<compile_context>
chip_gen: v7x
topology: tpu7x:2x2x1
jax: 0.10.0
libtpu: 0.0.40
codegen_flags: <defaults>
</compile_context>

<pallas_src>
import functools

import jax
import jax.numpy as jnp
from jax import lax
from jax.experimental import pallas as pl
from jax.experimental.pallas import tpu as pltpu

LOG_STD_MAX = 2.0
LOG_STD_MIN = -10.0
LANE = 128  # pad feature/channel dims to full 128-lane vregs


def _vmem_spec():
    return pl.BlockSpec(memory_space=pltpu.MemorySpace.VMEM)


def _round_up(x, m):
    return ((x + m - 1) // m) * m


def _pad_to(x, shape):
    return jnp.pad(x, [(0, t - s) for s, t in zip(x.shape, shape)])


# ------------------------------ fused kernel ------------------------------- #

def _sacae_fused_kernel(x_ph_ref, w1_ref, b1_ref, w2_ref, b2_ref,
                        wenc_ref, benc_ref, g_ref, beta_ref,
                        wfc1_ref, bfc1_ref, wfc2_ref, bfc2_ref,
                        whead_ref, bhead_ref, *rest,
                        batch, pw, blk, l1, l2, oh2, ow2, f_real,
                        act_scale, act_bias, greedy):
    if greedy:
        o_ref, feat_acc = rest
    else:
        eps_ref, o_ref, feat_acc = rest

    bf16 = jnp.bfloat16
    c1 = w1_ref.shape[-1]       # padded conv channels (128)
    fdim = wenc_ref.shape[-1]   # padded features_dim (128)

    # ---- conv1 (3x3, stride 2, pad 0) + ReLU --------------------------------
    # Input arrives as 4 stride-phases, each flattened to rows b*blk + i*pw + j
    # (the conv1 output grid).  Every tap is then a pure contiguous row-shift,
    # so the conv is 9 accumulated (rows, Cin) x (Cin, C1) matmuls in VMEM.
    phases = [x_ph_ref[p] for p in range(4)]            # each (batch*blk, cin) f32
    acc1 = jnp.zeros((l1, c1), jnp.float32)
    for ki in range(3):
        for kj in range(3):
            p = (ki % 2) * 2 + (kj % 2)
            sh = (ki // 2) * pw + (kj // 2)
            xs = phases[p][sh:sh + l1, :].astype(bf16)
            acc1 = acc1 + jnp.dot(xs, w1_ref[ki * 3 + kj],
                                  preferred_element_type=jnp.float32)
    h1 = jnp.maximum(acc1 + b1_ref[...], 0.0)           # (l1, c1) f32

    # ---- conv2 (3x3, stride 1, pad 0) + ReLU (same row-shift trick) ---------
    acc2 = jnp.zeros((l2, c1), jnp.float32)
    for ki in range(3):
        for kj in range(3):
            sh = ki * pw + kj
            xs = h1[sh:sh + l2, :].astype(bf16)
            acc2 = acc2 + jnp.dot(xs, w2_ref[ki * 3 + kj],
                                  preferred_element_type=jnp.float32)
    h2 = jnp.maximum(acc2 + b2_ref[...], 0.0)           # (l2, c1) f32

    # ---- flatten + encoder Linear ------------------------------------------
    # Gather the oh2*ow2 valid anchor rows of each batch element and accumulate
    # the encoder projection position-by-position (f32 accumulator in VMEM).
    for b in range(batch):
        row = jnp.zeros((1, fdim), jnp.float32)
        for m in range(oh2):
            for n in range(ow2):
                a = b * blk + m * pw + n
                xs = h2[a:a + 1, :].astype(bf16)
                row = row + jnp.dot(xs, wenc_ref[m * ow2 + n],
                                    preferred_element_type=jnp.float32)
        feat_acc[b:b + 1, :] = row
    y = feat_acc[...] + benc_ref[...]                   # (batch, fdim) f32

    # ---- LayerNorm(eps=1e-5) over the REAL features_dim, then tanh ----------
    # Padded columns of y are exactly zero (zero-padded weights/bias), so the
    # sums over 128 lanes equal sums over the real f_real features.
    mean = jnp.sum(y, axis=-1, keepdims=True) * (1.0 / f_real)
    col = lax.broadcasted_iota(jnp.int32, (1, fdim), 1)
    mask = (col < f_real).astype(jnp.float32)
    cen = (y - mean) * mask
    var = jnp.sum(cen * cen, axis=-1, keepdims=True) * (1.0 / f_real)
    feat = jnp.tanh(cen * lax.rsqrt(var + 1e-5) * g_ref[...] + beta_ref[...])

    # ---- actor trunk: Linear+ReLU -> Linear+ReLU ----------------------------
    h = jnp.dot(feat.astype(bf16), wfc1_ref[...], preferred_element_type=jnp.float32)
    h = jnp.maximum(h + bfc1_ref[...], 0.0)
    h = jnp.dot(h.astype(bf16), wfc2_ref[...], preferred_element_type=jnp.float32)
    h = jnp.maximum(h + bfc2_ref[...], 0.0)

    # ---- fused mean|logstd head + tanh squashing ----------------------------
    head = jnp.dot(h.astype(bf16), whead_ref[...], preferred_element_type=jnp.float32)
    head = head + bhead_ref[...]
    if greedy:
        o_ref[...] = jnp.tanh(head) * act_scale + act_bias
    else:
        apad = head.shape[-1] // 2
        mean_a = head[:, :apad]
        log_std = jnp.tanh(head[:, apad:])
        log_std = LOG_STD_MIN + 0.5 * (LOG_STD_MAX - LOG_STD_MIN) * (log_std + 1.0)
        std = jnp.exp(log_std)
        x_t = mean_a + std * eps_ref[...]               # Normal(mean, std).rsample()
        o_ref[...] = jnp.tanh(x_t) * act_scale + act_bias


# --------------------------------- wrapper ---------------------------------- #

@functools.partial(jax.jit, static_argnames=("greedy", "features_dim", "act_dim",
                                             "action_scale", "action_bias"))
def sacae_player_forward(obs_nchw, weights, noise=None, *, greedy=False,
                         features_dim, act_dim, action_scale=1.0, action_bias=0.0):
    x = jnp.transpose(obs_nchw, (0, 2, 3, 1)).astype(jnp.float32)  # NCHW -> NHWC
    B, H, W_, cin = x.shape
    assert H % 2 == 0 and W_ % 2 == 0 and H >= 8 and W_ >= 8
    ph_h, ph_w = H // 2, W_ // 2
    blk = ph_h * ph_w
    oh1, ow1 = ph_h - 1, ph_w - 1          # conv1 (3x3, s=2, p=0) output size
    oh2, ow2 = oh1 - 2, ow1 - 2            # conv2 (3x3, s=1, p=0) output size
    l1 = (B - 1) * blk + (oh1 - 1) * ph_w + ow1
    l2 = (B - 1) * blk + (oh2 - 1) * ph_w + ow2

    # stride-2 phase decomposition: 4 disjoint views = exactly the input once
    phases = jnp.stack(
        [x[:, pi::2, pj::2, :].reshape(B * blk, cin)
         for pi in (0, 1) for pj in (0, 1)], axis=0)               # (4, B*blk, cin)

    c1 = weights["w1"].shape[-1]
    fdim = weights["wenc"].shape[-1]
    hid = weights["wfc1"].shape[-1]
    apad = weights["whead"].shape[-1] // 2

    if greedy:
        # specialized signature: no logstd weights, no eps DMA
        whead = weights["whead"][:, :apad]
        bhead = weights["bhead"][:, :apad]
        extra = ()
    else:
        assert noise is not None
        whead = weights["whead"]
        bhead = weights["bhead"]
        eps = jnp.zeros((B, apad), jnp.float32).at[:, :act_dim].set(noise)
        extra = (eps,)

    args = (phases, weights["w1"], weights["b1"], weights["w2"], weights["b2"],
            weights["wenc"], weights["benc"], weights["ln_g"], weights["ln_b"],
            weights["wfc1"], weights["bfc1"], weights["wfc2"], weights["bfc2"],
            whead, bhead) + extra

    flops = 2 * (9 * l1 * cin * c1 + 9 * l2 * c1 * c1
                 + B * oh2 * ow2 * c1 * fdim + B * fdim * hid
                 + B * hid * hid + B * hid * whead.shape[-1])
    bytes_accessed = sum(int(a.size) * a.dtype.itemsize for a in args) + B * apad * 4
    cost = pl.CostEstimate(flops=int(flops),
                           transcendentals=int(B * (fdim + 3 * apad)),
                           bytes_accessed=int(bytes_accessed))

    kernel = functools.partial(
        _sacae_fused_kernel,
        batch=B, pw=ph_w, blk=blk, l1=l1, l2=l2, oh2=oh2, ow2=ow2,
        f_real=features_dim, act_scale=float(action_scale),
        act_bias=float(action_bias), greedy=greedy)

    out = pl.pallas_call(
        kernel,
        out_shape=jax.ShapeDtypeStruct((B, apad), jnp.float32),
        in_specs=[_vmem_spec()] * len(args),
        out_specs=_vmem_spec(),
        scratch_shapes=[pltpu.VMEM((B, fdim), jnp.float32)],
        cost_estimate=cost,
    )(*args)
    return out[:, :act_dim]


# ------------------------------ parameter init ------------------------------ #

def _init_linear(key, fan_in, fan_out):
    kw, kb = jax.random.split(key)
    bound = 1.0 / float(fan_in) ** 0.5
    w = jax.random.uniform(kw, (fan_in, fan_out), jnp.float32, -bound, bound)
    b = jax.random.uniform(kb, (fan_out,), jnp.float32, -bound, bound)
    return w, b


def init_params(key, in_channels, hw, cnn_channels, features_dim, hidden, act_dim,
                action_low=-1.0, action_high=1.0):
    ks = jax.random.split(key, 8)
    w1, b1 = _init_linear(ks[0], 3 * 3 * in_channels, cnn_channels)
    w2, b2 = _init_linear(ks[1], 3 * 3 * cnn_channels, cnn_channels)
    oh1 = (hw - 3) // 2 + 1
    oh2 = (oh1 - 3) // 1 + 1
    flat = oh2 * oh2 * cnn_channels
    enc_w, enc_b = _init_linear(ks[2], flat, features_dim)
    fc1_w, fc1_b = _init_linear(ks[3], features_dim, hidden)
    fc2_w, fc2_b = _init_linear(ks[4], hidden, hidden)
    mean_w, mean_b = _init_linear(ks[5], hidden, act_dim)
    ls_w, ls_b = _init_linear(ks[6], hidden, act_dim)
    return {
        "conv1_w": w1.reshape(3, 3, in_channels, cnn_channels), "conv1_b": b1,
        "conv2_w": w2.reshape(3, 3, cnn_channels, cnn_channels), "conv2_b": b2,
        "enc_fc_w": enc_w, "enc_fc_b": enc_b,
        "ln_g": jnp.ones((features_dim,), jnp.float32),
        "ln_b": jnp.zeros((features_dim,), jnp.float32),
        "fc1_w": fc1_w, "fc1_b": fc1_b,
        "fc2_w": fc2_w, "fc2_b": fc2_b,
        "mean_w": mean_w, "mean_b": mean_b,
        "logstd_w": ls_w, "logstd_b": ls_b,
        "action_scale": jnp.asarray((action_high - action_low) / 2.0, jnp.float32),
        "action_bias": jnp.asarray((action_high + action_low) / 2.0, jnp.float32),
    }


def pack_params(p):
    """Pad every weight to 128-lane-dense shapes (zeros), fuse the mean|logstd
    head into one matrix and cast matmul weights to bf16 (f32 accumulation is
    done on the MXU via preferred_element_type)."""
    cin = p["conv1_w"].shape[2]
    c1r = p["conv1_w"].shape[3]
    fr = p["enc_fc_w"].shape[1]
    hr = p["fc1_w"].shape[1]
    ar = p["mean_w"].shape[1]
    n_pos = p["enc_fc_w"].shape[0] // c1r
    c1 = _round_up(c1r, LANE)
    fdim = _round_up(fr, LANE)
    hid = _round_up(hr, LANE)
    apad = _round_up(ar, LANE)

    whead = jnp.zeros((hid, 2 * apad), jnp.float32)
    whead = whead.at[:hr, :ar].set(p["mean_w"]).at[:hr, apad:apad + ar].set(p["logstd_w"])
    bhead = jnp.zeros((1, 2 * apad), jnp.float32)
    bhead = bhead.at[0, :ar].set(p["mean_b"]).at[0, apad:apad + ar].set(p["logstd_b"])

    weights = {
        "w1": _pad_to(p["conv1_w"].reshape(9, cin, c1r), (9, cin, c1)).astype(jnp.bfloat16),
        "b1": _pad_to(p["conv1_b"].reshape(1, c1r), (1, c1)),
        "w2": _pad_to(p["conv2_w"].reshape(9, c1r, c1r), (9, c1, c1)).astype(jnp.bfloat16),
        "b2": _pad_to(p["conv2_b"].reshape(1, c1r), (1, c1)),
        "wenc": _pad_to(p["enc_fc_w"].reshape(n_pos, c1r, fr), (n_pos, c1, fdim)).astype(jnp.bfloat16),
        "benc": _pad_to(p["enc_fc_b"].reshape(1, fr), (1, fdim)),
        "ln_g": _pad_to(p["ln_g"].reshape(1, fr), (1, fdim)),
        "ln_b": _pad_to(p["ln_b"].reshape(1, fr), (1, fdim)),
        "wfc1": _pad_to(p["fc1_w"], (fdim, hid)).astype(jnp.bfloat16),
        "bfc1": _pad_to(p["fc1_b"].reshape(1, hr), (1, hid)),
        "wfc2": _pad_to(p["fc2_w"], (hid, hid)).astype(jnp.bfloat16),
        "bfc2": _pad_to(p["fc2_b"].reshape(1, hr), (1, hid)),
        "whead": whead.astype(jnp.bfloat16),
        "bhead": bhead,
    }
    meta = {
        "features_dim": int(fr),
        "act_dim": int(ar),
        "action_scale": float(p["action_scale"]),
        "action_bias": float(p["action_bias"]),
    }
    return weights, meta


# ------------------------- pure-JAX reference (check) ----------------------- #

def _bf(v):
    return v.astype(jnp.bfloat16)


def reference_forward(obs_nchw, params, noise, greedy=False):
    x = jnp.transpose(obs_nchw, (0, 2, 3, 1)).astype(jnp.float32)

    def conv_relu(x, w, b, stride):
        B, H, W_, C = x.shape
        KH, KW, _, Co = w.shape
        OH = (H - KH) // stride + 1
        OW = (W_ - KW) // stride + 1
        cols = [x[:, i:i + stride * (OH - 1) + 1:stride,
                  j:j + stride * (OW - 1) + 1:stride, :]
                for i in range(KH) for j in range(KW)]
        patches = jnp.concatenate(cols, axis=-1).reshape(B * OH * OW, KH * KW * C)
        y = jnp.dot(_bf(patches), _bf(w.reshape(KH * KW * C, Co)),
                    preferred_element_type=jnp.float32) + b
        return jnp.maximum(y, 0.0).reshape(B, OH, OW, Co)

    x = conv_relu(x, params["conv1_w"], params["conv1_b"], 2)
    x = conv_relu(x, params["conv2_w"], params["conv2_b"], 1)
    B = x.shape[0]
    flat = x.reshape(B, -1)
    y = jnp.dot(_bf(flat), _bf(params["enc_fc_w"]),
                preferred_element_type=jnp.float32) + params["enc_fc_b"]
    mu = jnp.mean(y, axis=-1, keepdims=True)
    var = jnp.mean((y - mu) ** 2, axis=-1, keepdims=True)
    feat = jnp.tanh((y - mu) * lax.rsqrt(var + 1e-5) * params["ln_g"] + params["ln_b"])
    h = jnp.maximum(jnp.dot(_bf(feat), _bf(params["fc1_w"]),
                            preferred_element_type=jnp.float32) + params["fc1_b"], 0.0)
    h = jnp.maximum(jnp.dot(_bf(h), _bf(params["fc2_w"]),
                            preferred_element_type=jnp.float32) + params["fc2_b"], 0.0)
    mean = jnp.dot(_bf(h), _bf(params["mean_w"]),
                   preferred_element_type=jnp.float32) + params["mean_b"]
    if greedy:
        return jnp.tanh(mean) * params["action_scale"] + params["action_bias"]
    log_std = jnp.dot(_bf(h), _bf(params["logstd_w"]),
                      preferred_element_type=jnp.float32) + params["logstd_b"]
    log_std = jnp.tanh(log_std)
    log_std = LOG_STD_MIN + 0.5 * (LOG_STD_MAX - LOG_STD_MIN) * (log_std + 1.0)
    std = jnp.exp(log_std)
    x_t = mean + std * noise
    return jnp.tanh(x_t) * params["action_scale"] + params["action_bias"]


# ----------------------------------- main ----------------------------------- #

if __name__ == "__main__":
    B, C, H, W = 2, 4, 16, 16
    cnn_channels, features_dim, hidden, act_dim = 8, 32, 32, 4

    root = jax.random.PRNGKey(0)
    k_obs, k_par, k_eps = jax.random.split(root, 3)

    obs = jax.random.uniform(k_obs, (B, C, H, W), jnp.float32)        # NCHW
    params = init_params(k_par, C, H, cnn_channels, features_dim, hidden, act_dim)
    noise = jax.random.normal(k_eps, (B, act_dim), jnp.float32)       # rsample eps

    weights, meta = pack_params(params)

    sampled = sacae_player_forward(obs, weights, noise, greedy=False, **meta)
    greedy_a = sacae_player_forward(obs, weights, None, greedy=True, **meta)
    jax.block_until_ready(sampled)
    jax.block_until_ready(greedy_a)

    # correctness vs. pure-JAX reference (same bf16 matmul precision)
    ref_s = reference_forward(obs, params, noise, greedy=False)
    ref_g = reference_forward(obs, params, noise, greedy=True)
    err_s = float(jnp.max(jnp.abs(sampled - ref_s)))
    err_g = float(jnp.max(jnp.abs(greedy_a - ref_g)))

    assert sampled.shape == (B, act_dim) and greedy_a.shape == (B, act_dim)
    assert bool(jnp.all(jnp.isfinite(sampled))) and bool(jnp.all(jnp.isfinite(greedy_a)))
    assert bool(jnp.all(jnp.abs(sampled) <= 1.0 + 1e-6))  # tanh-squashed, scale=1, bias=0
    assert err_s < 2e-2 and err_g < 2e-2, (err_s, err_g)
    print("KERNEL_OK")
</pallas_src>

<mosaic_0001>
module attributes {stable_mosaic.version = 11 : i64} {
  func.func @_sacae_fused_kernel(%arg0: memref<4x128x4xf32, #tpu.memory_space<vmem>>, %arg1: memref<9x4x128xbf16, #tpu.memory_space<vmem>>, %arg2: memref<1x128xf32, #tpu.memory_space<vmem>>, %arg3: memref<9x128x128xbf16, #tpu.memory_space<vmem>>, %arg4: memref<1x128xf32, #tpu.memory_space<vmem>>, %arg5: memref<25x128x128xbf16, #tpu.memory_space<vmem>>, %arg6: memref<1x128xf32, #tpu.memory_space<vmem>>, %arg7: memref<1x128xf32, #tpu.memory_space<vmem>>, %arg8: memref<1x128xf32, #tpu.memory_space<vmem>>, %arg9: memref<128x128xbf16, #tpu.memory_space<vmem>>, %arg10: memref<1x128xf32, #tpu.memory_space<vmem>>, %arg11: memref<128x128xbf16, #tpu.memory_space<vmem>>, %arg12: memref<1x128xf32, #tpu.memory_space<vmem>>, %arg13: memref<128x256xbf16, #tpu.memory_space<vmem>>, %arg14: memref<1x256xf32, #tpu.memory_space<vmem>>, %arg15: memref<2x128xf32, #tpu.memory_space<vmem>>, %arg16: memref<2x128xf32, #tpu.memory_space<vmem>>, %arg17: memref<2x128xf32, #tpu.memory_space<vmem>>) attributes {dimension_semantics = [], scalar_prefetch = 0 : i64, scratch_operands = 1 : i64, tpu.core_type = #tpu.core_type<tc>} {
    %c0 = arith.constant 0 : index
    %c0_0 = arith.constant 0 : index
    %c0_1 = arith.constant 0 : index
    %0 = vector.load %arg0[%c0, %c0_0, %c0_1] : memref<4x128x4xf32, #tpu.memory_space<vmem>>, vector<1x128x4xf32>
    %1 = vector.shape_cast %0 : vector<1x128x4xf32> to vector<128x4xf32>
    %c1 = arith.constant 1 : index
    %c0_2 = arith.constant 0 : index
    %c0_3 = arith.constant 0 : index
    %2 = vector.load %arg0[%c1, %c0_2, %c0_3] : memref<4x128x4xf32, #tpu.memory_space<vmem>>, vector<1x128x4xf32>
    %3 = vector.shape_cast %2 : vector<1x128x4xf32> to vector<128x4xf32>
    %c2 = arith.constant 2 : index
    %c0_4 = arith.constant 0 : index
    %c0_5 = arith.constant 0 : index
    %4 = vector.load %arg0[%c2, %c0_4, %c0_5] : memref<4x128x4xf32, #tpu.memory_space<vmem>>, vector<1x128x4xf32>
    %5 = vector.shape_cast %4 : vector<1x128x4xf32> to vector<128x4xf32>
    %c3 = arith.constant 3 : index
    %c0_6 = arith.constant 0 : index
    %c0_7 = arith.constant 0 : index
    %6 = vector.load %arg0[%c3, %c0_6, %c0_7] : memref<4x128x4xf32, #tpu.memory_space<vmem>>, vector<1x128x4xf32>
    %7 = vector.shape_cast %6 : vector<1x128x4xf32> to vector<128x4xf32>
    %cst = arith.constant 0.000000e+00 : f32
    %8 = vector.broadcast %cst : f32 to vector<119x128xf32>
    %9 = vector.extract_strided_slice %1 {offsets = [0, 0], sizes = [119, 4], strides = [1, 1]} : vector<128x4xf32> to vector<119x4xf32>
    %10 = arith.truncf %9 : vector<119x4xf32> to vector<119x4xbf16>
    %c0_8 = arith.constant 0 : index
    %c0_9 = arith.constant 0 : index
    %c0_10 = arith.constant 0 : index
    %11 = vector.load %arg1[%c0_8, %c0_9, %c0_10] : memref<9x4x128xbf16, #tpu.memory_space<vmem>>, vector<1x4x128xbf16>
    %12 = vector.shape_cast %11 : vector<1x4x128xbf16> to vector<4x128xbf16>
    %cst_11 = arith.constant dense<0.000000e+00> : vector<119x128xf32>
    %13 = tpu.matmul %10, %12, %cst_11 {dimension_numbers = #tpu.dot_dimension_numbers<[1], [0], [0], [1], [0, 0, 1, 1], [], []>} : vector<119x4xbf16>, vector<4x128xbf16>, vector<119x128xf32> -> vector<119x128xf32>
    %14 = arith.addf %8, %13 : vector<119x128xf32>
    %15 = vector.extract_strided_slice %3 {offsets = [0, 0], sizes = [119, 4], strides = [1, 1]} : vector<128x4xf32> to vector<119x4xf32>
    %16 = arith.truncf %15 : vector<119x4xf32> to vector<119x4xbf16>
    %c1_12 = arith.constant 1 : index
    %c0_13 = arith.constant 0 : index
    %c0_14 = arith.constant 0 : index
    %17 = vector.load %arg1[%c1_12, %c0_13, %c0_14] : memref<9x4x128xbf16, #tpu.memory_space<vmem>>, vector<1x4x128xbf16>
    %18 = vector.shape_cast %17 : vector<1x4x128xbf16> to vector<4x128xbf16>
    %cst_15 = arith.constant dense<0.000000e+00> : vector<119x128xf32>
    %19 = tpu.matmul %16, %18, %cst_15 {dimension_numbers = #tpu.dot_dimension_numbers<[1], [0], [0], [1], [0, 0, 1, 1], [], []>} : vector<119x4xbf16>, vector<4x128xbf16>, vector<119x128xf32> -> vector<119x128xf32>
    %20 = arith.addf %14, %19 : vector<119x128xf32>
    %21 = vector.extract_strided_slice %1 {offsets = [1, 0], sizes = [119, 4], strides = [1, 1]} : vector<128x4xf32> to vector<119x4xf32>
    %22 = arith.truncf %21 : vector<119x4xf32> to vector<119x4xbf16>
    %c2_16 = arith.constant 2 : index
    %c0_17 = arith.constant 0 : index
    %c0_18 = arith.constant 0 : index
    %23 = vector.load %arg1[%c2_16, %c0_17, %c0_18] : memref<9x4x128xbf16, #tpu.memory_space<vmem>>, vector<1x4x128xbf16>
    %24 = vector.shape_cast %23 : vector<1x4x128xbf16> to vector<4x128xbf16>
    %cst_19 = arith.constant dense<0.000000e+00> : vector<119x128xf32>
    %25 = tpu.matmul %22, %24, %cst_19 {dimension_numbers = #tpu.dot_dimension_numbers<[1], [0], [0], [1], [0, 0, 1, 1], [], []>} : vector<119x4xbf16>, vector<4x128xbf16>, vector<119x128xf32> -> vector<119x128xf32>
    %26 = arith.addf %20, %25 : vector<119x128xf32>
    %27 = vector.extract_strided_slice %5 {offsets = [0, 0], sizes = [119, 4], strides = [1, 1]} : vector<128x4xf32> to vector<119x4xf32>
    %28 = arith.truncf %27 : vector<119x4xf32> to vector<119x4xbf16>
    %c3_20 = arith.constant 3 : index
    %c0_21 = arith.constant 0 : index
    %c0_22 = arith.constant 0 : index
    %29 = vector.load %arg1[%c3_20, %c0_21, %c0_22] : memref<9x4x128xbf16, #tpu.memory_space<vmem>>, vector<1x4x128xbf16>
    %30 = vector.shape_cast %29 : vector<1x4x128xbf16> to vector<4x128xbf16>
    %cst_23 = arith.constant dense<0.000000e+00> : vector<119x128xf32>
    %31 = tpu.matmul %28, %30, %cst_23 {dimension_numbers = #tpu.dot_dimension_numbers<[1], [0], [0], [1], [0, 0, 1, 1], [], []>} : vector<119x4xbf16>, vector<4x128xbf16>, vector<119x128xf32> -> vector<119x128xf32>
    %32 = arith.addf %26, %31 : vector<119x128xf32>
    %33 = vector.extract_strided_slice %7 {offsets = [0, 0], sizes = [119, 4], strides = [1, 1]} : vector<128x4xf32> to vector<119x4xf32>
    %34 = arith.truncf %33 : vector<119x4xf32> to vector<119x4xbf16>
    %c4 = arith.constant 4 : index
    %c0_24 = arith.constant 0 : index
    %c0_25 = arith.constant 0 : index
    %35 = vector.load %arg1[%c4, %c0_24, %c0_25] : memref<9x4x128xbf16, #tpu.memory_space<vmem>>, vector<1x4x128xbf16>
    %36 = vector.shape_cast %35 : vector<1x4x128xbf16> to vector<4x128xbf16>
    %cst_26 = arith.constant dense<0.000000e+00> : vector<119x128xf32>
    %37 = tpu.matmul %34, %36, %cst_26 {dimension_numbers = #tpu.dot_dimension_numbers<[1], [0], [0], [1], [0, 0, 1, 1], [], []>} : vector<119x4xbf16>, vector<4x128xbf16>, vector<119x128xf32> -> vector<119x128xf32>
    %38 = arith.addf %32, %37 : vector<119x128xf32>
    %39 = vector.extract_strided_slice %5 {offsets = [1, 0], sizes = [119, 4], strides = [1, 1]} : vector<128x4xf32> to vector<119x4xf32>
    %40 = arith.truncf %39 : vector<119x4xf32> to vector<119x4xbf16>
    %c5 = arith.constant 5 : index
    %c0_27 = arith.constant 0 : index
    %c0_28 = arith.constant 0 : index
    %41 = vector.load %arg1[%c5, %c0_27, %c0_28] : memref<9x4x128xbf16, #tpu.memory_space<vmem>>, vector<1x4x128xbf16>
    %42 = vector.shape_cast %41 : vector<1x4x128xbf16> to vector<4x128xbf16>
    %cst_29 = arith.constant dense<0.000000e+00> : vector<119x128xf32>
    %43 = tpu.matmul %40, %42, %cst_29 {dimension_numbers = #tpu.dot_dimension_numbers<[1], [0], [0], [1], [0, 0, 1, 1], [], []>} : vector<119x4xbf16>, vector<4x128xbf16>, vector<119x128xf32> -> vector<119x128xf32>
    %44 = arith.addf %38, %43 : vector<119x128xf32>
    %45 = vector.extract_strided_slice %1 {offsets = [8, 0], sizes = [119, 4], strides = [1, 1]} : vector<128x4xf32> to vector<119x4xf32>
    %46 = arith.truncf %45 : vector<119x4xf32> to vector<119x4xbf16>
    %c6 = arith.constant 6 : index
    %c0_30 = arith.constant 0 : index
    %c0_31 = arith.constant 0 : index
    %47 = vector.load %arg1[%c6, %c0_30, %c0_31] : memref<9x4x128xbf16, #tpu.memory_space<vmem>>, vector<1x4x128xbf16>
    %48 = vector.shape_cast %47 : vector<1x4x128xbf16> to vector<4x128xbf16>
    %cst_32 = arith.constant dense<0.000000e+00> : vector<119x128xf32>
    %49 = tpu.matmul %46, %48, %cst_32 {dimension_numbers = #tpu.dot_dimension_numbers<[1], [0], [0], [1], [0, 0, 1, 1], [], []>} : vector<119x4xbf16>, vector<4x128xbf16>, vector<119x128xf32> -> vector<119x128xf32>
    %50 = arith.addf %44, %49 : vector<119x128xf32>
    %51 = vector.extract_strided_slice %3 {offsets = [8, 0], sizes = [119, 4], strides = [1, 1]} : vector<128x4xf32> to vector<119x4xf32>
    %52 = arith.truncf %51 : vector<119x4xf32> to vector<119x4xbf16>
    %c7 = arith.constant 7 : index
    %c0_33 = arith.constant 0 : index
    %c0_34 = arith.constant 0 : index
    %53 = vector.load %arg1[%c7, %c0_33, %c0_34] : memref<9x4x128xbf16, #tpu.memory_space<vmem>>, vector<1x4x128xbf16>
    %54 = vector.shape_cast %53 : vector<1x4x128xbf16> to vector<4x128xbf16>
    %cst_35 = arith.constant dense<0.000000e+00> : vector<119x128xf32>
    %55 = tpu.matmul %52, %54, %cst_35 {dimension_numbers = #tpu.dot_dimension_numbers<[1], [0], [0], [1], [0, 0, 1, 1], [], []>} : vector<119x4xbf16>, vector<4x128xbf16>, vector<119x128xf32> -> vector<119x128xf32>
    %56 = arith.addf %50, %55 : vector<119x128xf32>
    %57 = vector.extract_strided_slice %1 {offsets = [9, 0], sizes = [119, 4], strides = [1, 1]} : vector<128x4xf32> to vector<119x4xf32>
    %58 = arith.truncf %57 : vector<119x4xf32> to vector<119x4xbf16>
    %c8 = arith.constant 8 : index
    %c0_36 = arith.constant 0 : index
    %c0_37 = arith.constant 0 : index
    %59 = vector.load %arg1[%c8, %c0_36, %c0_37] : memref<9x4x128xbf16, #tpu.memory_space<vmem>>, vector<1x4x128xbf16>
    %60 = vector.shape_cast %59 : vector<1x4x128xbf16> to vector<4x128xbf16>
    %cst_38 = arith.constant dense<0.000000e+00> : vector<119x128xf32>
    %61 = tpu.matmul %58, %60, %cst_38 {dimension_numbers = #tpu.dot_dimension_numbers<[1], [0], [0], [1], [0, 0, 1, 1], [], []>} : vector<119x4xbf16>, vector<4x128xbf16>, vector<119x128xf32> -> vector<119x128xf32>
    %62 = arith.addf %56, %61 : vector<119x128xf32>
    %c0_39 = arith.constant 0 : index
    %c0_40 = arith.constant 0 : index
    %63 = vector.load %arg2[%c0_39, %c0_40] : memref<1x128xf32, #tpu.memory_space<vmem>>, vector<1x128xf32>
    %64 = vector.broadcast %63 : vector<1x128xf32> to vector<119x128xf32>
    %65 = arith.addf %62, %64 : vector<119x128xf32>
    %cst_41 = arith.constant 0.000000e+00 : f32
    %66 = vector.broadcast %cst_41 : f32 to vector<119x128xf32>
    %67 = arith.maximumf %65, %66 : vector<119x128xf32>
    %cst_42 = arith.constant 0.000000e+00 : f32
    %68 = vector.broadcast %cst_42 : f32 to vector<101x128xf32>
    %69 = vector.extract_strided_slice %67 {offsets = [0, 0], sizes = [101, 128], strides = [1, 1]} : vector<119x128xf32> to vector<101x128xf32>
    %70 = arith.truncf %69 : vector<101x128xf32> to vector<101x128xbf16>
    %c0_43 = arith.constant 0 : index
    %c0_44 = arith.constant 0 : index
    %c0_45 = arith.constant 0 : index
    %71 = vector.load %arg3[%c0_43, %c0_44, %c0_45] : memref<9x128x128xbf16, #tpu.memory_space<vmem>>, vector<1x128x128xbf16>
    %72 = vector.shape_cast %71 : vector<1x128x128xbf16> to vector<128x128xbf16>
    %cst_46 = arith.constant dense<0.000000e+00> : vector<101x128xf32>
    %73 = tpu.matmul %70, %72, %cst_46 {dimension_numbers = #tpu.dot_dimension_numbers<[1], [0], [0], [1], [0, 0, 1, 1], [], []>} : vector<101x128xbf16>, vector<128x128xbf16>, vector<101x128xf32> -> vector<101x128xf32>
    %74 = arith.addf %68, %73 : vector<101x128xf32>
    %75 = vector.extract_strided_slice %67 {offsets = [1, 0], sizes = [101, 128], strides = [1, 1]} : vector<119x128xf32> to vector<101x128xf32>
    %76 = arith.truncf %75 : vector<101x128xf32> to vector<101x128xbf16>
    %c1_47 = arith.constant 1 : index
    %c0_48 = arith.constant 0 : index
    %c0_49 = arith.constant 0 : index
    %77 = vector.load %arg3[%c1_47, %c0_48, %c0_49] : memref<9x128x128xbf16, #tpu.memory_space<vmem>>, vector<1x128x128xbf16>
    %78 = vector.shape_cast %77 : vector<1x128x128xbf16> to vector<128x128xbf16>
    %cst_50 = arith.constant dense<0.000000e+00> : vector<101x128xf32>
    %79 = tpu.matmul %76, %78, %cst_50 {dimension_numbers = #tpu.dot_dimension_numbers<[1], [0], [0], [1], [0, 0, 1, 1], [], []>} : vector<101x128xbf16>, vector<128x128xbf16>, vector<101x128xf32> -> vector<101x128xf32>
    %80 = arith.addf %74, %79 : vector<101x128xf32>
    %81 = vector.extract_strided_slice %67 {offsets = [2, 0], sizes = [101, 128], strides = [1, 1]} : vector<119x128xf32> to vector<101x128xf32>
    %82 = arith.truncf %81 : vector<101x128xf32> to vector<101x128xbf16>
    %c2_51 = arith.constant 2 : index
    %c0_52 = arith.constant 0 : index
    %c0_53 = arith.constant 0 : index
    %83 = vector.load %arg3[%c2_51, %c0_52, %c0_53] : memref<9x128x128xbf16, #tpu.memory_space<vmem>>, vector<1x128x128xbf16>
    %84 = vector.shape_cast %83 : vector<1x128x128xbf16> to vector<128x128xbf16>
    %cst_54 = arith.constant dense<0.000000e+00> : vector<101x128xf32>
    %85 = tpu.matmul %82, %84, %cst_54 {dimension_numbers = #tpu.dot_dimension_numbers<[1], [0], [0], [1], [0, 0, 1, 1], [], []>} : vector<101x128xbf16>, vector<128x128xbf16>, vector<101x128xf32> -> vector<101x128xf32>
    %86 = arith.addf %80, %85 : vector<101x128xf32>
    %87 = vector.extract_strided_slice %67 {offsets = [8, 0], sizes = [101, 128], strides = [1, 1]} : vector<119x128xf32> to vector<101x128xf32>
    %88 = arith.truncf %87 : vector<101x128xf32> to vector<101x128xbf16>
    %c3_55 = arith.constant 3 : index
    %c0_56 = arith.constant 0 : index
    %c0_57 = arith.constant 0 : index
    %89 = vector.load %arg3[%c3_55, %c0_56, %c0_57] : memref<9x128x128xbf16, #tpu.memory_space<vmem>>, vector<1x128x128xbf16>
    %90 = vector.shape_cast %89 : vector<1x128x128xbf16> to vector<128x128xbf16>
    %cst_58 = arith.constant dense<0.000000e+00> : vector<101x128xf32>
    %91 = tpu.matmul %88, %90, %cst_58 {dimension_numbers = #tpu.dot_dimension_numbers<[1], [0], [0], [1], [0, 0, 1, 1], [], []>} : vector<101x128xbf16>, vector<128x128xbf16>, vector<101x128xf32> -> vector<101x128xf32>
    %92 = arith.addf %86, %91 : vector<101x128xf32>
    %93 = vector.extract_strided_slice %67 {offsets = [9, 0], sizes = [101, 128], strides = [1, 1]} : vector<119x128xf32> to vector<101x128xf32>
    %94 = arith.truncf %93 : vector<101x128xf32> to vector<101x128xbf16>
    %c4_59 = arith.constant 4 : index
    %c0_60 = arith.constant 0 : index
    %c0_61 = arith.constant 0 : index
    %95 = vector.load %arg3[%c4_59, %c0_60, %c0_61] : memref<9x128x128xbf16, #tpu.memory_space<vmem>>, vector<1x128x128xbf16>
    %96 = vector.shape_cast %95 : vector<1x128x128xbf16> to vector<128x128xbf16>
    %cst_62 = arith.constant dense<0.000000e+00> : vector<101x128xf32>
    %97 = tpu.matmul %94, %96, %cst_62 {dimension_numbers = #tpu.dot_dimension_numbers<[1], [0], [0], [1], [0, 0, 1, 1], [], []>} : vector<101x128xbf16>, vector<128x128xbf16>, vector<101x128xf32> -> vector<101x128xf32>
    %98 = arith.addf %92, %97 : vector<101x128xf32>
    %99 = vector.extract_strided_slice %67 {offsets = [10, 0], sizes = [101, 128], strides = [1, 1]} : vector<119x128xf32> to vector<101x128xf32>
    %100 = arith.truncf %99 : vector<101x128xf32> to vector<101x128xbf16>
    %c5_63 = arith.constant 5 : index
    %c0_64 = arith.constant 0 : index
    %c0_65 = arith.constant 0 : index
    %101 = vector.load %arg3[%c5_63, %c0_64, %c0_65] : memref<9x128x128xbf16, #tpu.memory_space<vmem>>, vector<1x128x128xbf16>
    %102 = vector.shape_cast %101 : vector<1x128x128xbf16> to vector<128x128xbf16>
    %cst_66 = arith.constant dense<0.000000e+00> : vector<101x128xf32>
    %103 = tpu.matmul %100, %102, %cst_66 {dimension_numbers = #tpu.dot_dimension_numbers<[1], [0], [0], [1], [0, 0, 1, 1], [], []>} : vector<101x128xbf16>, vector<128x128xbf16>, vector<101x128xf32> -> vector<101x128xf32>
    %104 = arith.addf %98, %103 : vector<101x128xf32>
    %105 = vector.extract_strided_slice %67 {offsets = [16, 0], sizes = [101, 128], strides = [1, 1]} : vector<119x128xf32> to vector<101x128xf32>
    %106 = arith.truncf %105 : vector<101x128xf32> to vector<101x128xbf16>
    %c6_67 = arith.constant 6 : index
    %c0_68 = arith.constant 0 : index
    %c0_69 = arith.constant 0 : index
    %107 = vector.load %arg3[%c6_67, %c0_68, %c0_69] : memref<9x128x128xbf16, #tpu.memory_space<vmem>>, vector<1x128x128xbf16>
    %108 = vector.shape_cast %107 : vector<1x128x128xbf16> to vector<128x128xbf16>
    %cst_70 = arith.constant dense<0.000000e+00> : vector<101x128xf32>
    %109 = tpu.matmul %106, %108, %cst_70 {dimension_numbers = #tpu.dot_dimension_numbers<[1], [0], [0], [1], [0, 0, 1, 1], [], []>} : vector<101x128xbf16>, vector<128x128xbf16>, vector<101x128xf32> -> vector<101x128xf32>
    %110 = arith.addf %104, %109 : vector<101x128xf32>
    %111 = vector.extract_strided_slice %67 {offsets = [17, 0], sizes = [101, 128], strides = [1, 1]} : vector<119x128xf32> to vector<101x128xf32>
    %112 = arith.truncf %111 : vector<101x128xf32> to vector<101x128xbf16>
    %c7_71 = arith.constant 7 : index
    %c0_72 = arith.constant 0 : index
    %c0_73 = arith.constant 0 : index
    %113 = vector.load %arg3[%c7_71, %c0_72, %c0_73] : memref<9x128x128xbf16, #tpu.memory_space<vmem>>, vector<1x128x128xbf16>
    %114 = vector.shape_cast %113 : vector<1x128x128xbf16> to vector<128x128xbf16>
    %cst_74 = arith.constant dense<0.000000e+00> : vector<101x128xf32>
    %115 = tpu.matmul %112, %114, %cst_74 {dimension_numbers = #tpu.dot_dimension_numbers<[1], [0], [0], [1], [0, 0, 1, 1], [], []>} : vector<101x128xbf16>, vector<128x128xbf16>, vector<101x128xf32> -> vector<101x128xf32>
    %116 = arith.addf %110, %115 : vector<101x128xf32>
    %117 = vector.extract_strided_slice %67 {offsets = [18, 0], sizes = [101, 128], strides = [1, 1]} : vector<119x128xf32> to vector<101x128xf32>
    %118 = arith.truncf %117 : vector<101x128xf32> to vector<101x128xbf16>
    %c8_75 = arith.constant 8 : index
    %c0_76 = arith.constant 0 : index
    %c0_77 = arith.constant 0 : index
    %119 = vector.load %arg3[%c8_75, %c0_76, %c0_77] : memref<9x128x128xbf16, #tpu.memory_space<vmem>>, vector<1x128x128xbf16>
    %120 = vector.shape_cast %119 : vector<1x128x128xbf16> to vector<128x128xbf16>
    %cst_78 = arith.constant dense<0.000000e+00> : vector<101x128xf32>
    %121 = tpu.matmul %118, %120, %cst_78 {dimension_numbers = #tpu.dot_dimension_numbers<[1], [0], [0], [1], [0, 0, 1, 1], [], []>} : vector<101x128xbf16>, vector<128x128xbf16>, vector<101x128xf32> -> vector<101x128xf32>
    %122 = arith.addf %116, %121 : vector<101x128xf32>
    %c0_79 = arith.constant 0 : index
    %c0_80 = arith.constant 0 : index
    %123 = vector.load %arg4[%c0_79, %c0_80] : memref<1x128xf32, #tpu.memory_space<vmem>>, vector<1x128xf32>
    %124 = vector.broadcast %123 : vector<1x128xf32> to vector<101x128xf32>
    %125 = arith.addf %122, %124 : vector<101x128xf32>
    %cst_81 = arith.constant 0.000000e+00 : f32
    %126 = vector.broadcast %cst_81 : f32 to vector<101x128xf32>
    %127 = arith.maximumf %125, %126 : vector<101x128xf32>
    %cst_82 = arith.constant 0.000000e+00 : f32
    %128 = vector.broadcast %cst_82 : f32 to vector<1x128xf32>
    %129 = vector.extract_strided_slice %127 {offsets = [0, 0], sizes = [1, 128], strides = [1, 1]} : vector<101x128xf32> to vector<1x128xf32>
    %130 = arith.truncf %129 : vector<1x128xf32> to vector<1x128xbf16>
    %c0_83 = arith.constant 0 : index
    %c0_84 = arith.constant 0 : index
    %c0_85 = arith.constant 0 : index
    %131 = vector.load %arg5[%c0_83, %c0_84, %c0_85] : memref<25x128x128xbf16, #tpu.memory_space<vmem>>, vector<1x128x128xbf16>
    %132 = vector.shape_cast %131 : vector<1x128x128xbf16> to vector<128x128xbf16>
    %cst_86 = arith.constant dense<0.000000e+00> : vector<1x128xf32>
    %133 = tpu.matmul %130, %132, %cst_86 {dimension_numbers = #tpu.dot_dimension_numbers<[1], [0], [0], [1], [0, 0, 1, 1], [], []>} : vector<1x128xbf16>, vector<128x128xbf16>, vector<1x128xf32> -> vector<1x128xf32>
    %134 = arith.addf %128, %133 : vector<1x128xf32>
    %135 = vector.extract_strided_slice %127 {offsets = [1, 0], sizes = [1, 128], strides = [1, 1]} : vector<101x128xf32> to vector<1x128xf32>
    %136 = arith.truncf %135 : vector<1x128xf32> to vector<1x128xbf16>
    %c1_87 = arith.constant 1 : index
    %c0_88 = arith.constant 0 : index
    %c0_89 = arith.constant 0 : index
    %137 = vector.load %arg5[%c1_87, %c0_88, %c0_89] : memref<25x128x128xbf16, #tpu.memory_space<vmem>>, vector<1x128x128xbf16>
    %138 = vector.shape_cast %137 : vector<1x128x128xbf16> to vector<128x128xbf16>
    %cst_90 = arith.constant dense<0.000000e+00> : vector<1x128xf32>
    %139 = tpu.matmul %136, %138, %cst_90 {dimension_numbers = #tpu.dot_dimension_numbers<[1], [0], [0], [1], [0, 0, 1, 1], [], []>} : vector<1x128xbf16>, vector<128x128xbf16>, vector<1x128xf32> -> vector<1x128xf32>
    %140 = arith.addf %134, %139 : vector<1x128xf32>
    %141 = vector.extract_strided_slice %127 {offsets = [2, 0], sizes = [1, 128], strides = [1, 1]} : vector<101x128xf32> to vector<1x128xf32>
    %142 = arith.truncf %141 : vector<1x128xf32> to vector<1x128xbf16>
    %c2_91 = arith.constant 2 : index
    %c0_92 = arith.constant 0 : index
    %c0_93 = arith.constant 0 : index
    %143 = vector.load %arg5[%c2_91, %c0_92, %c0_93] : memref<25x128x128xbf16, #tpu.memory_space<vmem>>, vector<1x128x128xbf16>
    %144 = vector.shape_cast %143 : vector<1x128x128xbf16> to vector<128x128xbf16>
    %cst_94 = arith.constant dense<0.000000e+00> : vector<1x128xf32>
    %145 = tpu.matmul %142, %144, %cst_94 {dimension_numbers = #tpu.dot_dimension_numbers<[1], [0], [0], [1], [0, 0, 1, 1], [], []>} : vector<1x128xbf16>, vector<128x128xbf16>, vector<1x128xf32> -> vector<1x128xf32>
    %146 = arith.addf %140, %145 : vector<1x128xf32>
    %147 = vector.extract_strided_slice %127 {offsets = [3, 0], sizes = [1, 128], strides = [1, 1]} : vector<101x128xf32> to vector<1x128xf32>
    %148 = arith.truncf %147 : vector<1x128xf32> to vector<1x128xbf16>
    %c3_95 = arith.constant 3 : index
    %c0_96 = arith.constant 0 : index
    %c0_97 = arith.constant 0 : index
    %149 = vector.load %arg5[%c3_95, %c0_96, %c0_97] : memref<25x128x128xbf16, #tpu.memory_space<vmem>>, vector<1x128x128xbf16>
    %150 = vector.shape_cast %149 : vector<1x128x128xbf16> to vector<128x128xbf16>
    %cst_98 = arith.constant dense<0.000000e+00> : vector<1x128xf32>
    %151 = tpu.matmul %148, %150, %cst_98 {dimension_numbers = #tpu.dot_dimension_numbers<[1], [0], [0], [1], [0, 0, 1, 1], [], []>} : vector<1x128xbf16>, vector<128x128xbf16>, vector<1x128xf32> -> vector<1x128xf32>
    %152 = arith.addf %146, %151 : vector<1x128xf32>
    %153 = vector.extract_strided_slice %127 {offsets = [4, 0], sizes = [1, 128], strides = [1, 1]} : vector<101x128xf32> to vector<1x128xf32>
    %154 = arith.truncf %153 : vector<1x128xf32> to vector<1x128xbf16>
    %c4_99 = arith.constant 4 : index
    %c0_100 = arith.constant 0 : index
    %c0_101 = arith.constant 0 : index
    %155 = vector.load %arg5[%c4_99, %c0_100, %c0_101] : memref<25x128x128xbf16, #tpu.memory_space<vmem>>, vector<1x128x128xbf16>
    %156 = vector.shape_cast %155 : vector<1x128x128xbf16> to vector<128x128xbf16>
    %cst_102 = arith.constant dense<0.000000e+00> : vector<1x128xf32>
    %157 = tpu.matmul %154, %156, %cst_102 {dimension_numbers = #tpu.dot_dimension_numbers<[1], [0], [0], [1], [0, 0, 1, 1], [], []>} : vector<1x128xbf16>, vector<128x128xbf16>, vector<1x128xf32> -> vector<1x128xf32>
    %158 = arith.addf %152, %157 : vector<1x128xf32>
    %159 = vector.extract_strided_slice %127 {offsets = [8, 0], sizes = [1, 128], strides = [1, 1]} : vector<101x128xf32> to vector<1x128xf32>
    %160 = arith.truncf %159 : vector<1x128xf32> to vector<1x128xbf16>
    %c5_103 = arith.constant 5 : index
    %c0_104 = arith.constant 0 : index
    %c0_105 = arith.constant 0 : index
    %161 = vector.load %arg5[%c5_103, %c0_104, %c0_105] : memref<25x128x128xbf16, #tpu.memory_space<vmem>>, vector<1x128x128xbf16>
    %162 = vector.shape_cast %161 : vector<1x128x128xbf16> to vector<128x128xbf16>
    %cst_106 = arith.constant dense<0.000000e+00> : vector<1x128xf32>
    %163 = tpu.matmul %160, %162, %cst_106 {dimension_numbers = #tpu.dot_dimension_numbers<[1], [0], [0], [1], [0, 0, 1, 1], [], []>} : vector<1x128xbf16>, vector<128x128xbf16>, vector<1x128xf32> -> vector<1x128xf32>
    %164 = arith.addf %158, %163 : vector<1x128xf32>
    %165 = vector.extract_strided_slice %127 {offsets = [9, 0], sizes = [1, 128], strides = [1, 1]} : vector<101x128xf32> to vector<1x128xf32>
    %166 = arith.truncf %165 : vector<1x128xf32> to vector<1x128xbf16>
    %c6_107 = arith.constant 6 : index
    %c0_108 = arith.constant 0 : index
    %c0_109 = arith.constant 0 : index
    %167 = vector.load %arg5[%c6_107, %c0_108, %c0_109] : memref<25x128x128xbf16, #tpu.memory_space<vmem>>, vector<1x128x128xbf16>
    %168 = vector.shape_cast %167 : vector<1x128x128xbf16> to vector<128x128xbf16>
    %cst_110 = arith.constant dense<0.000000e+00> : vector<1x128xf32>
    %169 = tpu.matmul %166, %168, %cst_110 {dimension_numbers = #tpu.dot_dimension_numbers<[1], [0], [0], [1], [0, 0, 1, 1], [], []>} : vector<1x128xbf16>, vector<128x128xbf16>, vector<1x128xf32> -> vector<1x128xf32>
    %170 = arith.addf %164, %169 : vector<1x128xf32>
    %171 = vector.extract_strided_slice %127 {offsets = [10, 0], sizes = [1, 128], strides = [1, 1]} : vector<101x128xf32> to vector<1x128xf32>
    %172 = arith.truncf %171 : vector<1x128xf32> to vector<1x128xbf16>
    %c7_111 = arith.constant 7 : index
    %c0_112 = arith.constant 0 : index
    %c0_113 = arith.constant 0 : index
    %173 = vector.load %arg5[%c7_111, %c0_112, %c0_113] : memref<25x128x128xbf16, #tpu.memory_space<vmem>>, vector<1x128x128xbf16>
    %174 = vector.shape_cast %173 : vector<1x128x128xbf16> to vector<128x128xbf16>
    %cst_114 = arith.constant dense<0.000000e+00> : vector<1x128xf32>
    %175 = tpu.matmul %172, %174, %cst_114 {dimension_numbers = #tpu.dot_dimension_numbers<[1], [0], [0], [1], [0, 0, 1, 1], [], []>} : vector<1x128xbf16>, vector<128x128xbf16>, vector<1x128xf32> -> vector<1x128xf32>
    %176 = arith.addf %170, %175 : vector<1x128xf32>
    %177 = vector.extract_strided_slice %127 {offsets = [11, 0], sizes = [1, 128], strides = [1, 1]} : vector<101x128xf32> to vector<1x128xf32>
    %178 = arith.truncf %177 : vector<1x128xf32> to vector<1x128xbf16>
    %c8_115 = arith.constant 8 : index
    %c0_116 = arith.constant 0 : index
    %c0_117 = arith.constant 0 : index
    %179 = vector.load %arg5[%c8_115, %c0_116, %c0_117] : memref<25x128x128xbf16, #tpu.memory_space<vmem>>, vector<1x128x128xbf16>
    %180 = vector.shape_cast %179 : vector<1x128x128xbf16> to vector<128x128xbf16>
    %cst_118 = arith.constant dense<0.000000e+00> : vector<1x128xf32>
    %181 = tpu.matmul %178, %180, %cst_118 {dimension_numbers = #tpu.dot_dimension_numbers<[1], [0], [0], [1], [0, 0, 1, 1], [], []>} : vector<1x128xbf16>, vector<128x128xbf16>, vector<1x128xf32> -> vector<1x128xf32>
    %182 = arith.addf %176, %181 : vector<1x128xf32>
    %183 = vector.extract_strided_slice %127 {offsets = [12, 0], sizes = [1, 128], strides = [1, 1]} : vector<101x128xf32> to vector<1x128xf32>
    %184 = arith.truncf %183 : vector<1x128xf32> to vector<1x128xbf16>
    %c9 = arith.constant 9 : index
    %c0_119 = arith.constant 0 : index
    %c0_120 = arith.constant 0 : index
    %185 = vector.load %arg5[%c9, %c0_119, %c0_120] : memref<25x128x128xbf16, #tpu.memory_space<vmem>>, vector<1x128x128xbf16>
    %186 = vector.shape_cast %185 : vector<1x128x128xbf16> to vector<128x128xbf16>
    %cst_121 = arith.constant dense<0.000000e+00> : vector<1x128xf32>
    %187 = tpu.matmul %184, %186, %cst_121 {dimension_numbers = #tpu.dot_dimension_numbers<[1], [0], [0], [1], [0, 0, 1, 1], [], []>} : vector<1x128xbf16>, vector<128x128xbf16>, vector<1x128xf32> -> vector<1x128xf32>
    %188 = arith.addf %182, %187 : vector<1x128xf32>
    %189 = vector.extract_strided_slice %127 {offsets = [16, 0], sizes = [1, 128], strides = [1, 1]} : vector<101x128xf32> to vector<1x128xf32>
    %190 = arith.truncf %189 : vector<1x128xf32> to vector<1x128xbf16>
    %c10 = arith.constant 10 : index
    %c0_122 = arith.constant 0 : index
    %c0_123 = arith.constant 0 : index
    %191 = vector.load %arg5[%c10, %c0_122, %c0_123] : memref<25x128x128xbf16, #tpu.memory_space<vmem>>, vector<1x128x128xbf16>
    %192 = vector.shape_cast %191 : vector<1x128x128xbf16> to vector<128x128xbf16>
    %cst_124 = arith.constant dense<0.000000e+00> : vector<1x128xf32>
    %193 = tpu.matmul %190, %192, %cst_124 {dimension_numbers = #tpu.dot_dimension_numbers<[1], [0], [0], [1], [0, 0, 1, 1], [], []>} : vector<1x128xbf16>, vector<128x128xbf16>, vector<1x128xf32> -> vector<1x128xf32>
    %194 = arith.addf %188, %193 : vector<1x128xf32>
    %195 = vector.extract_strided_slice %127 {offsets = [17, 0], sizes = [1, 128], strides = [1, 1]} : vector<101x128xf32> to vector<1x128xf32>
    %196 = arith.truncf %195 : vector<1x128xf32> to vector<1x128xbf16>
    %c11 = arith.constant 11 : index
    %c0_125 = arith.constant 0 : index
    %c0_126 = arith.constant 0 : index
    %197 = vector.load %arg5[%c11, %c0_125, %c0_126] : memref<25x128x128xbf16, #tpu.memory_space<vmem>>, vector<1x128x128xbf16>
    %198 = vector.shape_cast %197 : vector<1x128x128xbf16> to vector<128x128xbf16>
    %cst_127 = arith.constant dense<0.000000e+00> : vector<1x128xf32>
    %199 = tpu.matmul %196, %198, %cst_127 {dimension_numbers = #tpu.dot_dimension_numbers<[1], [0], [0], [1], [0, 0, 1, 1], [], []>} : vector<1x128xbf16>, vector<128x128xbf16>, vector<1x128xf32> -> vector<1x128xf32>
    %200 = arith.addf %194, %199 : vector<1x128xf32>
    %201 = vector.extract_strided_slice %127 {offsets = [18, 0], sizes = [1, 128], strides = [1, 1]} : vector<101x128xf32> to vector<1x128xf32>
    %202 = arith.truncf %201 : vector<1x128xf32> to vector<1x128xbf16>
    %c12 = arith.constant 12 : index
    %c0_128 = arith.constant 0 : index
    %c0_129 = arith.constant 0 : index
    %203 = vector.load %arg5[%c12, %c0_128, %c0_129] : memref<25x128x128xbf16, #tpu.memory_space<vmem>>, vector<1x128x128xbf16>
    %204 = vector.shape_cast %203 : vector<1x128x128xbf16> to vector<128x128xbf16>
    %cst_130 = arith.constant dense<0.000000e+00> : vector<1x128xf32>
    %205 = tpu.matmul %202, %204, %cst_130 {dimension_numbers = #tpu.dot_dimension_numbers<[1], [0], [0], [1], [0, 0, 1, 1], [], []>} : vector<1x128xbf16>, vector<128x128xbf16>, vector<1x128xf32> -> vector<1x128xf32>
    %206 = arith.addf %200, %205 : vector<1x128xf32>
    %207 = vector.extract_strided_slice %127 {offsets = [19, 0], sizes = [1, 128], strides = [1, 1]} : vector<101x128xf32> to vector<1x128xf32>
    %208 = arith.truncf %207 : vector<1x128xf32> to vector<1x128xbf16>
    %c13 = arith.constant 13 : index
    %c0_131 = arith.constant 0 : index
    %c0_132 = arith.constant 0 : index
    %209 = vector.load %arg5[%c13, %c0_131, %c0_132] : memref<25x128x128xbf16, #tpu.memory_space<vmem>>, vector<1x128x128xbf16>
    %210 = vector.shape_cast %209 : vector<1x128x128xbf16> to vector<128x128xbf16>
    %cst_133 = arith.constant dense<0.000000e+00> : vector<1x128xf32>
    %211 = tpu.matmul %208, %210, %cst_133 {dimension_numbers = #tpu.dot_dimension_numbers<[1], [0], [0], [1], [0, 0, 1, 1], [], []>} : vector<1x128xbf16>, vector<128x128xbf16>, vector<1x128xf32> -> vector<1x128xf32>
    %212 = arith.addf %206, %211 : vector<1x128xf32>
    %213 = vector.extract_strided_slice %127 {offsets = [20, 0], sizes = [1, 128], strides = [1, 1]} : vector<101x128xf32> to vector<1x128xf32>
    %214 = arith.truncf %213 : vector<1x128xf32> to vector<1x128xbf16>
    %c14 = arith.constant 14 : index
    %c0_134 = arith.constant 0 : index
    %c0_135 = arith.constant 0 : index
    %215 = vector.load %arg5[%c14, %c0_134, %c0_135] : memref<25x128x128xbf16, #tpu.memory_space<vmem>>, vector<1x128x128xbf16>
    %216 = vector.shape_cast %215 : vector<1x128x128xbf16> to vector<128x128xbf16>
    %cst_136 = arith.constant dense<0.000000e+00> : vector<1x128xf32>
    %217 = tpu.matmul %214, %216, %cst_136 {dimension_numbers = #tpu.dot_dimension_numbers<[1], [0], [0], [1], [0, 0, 1, 1], [], []>} : vector<1x128xbf16>, vector<128x128xbf16>, vector<1x128xf32> -> vector<1x128xf32>
    %218 = arith.addf %212, %217 : vector<1x128xf32>
    %219 = vector.extract_strided_slice %127 {offsets = [24, 0], sizes = [1, 128], strides = [1, 1]} : vector<101x128xf32> to vector<1x128xf32>
    %220 = arith.truncf %219 : vector<1x128xf32> to vector<1x128xbf16>
    %c15 = arith.constant 15 : index
    %c0_137 = arith.constant 0 : index
    %c0_138 = arith.constant 0 : index
    %221 = vector.load %arg5[%c15, %c0_137, %c0_138] : memref<25x128x128xbf16, #tpu.memory_space<vmem>>, vector<1x128x128xbf16>
    %222 = vector.shape_cast %221 : vector<1x128x128xbf16> to vector<128x128xbf16>
    %cst_139 = arith.constant dense<0.000000e+00> : vector<1x128xf32>
    %223 = tpu.matmul %220, %222, %cst_139 {dimension_numbers = #tpu.dot_dimension_numbers<[1], [0], [0], [1], [0, 0, 1, 1], [], []>} : vector<1x128xbf16>, vector<128x128xbf16>, vector<1x128xf32> -> vector<1x128xf32>
    %224 = arith.addf %218, %223 : vector<1x128xf32>
    %225 = vector.extract_strided_slice %127 {offsets = [25, 0], sizes = [1, 128], strides = [1, 1]} : vector<101x128xf32> to vector<1x128xf32>
    %226 = arith.truncf %225 : vector<1x128xf32> to vector<1x128xbf16>
    %c16 = arith.constant 16 : index
    %c0_140 = arith.constant 0 : index
    %c0_141 = arith.constant 0 : index
    %227 = vector.load %arg5[%c16, %c0_140, %c0_141] : memref<25x128x128xbf16, #tpu.memory_space<vmem>>, vector<1x128x128xbf16>
    %228 = vector.shape_cast %227 : vector<1x128x128xbf16> to vector<128x128xbf16>
    %cst_142 = arith.constant dense<0.000000e+00> : vector<1x128xf32>
    %229 = tpu.matmul %226, %228, %cst_142 {dimension_numbers = #tpu.dot_dimension_numbers<[1], [0], [0], [1], [0, 0, 1, 1], [], []>} : vector<1x128xbf16>, vector<128x128xbf16>, vector<1x128xf32> -> vector<1x128xf32>
    %230 = arith.addf %224, %229 : vector<1x128xf32>
    %231 = vector.extract_strided_slice %127 {offsets = [26, 0], sizes = [1, 128], strides = [1, 1]} : vector<101x128xf32> to vector<1x128xf32>
    %232 = arith.truncf %231 : vector<1x128xf32> to vector<1x128xbf16>
    %c17 = arith.constant 17 : index
    %c0_143 = arith.constant 0 : index
    %c0_144 = arith.constant 0 : index
    %233 = vector.load %arg5[%c17, %c0_143, %c0_144] : memref<25x128x128xbf16, #tpu.memory_space<vmem>>, vector<1x128x128xbf16>
    %234 = vector.shape_cast %233 : vector<1x128x128xbf16> to vector<128x128xbf16>
    %cst_145 = arith.constant dense<0.000000e+00> : vector<1x128xf32>
    %235 = tpu.matmul %232, %234, %cst_145 {dimension_numbers = #tpu.dot_dimension_numbers<[1], [0], [0], [1], [0, 0, 1, 1], [], []>} : vector<1x128xbf16>, vector<128x128xbf16>, vector<1x128xf32> -> vector<1x128xf32>
    %236 = arith.addf %230, %235 : vector<1x128xf32>
    %237 = vector.extract_strided_slice %127 {offsets = [27, 0], sizes = [1, 128], strides = [1, 1]} : vector<101x128xf32> to vector<1x128xf32>
    %238 = arith.truncf %237 : vector<1x128xf32> to vector<1x128xbf16>
    %c18 = arith.constant 18 : index
    %c0_146 = arith.constant 0 : index
    %c0_147 = arith.constant 0 : index
    %239 = vector.load %arg5[%c18, %c0_146, %c0_147] : memref<25x128x128xbf16, #tpu.memory_space<vmem>>, vector<1x128x128xbf16>
    %240 = vector.shape_cast %239 : vector<1x128x128xbf16> to vector<128x128xbf16>
    %cst_148 = arith.constant dense<0.000000e+00> : vector<1x128xf32>
    %241 = tpu.matmul %238, %240, %cst_148 {dimension_numbers = #tpu.dot_dimension_numbers<[1], [0], [0], [1], [0, 0, 1, 1], [], []>} : vector<1x128xbf16>, vector<128x128xbf16>, vector<1x128xf32> -> vector<1x128xf32>
    %242 = arith.addf %236, %241 : vector<1x128xf32>
    %243 = vector.extract_strided_slice %127 {offsets = [28, 0], sizes = [1, 128], strides = [1, 1]} : vector<101x128xf32> to vector<1x128xf32>
    %244 = arith.truncf %243 : vector<1x128xf32> to vector<1x128xbf16>
    %c19 = arith.constant 19 : index
    %c0_149 = arith.constant 0 : index
    %c0_150 = arith.constant 0 : index
    %245 = vector.load %arg5[%c19, %c0_149, %c0_150] : memref<25x128x128xbf16, #tpu.memory_space<vmem>>, vector<1x128x128xbf16>
    %246 = vector.shape_cast %245 : vector<1x128x128xbf16> to vector<128x128xbf16>
    %cst_151 = arith.constant dense<0.000000e+00> : vector<1x128xf32>
    %247 = tpu.matmul %244, %246, %cst_151 {dimension_numbers = #tpu.dot_dimension_numbers<[1], [0], [0], [1], [0, 0, 1, 1], [], []>} : vector<1x128xbf16>, vector<128x128xbf16>, vector<1x128xf32> -> vector<1x128xf32>
    %248 = arith.addf %242, %247 : vector<1x128xf32>
    %249 = vector.extract_strided_slice %127 {offsets = [32, 0], sizes = [1, 128], strides = [1, 1]} : vector<101x128xf32> to vector<1x128xf32>
    %250 = arith.truncf %249 : vector<1x128xf32> to vector<1x128xbf16>
    %c20 = arith.constant 20 : index
    %c0_152 = arith.constant 0 : index
    %c0_153 = arith.constant 0 : index
    %251 = vector.load %arg5[%c20, %c0_152, %c0_153] : memref<25x128x128xbf16, #tpu.memory_space<vmem>>, vector<1x128x128xbf16>
    %252 = vector.shape_cast %251 : vector<1x128x128xbf16> to vector<128x128xbf16>
    %cst_154 = arith.constant dense<0.000000e+00> : vector<1x128xf32>
    %253 = tpu.matmul %250, %252, %cst_154 {dimension_numbers = #tpu.dot_dimension_numbers<[1], [0], [0], [1], [0, 0, 1, 1], [], []>} : vector<1x128xbf16>, vector<128x128xbf16>, vector<1x128xf32> -> vector<1x128xf32>
    %254 = arith.addf %248, %253 : vector<1x128xf32>
    %255 = vector.extract_strided_slice %127 {offsets = [33, 0], sizes = [1, 128], strides = [1, 1]} : vector<101x128xf32> to vector<1x128xf32>
    %256 = arith.truncf %255 : vector<1x128xf32> to vector<1x128xbf16>
    %c21 = arith.constant 21 : index
    %c0_155 = arith.constant 0 : index
    %c0_156 = arith.constant 0 : index
    %257 = vector.load %arg5[%c21, %c0_155, %c0_156] : memref<25x128x128xbf16, #tpu.memory_space<vmem>>, vector<1x128x128xbf16>
    %258 = vector.shape_cast %257 : vector<1x128x128xbf16> to vector<128x128xbf16>
    %cst_157 = arith.constant dense<0.000000e+00> : vector<1x128xf32>
    %259 = tpu.matmul %256, %258, %cst_157 {dimension_numbers = #tpu.dot_dimension_numbers<[1], [0], [0], [1], [0, 0, 1, 1], [], []>} : vector<1x128xbf16>, vector<128x128xbf16>, vector<1x128xf32> -> vector<1x128xf32>
    %260 = arith.addf %254, %259 : vector<1x128xf32>
    %261 = vector.extract_strided_slice %127 {offsets = [34, 0], sizes = [1, 128], strides = [1, 1]} : vector<101x128xf32> to vector<1x128xf32>
    %262 = arith.truncf %261 : vector<1x128xf32> to vector<1x128xbf16>
    %c22 = arith.constant 22 : index
    %c0_158 = arith.constant 0 : index
    %c0_159 = arith.constant 0 : index
    %263 = vector.load %arg5[%c22, %c0_158, %c0_159] : memref<25x128x128xbf16, #tpu.memory_space<vmem>>, vector<1x128x128xbf16>
    %264 = vector.shape_cast %263 : vector<1x128x128xbf16> to vector<128x128xbf16>
    %cst_160 = arith.constant dense<0.000000e+00> : vector<1x128xf32>
    %265 = tpu.matmul %262, %264, %cst_160 {dimension_numbers = #tpu.dot_dimension_numbers<[1], [0], [0], [1], [0, 0, 1, 1], [], []>} : vector<1x128xbf16>, vector<128x128xbf16>, vector<1x128xf32> -> vector<1x128xf32>
    %266 = arith.addf %260, %265 : vector<1x128xf32>
    %267 = vector.extract_strided_slice %127 {offsets = [35, 0], sizes = [1, 128], strides = [1, 1]} : vector<101x128xf32> to vector<1x128xf32>
    %268 = arith.truncf %267 : vector<1x128xf32> to vector<1x128xbf16>
    %c23 = arith.constant 23 : index
    %c0_161 = arith.constant 0 : index
    %c0_162 = arith.constant 0 : index
    %269 = vector.load %arg5[%c23, %c0_161, %c0_162] : memref<25x128x128xbf16, #tpu.memory_space<vmem>>, vector<1x128x128xbf16>
    %270 = vector.shape_cast %269 : vector<1x128x128xbf16> to vector<128x128xbf16>
    %cst_163 = arith.constant dense<0.000000e+00> : vector<1x128xf32>
    %271 = tpu.matmul %268, %270, %cst_163 {dimension_numbers = #tpu.dot_dimension_numbers<[1], [0], [0], [1], [0, 0, 1, 1], [], []>} : vector<1x128xbf16>, vector<128x128xbf16>, vector<1x128xf32> -> vector<1x128xf32>
    %272 = arith.addf %266, %271 : vector<1x128xf32>
    %273 = vector.extract_strided_slice %127 {offsets = [36, 0], sizes = [1, 128], strides = [1, 1]} : vector<101x128xf32> to vector<1x128xf32>
    %274 = arith.truncf %273 : vector<1x128xf32> to vector<1x128xbf16>
    %c24 = arith.constant 24 : index
    %c0_164 = arith.constant 0 : index
    %c0_165 = arith.constant 0 : index
    %275 = vector.load %arg5[%c24, %c0_164, %c0_165] : memref<25x128x128xbf16, #tpu.memory_space<vmem>>, vector<1x128x128xbf16>
    %276 = vector.shape_cast %275 : vector<1x128x128xbf16> to vector<128x128xbf16>
    %cst_166 = arith.constant dense<0.000000e+00> : vector<1x128xf32>
    %277 = tpu.matmul %274, %276, %cst_166 {dimension_numbers = #tpu.dot_dimension_numbers<[1], [0], [0], [1], [0, 0, 1, 1], [], []>} : vector<1x128xbf16>, vector<128x128xbf16>, vector<1x128xf32> -> vector<1x128xf32>
    %278 = arith.addf %272, %277 : vector<1x128xf32>
    %c0_167 = arith.constant 0 : index
    %c0_168 = arith.constant 0 : index
    %279 = vector.load %arg17[%c0_167, %c0_168] : memref<2x128xf32, #tpu.memory_space<vmem>>, vector<1x128xf32>
    tpu.vector_store %arg17[%c0_167, %c0_168], %278 {strides = array<i32>} : memref<2x128xf32, #tpu.memory_space<vmem>>, vector<1x128xf32>,
    %cst_169 = arith.constant 0.000000e+00 : f32
    %280 = vector.broadcast %cst_169 : f32 to vector<1x128xf32>
    %281 = vector.extract_strided_slice %127 {offsets = [64, 0], sizes = [1, 128], strides = [1, 1]} : vector<101x128xf32> to vector<1x128xf32>
    %282 = arith.truncf %281 : vector<1x128xf32> to vector<1x128xbf16>
    %c0_170 = arith.constant 0 : index
    %c0_171 = arith.constant 0 : index
    %c0_172 = arith.constant 0 : index
    %283 = vector.load %arg5[%c0_170, %c0_171, %c0_172] : memref<25x128x128xbf16, #tpu.memory_space<vmem>>, vector<1x128x128xbf16>
    %284 = vector.shape_cast %283 : vector<1x128x128xbf16> to vector<128x128xbf16>
    %cst_173 = arith.constant dense<0.000000e+00> : vector<1x128xf32>
    %285 = tpu.matmul %282, %284, %cst_173 {dimension_numbers = #tpu.dot_dimension_numbers<[1], [0], [0], [1], [0, 0, 1, 1], [], []>} : vector<1x128xbf16>, vector<128x128xbf16>, vector<1x128xf32> -> vector<1x128xf32>
    %286 = arith.addf %280, %285 : vector<1x128xf32>
    %287 = vector.extract_strided_slice %127 {offsets = [65, 0], sizes = [1, 128], strides = [1, 1]} : vector<101x128xf32> to vector<1x128xf32>
    %288 = arith.truncf %287 : vector<1x128xf32> to vector<1x128xbf16>
    %c1_174 = arith.constant 1 : index
    %c0_175 = arith.constant 0 : index
    %c0_176 = arith.constant 0 : index
    %289 = vector.load %arg5[%c1_174, %c0_175, %c0_176] : memref<25x128x128xbf16, #tpu.memory_space<vmem>>, vector<1x128x128xbf16>
    %290 = vector.shape_cast %289 : vector<1x128x128xbf16> to vector<128x128xbf16>
    %cst_177 = arith.constant dense<0.000000e+00> : vector<1x128xf32>
    %291 = tpu.matmul %288, %290, %cst_177 {dimension_numbers = #tpu.dot_dimension_numbers<[1], [0], [0], [1], [0, 0, 1, 1], [], []>} : vector<1x128xbf16>, vector<128x128xbf16>, vector<1x128xf32> -> vector<1x128xf32>
    %292 = arith.addf %286, %291 : vector<1x128xf32>
    %293 = vector.extract_strided_slice %127 {offsets = [66, 0], sizes = [1, 128], strides = [1, 1]} : vector<101x128xf32> to vector<1x128xf32>
    %294 = arith.truncf %293 : vector<1x128xf32> to vector<1x128xbf16>
    %c2_178 = arith.constant 2 : index
    %c0_179 = arith.constant 0 : index
    %c0_180 = arith.constant 0 : index
    %295 = vector.load %arg5[%c2_178, %c0_179, %c0_180] : memref<25x128x128xbf16, #tpu.memory_space<vmem>>, vector<1x128x128xbf16>
    %296 = vector.shape_cast %295 : vector<1x128x128xbf16> to vector<128x128xbf16>
    %cst_181 = arith.constant dense<0.000000e+00> : vector<1x128xf32>
    %297 = tpu.matmul %294, %296, %cst_181 {dimension_numbers = #tpu.dot_dimension_numbers<[1], [0], [0], [1], [0, 0, 1, 1], [], []>} : vector<1x128xbf16>, vector<128x128xbf16>, vector<1x128xf32> -> vector<1x128xf32>
    %298 = arith.addf %292, %297 : vector<1x128xf32>
    %299 = vector.extract_strided_slice %127 {offsets = [67, 0], sizes = [1, 128], strides = [1, 1]} : vector<101x128xf32> to vector<1x128xf32>
    %300 = arith.truncf %299 : vector<1x128xf32> to vector<1x128xbf16>
    %c3_182 = arith.constant 3 : index
    %c0_183 = arith.constant 0 : index
    %c0_184 = arith.constant 0 : index
    %301 = vector.load %arg5[%c3_182, %c0_183, %c0_184] : memref<25x128x128xbf16, #tpu.memory_space<vmem>>, vector<1x128x128xbf16>
    %302 = vector.shape_cast %301 : vector<1x128x128xbf16> to vector<128x128xbf16>
    %cst_185 = arith.constant dense<0.000000e+00> : vector<1x128xf32>
    %303 = tpu.matmul %300, %302, %cst_185 {dimension_numbers = #tpu.dot_dimension_numbers<[1], [0], [0], [1], [0, 0, 1, 1], [], []>} : vector<1x128xbf16>, vector<128x128xbf16>, vector<1x128xf32> -> vector<1x128xf32>
    %304 = arith.addf %298, %303 : vector<1x128xf32>
    %305 = vector.extract_strided_slice %127 {offsets = [68, 0], sizes = [1, 128], strides = [1, 1]} : vector<101x128xf32> to vector<1x128xf32>
    %306 = arith.truncf %305 : vector<1x128xf32> to vector<1x128xbf16>
    %c4_186 = arith.constant 4 : index
    %c0_187 = arith.constant 0 : index
    %c0_188 = arith.constant 0 : index
    %307 = vector.load %arg5[%c4_186, %c0_187, %c0_188] : memref<25x128x128xbf16, #tpu.memory_space<vmem>>, vector<1x128x128xbf16>
    %308 = vector.shape_cast %307 : vector<1x128x128xbf16> to vector<128x128xbf16>
    %cst_189 = arith.constant dense<0.000000e+00> : vector<1x128xf32>
    %309 = tpu.matmul %306, %308, %cst_189 {dimension_numbers = #tpu.dot_dimension_numbers<[1], [0], [0], [1], [0, 0, 1, 1], [], []>} : vector<1x128xbf16>, vector<128x128xbf16>, vector<1x128xf32> -> vector<1x128xf32>
    %310 = arith.addf %304, %309 : vector<1x128xf32>
    %311 = vector.extract_strided_slice %127 {offsets = [72, 0], sizes = [1, 128], strides = [1, 1]} : vector<101x128xf32> to vector<1x128xf32>
    %312 = arith.truncf %311 : vector<1x128xf32> to vector<1x128xbf16>
    %c5_190 = arith.constant 5 : index
    %c0_191 = arith.constant 0 : index
    %c0_192 = arith.constant 0 : index
    %313 = vector.load %arg5[%c5_190, %c0_191, %c0_192] : memref<25x128x128xbf16, #tpu.memory_space<vmem>>, vector<1x128x128xbf16>
    %314 = vector.shape_cast %313 : vector<1x128x128xbf16> to vector<128x128xbf16>
    %cst_193 = arith.constant dense<0.000000e+00> : vector<1x128xf32>
    %315 = tpu.matmul %312, %314, %cst_193 {dimension_numbers = #tpu.dot_dimension_numbers<[1], [0], [0], [1], [0, 0, 1, 1], [], []>} : vector<1x128xbf16>, vector<128x128xbf16>, vector<1x128xf32> -> vector<1x128xf32>
    %316 = arith.addf %310, %315 : vector<1x128xf32>
    %317 = vector.extract_strided_slice %127 {offsets = [73, 0], sizes = [1, 128], strides = [1, 1]} : vector<101x128xf32> to vector<1x128xf32>
    %318 = arith.truncf %317 : vector<1x128xf32> to vector<1x128xbf16>
    %c6_194 = arith.constant 6 : index
    %c0_195 = arith.constant 0 : index
    %c0_196 = arith.constant 0 : index
    %319 = vector.load %arg5[%c6_194, %c0_195, %c0_196] : memref<25x128x128xbf16, #tpu.memory_space<vmem>>, vector<1x128x128xbf16>
    %320 = vector.shape_cast %319 : vector<1x128x128xbf16> to vector<128x128xbf16>
    %cst_197 = arith.constant dense<0.000000e+00> : vector<1x128xf32>
    %321 = tpu.matmul %318, %320, %cst_197 {dimension_numbers = #tpu.dot_dimension_numbers<[1], [0], [0], [1], [0, 0, 1, 1], [], []>} : vector<1x128xbf16>, vector<128x128xbf16>, vector<1x128xf32> -> vector<1x128xf32>
    %322 = arith.addf %316, %321 : vector<1x128xf32>
    %323 = vector.extract_strided_slice %127 {offsets = [74, 0], sizes = [1, 128], strides = [1, 1]} : vector<101x128xf32> to vector<1x128xf32>
    %324 = arith.truncf %323 : vector<1x128xf32> to vector<1x128xbf16>
    %c7_198 = arith.constant 7 : index
    %c0_199 = arith.constant 0 : index
    %c0_200 = arith.constant 0 : index
    %325 = vector.load %arg5[%c7_198, %c0_199, %c0_200] : memref<25x128x128xbf16, #tpu.memory_space<vmem>>, vector<1x128x128xbf16>
    %326 = vector.shape_cast %325 : vector<1x128x128xbf16> to vector<128x128xbf16>
    %cst_201 = arith.constant dense<0.000000e+00> : vector<1x128xf32>
    %327 = tpu.matmul %324, %326, %cst_201 {dimension_numbers = #tpu.dot_dimension_numbers<[1], [0], [0], [1], [0, 0, 1, 1], [], []>} : vector<1x128xbf16>, vector<128x128xbf16>, vector<1x128xf32> -> vector<1x128xf32>
    %328 = arith.addf %322, %327 : vector<1x128xf32>
    %329 = vector.extract_strided_slice %127 {offsets = [75, 0], sizes = [1, 128], strides = [1, 1]} : vector<101x128xf32> to vector<1x128xf32>
    %330 = arith.truncf %329 : vector<1x128xf32> to vector<1x128xbf16>
    %c8_202 = arith.constant 8 : index
    %c0_203 = arith.constant 0 : index
    %c0_204 = arith.constant 0 : index
    %331 = vector.load %arg5[%c8_202, %c0_203, %c0_204] : memref<25x128x128xbf16, #tpu.memory_space<vmem>>, vector<1x128x128xbf16>
    %332 = vector.shape_cast %331 : vector<1x128x128xbf16> to vector<128x128xbf16>
    %cst_205 = arith.constant dense<0.000000e+00> : vector<1x128xf32>
    %333 = tpu.matmul %330, %332, %cst_205 {dimension_numbers = #tpu.dot_dimension_numbers<[1], [0], [0], [1], [0, 0, 1, 1], [], []>} : vector<1x128xbf16>, vector<128x128xbf16>, vector<1x128xf32> -> vector<1x128xf32>
    %334 = arith.addf %328, %333 : vector<1x128xf32>
    %335 = vector.extract_strided_slice %127 {offsets = [76, 0], sizes = [1, 128], strides = [1, 1]} : vector<101x128xf32> to vector<1x128xf32>
    %336 = arith.truncf %335 : vector<1x128xf32> to vector<1x128xbf16>
    %c9_206 = arith.constant 9 : index
    %c0_207 = arith.constant 0 : index
    %c0_208 = arith.constant 0 : index
    %337 = vector.load %arg5[%c9_206, %c0_207, %c0_208] : memref<25x128x128xbf16, #tpu.memory_space<vmem>>, vector<1x128x128xbf16>
    %338 = vector.shape_cast %337 : vector<1x128x128xbf16> to vector<128x128xbf16>
    %cst_209 = arith.constant dense<0.000000e+00> : vector<1x128xf32>
    %339 = tpu.matmul %336, %338, %cst_209 {dimension_numbers = #tpu.dot_dimension_numbers<[1], [0], [0], [1], [0, 0, 1, 1], [], []>} : vector<1x128xbf16>, vector<128x128xbf16>, vector<1x128xf32> -> vector<1x128xf32>
    %340 = arith.addf %334, %339 : vector<1x128xf32>
    %341 = vector.extract_strided_slice %127 {offsets = [80, 0], sizes = [1, 128], strides = [1, 1]} : vector<101x128xf32> to vector<1x128xf32>
    %342 = arith.truncf %341 : vector<1x128xf32> to vector<1x128xbf16>
    %c10_210 = arith.constant 10 : index
    %c0_211 = arith.constant 0 : index
    %c0_212 = arith.constant 0 : index
    %343 = vector.load %arg5[%c10_210, %c0_211, %c0_212] : memref<25x128x128xbf16, #tpu.memory_space<vmem>>, vector<1x128x128xbf16>
    %344 = vector.shape_cast %343 : vector<1x128x128xbf16> to vector<128x128xbf16>
    %cst_213 = arith.constant dense<0.000000e+00> : vector<1x128xf32>
    %345 = tpu.matmul %342, %344, %cst_213 {dimension_numbers = #tpu.dot_dimension_numbers<[1], [0], [0], [1], [0, 0, 1, 1], [], []>} : vector<1x128xbf16>, vector<128x128xbf16>, vector<1x128xf32> -> vector<1x128xf32>
    %346 = arith.addf %340, %345 : vector<1x128xf32>
    %347 = vector.extract_strided_slice %127 {offsets = [81, 0], sizes = [1, 128], strides = [1, 1]} : vector<101x128xf32> to vector<1x128xf32>
    %348 = arith.truncf %347 : vector<1x128xf32> to vector<1x128xbf16>
    %c11_214 = arith.constant 11 : index
    %c0_215 = arith.constant 0 : index
    %c0_216 = arith.constant 0 : index
    %349 = vector.load %arg5[%c11_214, %c0_215, %c0_216] : memref<25x128x128xbf16, #tpu.memory_space<vmem>>, vector<1x128x128xbf16>
    %350 = vector.shape_cast %349 : vector<1x128x128xbf16> to vector<128x128xbf16>
    %cst_217 = arith.constant dense<0.000000e+00> : vector<1x128xf32>
    %351 = tpu.matmul %348, %350, %cst_217 {dimension_numbers = #tpu.dot_dimension_numbers<[1], [0], [0], [1], [0, 0, 1, 1], [], []>} : vector<1x128xbf16>, vector<128x128xbf16>, vector<1x128xf32> -> vector<1x128xf32>
    %352 = arith.addf %346, %351 : vector<1x128xf32>
    %353 = vector.extract_strided_slice %127 {offsets = [82, 0], sizes = [1, 128], strides = [1, 1]} : vector<101x128xf32> to vector<1x128xf32>
    %354 = arith.truncf %353 : vector<1x128xf32> to vector<1x128xbf16>
    %c12_218 = arith.constant 12 : index
    %c0_219 = arith.constant 0 : index
    %c0_220 = arith.constant 0 : index
    %355 = vector.load %arg5[%c12_218, %c0_219, %c0_220] : memref<25x128x128xbf16, #tpu.memory_space<vmem>>, vector<1x128x128xbf16>
    %356 = vector.shape_cast %355 : vector<1x128x128xbf16> to vector<128x128xbf16>
    %cst_221 = arith.constant dense<0.000000e+00> : vector<1x128xf32>
    %357 = tpu.matmul %354, %356, %cst_221 {dimension_numbers = #tpu.dot_dimension_numbers<[1], [0], [0], [1], [0, 0, 1, 1], [], []>} : vector<1x128xbf16>, vector<128x128xbf16>, vector<1x128xf32> -> vector<1x128xf32>
    %358 = arith.addf %352, %357 : vector<1x128xf32>
    %359 = vector.extract_strided_slice %127 {offsets = [83, 0], sizes = [1, 128], strides = [1, 1]} : vector<101x128xf32> to vector<1x128xf32>
    %360 = arith.truncf %359 : vector<1x128xf32> to vector<1x128xbf16>
    %c13_222 = arith.constant 13 : index
    %c0_223 = arith.constant 0 : index
    %c0_224 = arith.constant 0 : index
    %361 = vector.load %arg5[%c13_222, %c0_223, %c0_224] : memref<25x128x128xbf16, #tpu.memory_space<vmem>>, vector<1x128x128xbf16>
    %362 = vector.shape_cast %361 : vector<1x128x128xbf16> to vector<128x128xbf16>
    %cst_225 = arith.constant dense<0.000000e+00> : vector<1x128xf32>
    %363 = tpu.matmul %360, %362, %cst_225 {dimension_numbers = #tpu.dot_dimension_numbers<[1], [0], [0], [1], [0, 0, 1, 1], [], []>} : vector<1x128xbf16>, vector<128x128xbf16>, vector<1x128xf32> -> vector<1x128xf32>
    %364 = arith.addf %358, %363 : vector<1x128xf32>
    %365 = vector.extract_strided_slice %127 {offsets = [84, 0], sizes = [1, 128], strides = [1, 1]} : vector<101x128xf32> to vector<1x128xf32>
    %366 = arith.truncf %365 : vector<1x128xf32> to vector<1x128xbf16>
    %c14_226 = arith.constant 14 : index
    %c0_227 = arith.constant 0 : index
    %c0_228 = arith.constant 0 : index
    %367 = vector.load %arg5[%c14_226, %c0_227, %c0_228] : memref<25x128x128xbf16, #tpu.memory_space<vmem>>, vector<1x128x128xbf16>
    %368 = vector.shape_cast %367 : vector<1x128x128xbf16> to vector<128x128xbf16>
    %cst_229 = arith.constant dense<0.000000e+00> : vector<1x128xf32>
    %369 = tpu.matmul %366, %368, %cst_229 {dimension_numbers = #tpu.dot_dimension_numbers<[1], [0], [0], [1], [0, 0, 1, 1], [], []>} : vector<1x128xbf16>, vector<128x128xbf16>, vector<1x128xf32> -> vector<1x128xf32>
    %370 = arith.addf %364, %369 : vector<1x128xf32>
    %371 = vector.extract_strided_slice %127 {offsets = [88, 0], sizes = [1, 128], strides = [1, 1]} : vector<101x128xf32> to vector<1x128xf32>
    %372 = arith.truncf %371 : vector<1x128xf32> to vector<1x128xbf16>
    %c15_230 = arith.constant 15 : index
    %c0_231 = arith.constant 0 : index
    %c0_232 = arith.constant 0 : index
    %373 = vector.load %arg5[%c15_230, %c0_231, %c0_232] : memref<25x128x128xbf16, #tpu.memory_space<vmem>>, vector<1x128x128xbf16>
    %374 = vector.shape_cast %373 : vector<1x128x128xbf16> to vector<128x128xbf16>
    %cst_233 = arith.constant dense<0.000000e+00> : vector<1x128xf32>
    %375 = tpu.matmul %372, %374, %cst_233 {dimension_numbers = #tpu.dot_dimension_numbers<[1], [0], [0], [1], [0, 0, 1, 1], [], []>} : vector<1x128xbf16>, vector<128x128xbf16>, vector<1x128xf32> -> vector<1x128xf32>
    %376 = arith.addf %370, %375 : vector<1x128xf32>
    %377 = vector.extract_strided_slice %127 {offsets = [89, 0], sizes = [1, 128], strides = [1, 1]} : vector<101x128xf32> to vector<1x128xf32>
    %378 = arith.truncf %377 : vector<1x128xf32> to vector<1x128xbf16>
    %c16_234 = arith.constant 16 : index
    %c0_235 = arith.constant 0 : index
    %c0_236 = arith.constant 0 : index
    %379 = vector.load %arg5[%c16_234, %c0_235, %c0_236] : memref<25x128x128xbf16, #tpu.memory_space<vmem>>, vector<1x128x128xbf16>
    %380 = vector.shape_cast %379 : vector<1x128x128xbf16> to vector<128x128xbf16>
    %cst_237 = arith.constant dense<0.000000e+00> : vector<1x128xf32>
    %381 = tpu.matmul %378, %380, %cst_237 {dimension_numbers = #tpu.dot_dimension_numbers<[1], [0], [0], [1], [0, 0, 1, 1], [], []>} : vector<1x128xbf16>, vector<128x128xbf16>, vector<1x128xf32> -> vector<1x128xf32>
    %382 = arith.addf %376, %381 : vector<1x128xf32>
    %383 = vector.extract_strided_slice %127 {offsets = [90, 0], sizes = [1, 128], strides = [1, 1]} : vector<101x128xf32> to vector<1x128xf32>
    %384 = arith.truncf %383 : vector<1x128xf32> to vector<1x128xbf16>
    %c17_238 = arith.constant 17 : index
    %c0_239 = arith.constant 0 : index
    %c0_240 = arith.constant 0 : index
    %385 = vector.load %arg5[%c17_238, %c0_239, %c0_240] : memref<25x128x128xbf16, #tpu.memory_space<vmem>>, vector<1x128x128xbf16>
    %386 = vector.shape_cast %385 : vector<1x128x128xbf16> to vector<128x128xbf16>
    %cst_241 = arith.constant dense<0.000000e+00> : vector<1x128xf32>
    %387 = tpu.matmul %384, %386, %cst_241 {dimension_numbers = #tpu.dot_dimension_numbers<[1], [0], [0], [1], [0, 0, 1, 1], [], []>} : vector<1x128xbf16>, vector<128x128xbf16>, vector<1x128xf32> -> vector<1x128xf32>
    %388 = arith.addf %382, %387 : vector<1x128xf32>
    %389 = vector.extract_strided_slice %127 {offsets = [91, 0], sizes = [1, 128], strides = [1, 1]} : vector<101x128xf32> to vector<1x128xf32>
    %390 = arith.truncf %389 : vector<1x128xf32> to vector<1x128xbf16>
    %c18_242 = arith.constant 18 : index
    %c0_243 = arith.constant 0 : index
    %c0_244 = arith.constant 0 : index
    %391 = vector.load %arg5[%c18_242, %c0_243, %c0_244] : memref<25x128x128xbf16, #tpu.memory_space<vmem>>, vector<1x128x128xbf16>
    %392 = vector.shape_cast %391 : vector<1x128x128xbf16> to vector<128x128xbf16>
    %cst_245 = arith.constant dense<0.000000e+00> : vector<1x128xf32>
    %393 = tpu.matmul %390, %392, %cst_245 {dimension_numbers = #tpu.dot_dimension_numbers<[1], [0], [0], [1], [0, 0, 1, 1], [], []>} : vector<1x128xbf16>, vector<128x128xbf16>, vector<1x128xf32> -> vector<1x128xf32>
    %394 = arith.addf %388, %393 : vector<1x128xf32>
    %395 = vector.extract_strided_slice %127 {offsets = [92, 0], sizes = [1, 128], strides = [1, 1]} : vector<101x128xf32> to vector<1x128xf32>
    %396 = arith.truncf %395 : vector<1x128xf32> to vector<1x128xbf16>
    %c19_246 = arith.constant 19 : index
    %c0_247 = arith.constant 0 : index
    %c0_248 = arith.constant 0 : index
    %397 = vector.load %arg5[%c19_246, %c0_247, %c0_248] : memref<25x128x128xbf16, #tpu.memory_space<vmem>>, vector<1x128x128xbf16>
    %398 = vector.shape_cast %397 : vector<1x128x128xbf16> to vector<128x128xbf16>
    %cst_249 = arith.constant dense<0.000000e+00> : vector<1x128xf32>
    %399 = tpu.matmul %396, %398, %cst_249 {dimension_numbers = #tpu.dot_dimension_numbers<[1], [0], [0], [1], [0, 0, 1, 1], [], []>} : vector<1x128xbf16>, vector<128x128xbf16>, vector<1x128xf32> -> vector<1x128xf32>
    %400 = arith.addf %394, %399 : vector<1x128xf32>
    %401 = vector.extract_strided_slice %127 {offsets = [96, 0], sizes = [1, 128], strides = [1, 1]} : vector<101x128xf32> to vector<1x128xf32>
    %402 = arith.truncf %401 : vector<1x128xf32> to vector<1x128xbf16>
    %c20_250 = arith.constant 20 : index
    %c0_251 = arith.constant 0 : index
    %c0_252 = arith.constant 0 : index
    %403 = vector.load %arg5[%c20_250, %c0_251, %c0_252] : memref<25x128x128xbf16, #tpu.memory_space<vmem>>, vector<1x128x128xbf16>
    %404 = vector.shape_cast %403 : vector<1x128x128xbf16> to vector<128x128xbf16>
    %cst_253 = arith.constant dense<0.000000e+00> : vector<1x128xf32>
    %405 = tpu.matmul %402, %404, %cst_253 {dimension_numbers = #tpu.dot_dimension_numbers<[1], [0], [0], [1], [0, 0, 1, 1], [], []>} : vector<1x128xbf16>, vector<128x128xbf16>, vector<1x128xf32> -> vector<1x128xf32>
    %406 = arith.addf %400, %405 : vector<1x128xf32>
    %407 = vector.extract_strided_slice %127 {offsets = [97, 0], sizes = [1, 128], strides = [1, 1]} : vector<101x128xf32> to vector<1x128xf32>
    %408 = arith.truncf %407 : vector<1x128xf32> to vector<1x128xbf16>
    %c21_254 = arith.constant 21 : index
    %c0_255 = arith.constant 0 : index
    %c0_256 = arith.constant 0 : index
    %409 = vector.load %arg5[%c21_254, %c0_255, %c0_256] : memref<25x128x128xbf16, #tpu.memory_space<vmem>>, vector<1x128x128xbf16>
    %410 = vector.shape_cast %409 : vector<1x128x128xbf16> to vector<128x128xbf16>
    %cst_257 = arith.constant dense<0.000000e+00> : vector<1x128xf32>
    %411 = tpu.matmul %408, %410, %cst_257 {dimension_numbers = #tpu.dot_dimension_numbers<[1], [0], [0], [1], [0, 0, 1, 1], [], []>} : vector<1x128xbf16>, vector<128x128xbf16>, vector<1x128xf32> -> vector<1x128xf32>
    %412 = arith.addf %406, %411 : vector<1x128xf32>
    %413 = vector.extract_strided_slice %127 {offsets = [98, 0], sizes = [1, 128], strides = [1, 1]} : vector<101x128xf32> to vector<1x128xf32>
    %414 = arith.truncf %413 : vector<1x128xf32> to vector<1x128xbf16>
    %c22_258 = arith.constant 22 : index
    %c0_259 = arith.constant 0 : index
    %c0_260 = arith.constant 0 : index
    %415 = vector.load %arg5[%c22_258, %c0_259, %c0_260] : memref<25x128x128xbf16, #tpu.memory_space<vmem>>, vector<1x128x128xbf16>
    %416 = vector.shape_cast %415 : vector<1x128x128xbf16> to vector<128x128xbf16>
    %cst_261 = arith.constant dense<0.000000e+00> : vector<1x128xf32>
    %417 = tpu.matmul %414, %416, %cst_261 {dimension_numbers = #tpu.dot_dimension_numbers<[1], [0], [0], [1], [0, 0, 1, 1], [], []>} : vector<1x128xbf16>, vector<128x128xbf16>, vector<1x128xf32> -> vector<1x128xf32>
    %418 = arith.addf %412, %417 : vector<1x128xf32>
    %419 = vector.extract_strided_slice %127 {offsets = [99, 0], sizes = [1, 128], strides = [1, 1]} : vector<101x128xf32> to vector<1x128xf32>
    %420 = arith.truncf %419 : vector<1x128xf32> to vector<1x128xbf16>
    %c23_262 = arith.constant 23 : index
    %c0_263 = arith.constant 0 : index
    %c0_264 = arith.constant 0 : index
    %421 = vector.load %arg5[%c23_262, %c0_263, %c0_264] : memref<25x128x128xbf16, #tpu.memory_space<vmem>>, vector<1x128x128xbf16>
    %422 = vector.shape_cast %421 : vector<1x128x128xbf16> to vector<128x128xbf16>
    %cst_265 = arith.constant dense<0.000000e+00> : vector<1x128xf32>
    %423 = tpu.matmul %420, %422, %cst_265 {dimension_numbers = #tpu.dot_dimension_numbers<[1], [0], [0], [1], [0, 0, 1, 1], [], []>} : vector<1x128xbf16>, vector<128x128xbf16>, vector<1x128xf32> -> vector<1x128xf32>
    %424 = arith.addf %418, %423 : vector<1x128xf32>
    %425 = vector.extract_strided_slice %127 {offsets = [100, 0], sizes = [1, 128], strides = [1, 1]} : vector<101x128xf32> to vector<1x128xf32>
    %426 = arith.truncf %425 : vector<1x128xf32> to vector<1x128xbf16>
    %c24_266 = arith.constant 24 : index
    %c0_267 = arith.constant 0 : index
    %c0_268 = arith.constant 0 : index
    %427 = vector.load %arg5[%c24_266, %c0_267, %c0_268] : memref<25x128x128xbf16, #tpu.memory_space<vmem>>, vector<1x128x128xbf16>
    %428 = vector.shape_cast %427 : vector<1x128x128xbf16> to vector<128x128xbf16>
    %cst_269 = arith.constant dense<0.000000e+00> : vector<1x128xf32>
    %429 = tpu.matmul %426, %428, %cst_269 {dimension_numbers = #tpu.dot_dimension_numbers<[1], [0], [0], [1], [0, 0, 1, 1], [], []>} : vector<1x128xbf16>, vector<128x128xbf16>, vector<1x128xf32> -> vector<1x128xf32>
    %430 = arith.addf %424, %429 : vector<1x128xf32>
    %c1_270 = arith.constant 1 : index
    %c0_271 = arith.constant 0 : index
    %431 = vector.load %arg17[%c1_270, %c0_271] : memref<2x128xf32, #tpu.memory_space<vmem>>, vector<1x128xf32>
    tpu.vector_store %arg17[%c1_270, %c0_271], %430 {strides = array<i32>} : memref<2x128xf32, #tpu.memory_space<vmem>>, vector<1x128xf32>,
    %c0_272 = arith.constant 0 : index
    %c0_273 = arith.constant 0 : index
    %432 = vector.load %arg17[%c0_272, %c0_273] : memref<2x128xf32, #tpu.memory_space<vmem>>, vector<2x128xf32>
    %c0_274 = arith.constant 0 : index
    %c0_275 = arith.constant 0 : index
    %433 = vector.load %arg6[%c0_274, %c0_275] : memref<1x128xf32, #tpu.memory_space<vmem>>, vector<1x128xf32>
    %434 = vector.broadcast %433 : vector<1x128xf32> to vector<2x128xf32>
    %435 = arith.addf %432, %434 : vector<2x128xf32>
    %cst_276 = arith.constant dense<0.000000e+00> : vector<2xf32>
    %436 = vector.multi_reduction <add>, %435, %cst_276 [1] : vector<2x128xf32> to vector<2xf32>
    %437 = vector.shape_cast %436 : vector<2xf32> to vector<2x1xf32>
    %cst_277 = arith.constant 3.125000e-02 : f32
    %438 = vector.broadcast %cst_277 : f32 to vector<2x1xf32>
    %439 = arith.mulf %437, %438 : vector<2x1xf32>
    %440 = tpu.iota {dimensions = array<i32: 1>} : vector<1x128xi32>
    %c32_i32 = arith.constant 32 : i32
    %441 = vector.broadcast %c32_i32 : i32 to vector<1x128xi32>
    %442 = arith.cmpi slt, %440, %441 : vector<1x128xi32>
    %443 = arith.extui %442 : vector<1x128xi1> to vector<1x128xi32>
    %444 = arith.sitofp %443 : vector<1x128xi32> to vector<1x128xf32>
    %445 = vector.broadcast %439 : vector<2x1xf32> to vector<2x128xf32>
    %446 = arith.subf %435, %445 : vector<2x128xf32>
    %447 = vector.broadcast %444 : vector<1x128xf32> to vector<2x128xf32>
    %448 = arith.mulf %446, %447 : vector<2x128xf32>
    %449 = arith.mulf %448, %448 : vector<2x128xf32>
    %cst_278 = arith.constant dense<0.000000e+00> : vector<2xf32>
    %450 = vector.multi_reduction <add>, %449, %cst_278 [1] : vector<2x128xf32> to vector<2xf32>
    %451 = vector.shape_cast %450 : vector<2xf32> to vector<2x1xf32>
    %cst_279 = arith.constant 3.125000e-02 : f32
    %452 = vector.broadcast %cst_279 : f32 to vector<2x1xf32>
    %453 = arith.mulf %451, %452 : vector<2x1xf32>
    %cst_280 = arith.constant 9.99999974E-6 : f32
    %454 = vector.broadcast %cst_280 : f32 to vector<2x1xf32>
    %455 = arith.addf %453, %454 : vector<2x1xf32>
    %456 = math.rsqrt %455 : vector<2x1xf32>
    %457 = vector.broadcast %456 : vector<2x1xf32> to vector<2x128xf32>
    %458 = arith.mulf %448, %457 : vector<2x128xf32>
    %c0_281 = arith.constant 0 : index
    %c0_282 = arith.constant 0 : index
    %459 = vector.load %arg7[%c0_281, %c0_282] : memref<1x128xf32, #tpu.memory_space<vmem>>, vector<1x128xf32>
    %460 = vector.broadcast %459 : vector<1x128xf32> to vector<2x128xf32>
    %461 = arith.mulf %458, %460 : vector<2x128xf32>
    %c0_283 = arith.constant 0 : index
    %c0_284 = arith.constant 0 : index
    %462 = vector.load %arg8[%c0_283, %c0_284] : memref<1x128xf32, #tpu.memory_space<vmem>>, vector<1x128xf32>
    %463 = vector.broadcast %462 : vector<1x128xf32> to vector<2x128xf32>
    %464 = arith.addf %461, %463 : vector<2x128xf32>
    %465 = math.tanh %464 : vector<2x128xf32>
    %466 = arith.truncf %465 : vector<2x128xf32> to vector<2x128xbf16>
    %c0_285 = arith.constant 0 : index
    %c0_286 = arith.constant 0 : index
    %467 = vector.load %arg9[%c0_285, %c0_286] : memref<128x128xbf16, #tpu.memory_space<vmem>>, vector<128x128xbf16>
    %cst_287 = arith.constant dense<0.000000e+00> : vector<2x128xf32>
    %468 = tpu.matmul %466, %467, %cst_287 {dimension_numbers = #tpu.dot_dimension_numbers<[1], [0], [0], [1], [0, 0, 1, 1], [], []>} : vector<2x128xbf16>, vector<128x128xbf16>, vector<2x128xf32> -> vector<2x128xf32>
    %c0_288 = arith.constant 0 : index
    %c0_289 = arith.constant 0 : index
    %469 = vector.load %arg10[%c0_288, %c0_289] : memref<1x128xf32, #tpu.memory_space<vmem>>, vector<1x128xf32>
    %470 = vector.broadcast %469 : vector<1x128xf32> to vector<2x128xf32>
    %471 = arith.addf %468, %470 : vector<2x128xf32>
    %cst_290 = arith.constant 0.000000e+00 : f32
    %472 = vector.broadcast %cst_290 : f32 to vector<2x128xf32>
    %473 = arith.maximumf %471, %472 : vector<2x128xf32>
    %474 = arith.truncf %473 : vector<2x128xf32> to vector<2x128xbf16>
    %c0_291 = arith.constant 0 : index
    %c0_292 = arith.constant 0 : index
    %475 = vector.load %arg11[%c0_291, %c0_292] : memref<128x128xbf16, #tpu.memory_space<vmem>>, vector<128x128xbf16>
    %cst_293 = arith.constant dense<0.000000e+00> : vector<2x128xf32>
    %476 = tpu.matmul %474, %475, %cst_293 {dimension_numbers = #tpu.dot_dimension_numbers<[1], [0], [0], [1], [0, 0, 1, 1], [], []>} : vector<2x128xbf16>, vector<128x128xbf16>, vector<2x128xf32> -> vector<2x128xf32>
    %c0_294 = arith.constant 0 : index
    %c0_295 = arith.constant 0 : index
    %477 = vector.load %arg12[%c0_294, %c0_295] : memref<1x128xf32, #tpu.memory_space<vmem>>, vector<1x128xf32>
    %478 = vector.broadcast %477 : vector<1x128xf32> to vector<2x128xf32>
    %479 = arith.addf %476, %478 : vector<2x128xf32>
    %cst_296 = arith.constant 0.000000e+00 : f32
    %480 = vector.broadcast %cst_296 : f32 to vector<2x128xf32>
    %481 = arith.maximumf %479, %480 : vector<2x128xf32>
    %482 = arith.truncf %481 : vector<2x128xf32> to vector<2x128xbf16>
    %c0_297 = arith.constant 0 : index
    %c0_298 = arith.constant 0 : index
    %483 = vector.load %arg13[%c0_297, %c0_298] : memref<128x256xbf16, #tpu.memory_space<vmem>>, vector<128x256xbf16>
    %cst_299 = arith.constant dense<0.000000e+00> : vector<2x256xf32>
    %484 = tpu.matmul %482, %483, %cst_299 {dimension_numbers = #tpu.dot_dimension_numbers<[1], [0], [0], [1], [0, 0, 1, 1], [], []>} : vector<2x128xbf16>, vector<128x256xbf16>, vector<2x256xf32> -> vector<2x256xf32>
    %c0_300 = arith.constant 0 : index
    %c0_301 = arith.constant 0 : index
    %485 = vector.load %arg14[%c0_300, %c0_301] : memref<1x256xf32, #tpu.memory_space<vmem>>, vector<1x256xf32>
    %486 = vector.broadcast %485 : vector<1x256xf32> to vector<2x256xf32>
    %487 = arith.addf %484, %486 : vector<2x256xf32>
    %488 = vector.extract_strided_slice %487 {offsets = [0, 0], sizes = [2, 128], strides = [1, 1]} : vector<2x256xf32> to vector<2x128xf32>
    %489 = vector.extract_strided_slice %487 {offsets = [0, 128], sizes = [2, 128], strides = [1, 1]} : vector<2x256xf32> to vector<2x128xf32>
    %490 = math.tanh %489 : vector<2x128xf32>
    %cst_302 = arith.constant 1.000000e+00 : f32
    %491 = vector.broadcast %cst_302 : f32 to vector<2x128xf32>
    %492 = arith.addf %490, %491 : vector<2x128xf32>
    %cst_303 = arith.constant 6.000000e+00 : f32
    %493 = vector.broadcast %cst_303 : f32 to vector<2x128xf32>
    %494 = arith.mulf %493, %492 : vector<2x128xf32>
    %cst_304 = arith.constant -1.000000e+01 : f32
    %495 = vector.broadcast %cst_304 : f32 to vector<2x128xf32>
    %496 = arith.addf %495, %494 : vector<2x128xf32>
    %497 = math.exp %496 : vector<2x128xf32>
    %c0_305 = arith.constant 0 : index
    %c0_306 = arith.constant 0 : index
    %498 = vector.load %arg15[%c0_305, %c0_306] : memref<2x128xf32, #tpu.memory_space<vmem>>, vector<2x128xf32>
    %499 = arith.mulf %497, %498 : vector<2x128xf32>
    %500 = arith.addf %488, %499 : vector<2x128xf32>
    %501 = math.tanh %500 : vector<2x128xf32>
    %cst_307 = arith.constant 1.000000e+00 : f32
    %502 = vector.broadcast %cst_307 : f32 to vector<2x128xf32>
    %503 = arith.mulf %501, %502 : vector<2x128xf32>
    %cst_308 = arith.constant 0.000000e+00 : f32
    %504 = vector.broadcast %cst_308 : f32 to vector<2x128xf32>
    %505 = arith.addf %503, %504 : vector<2x128xf32>
    %c0_309 = arith.constant 0 : index
    %c0_310 = arith.constant 0 : index
    %506 = vector.load %arg16[%c0_309, %c0_310] : memref<2x128xf32, #tpu.memory_space<vmem>>, vector<2x128xf32>
    tpu.vector_store %arg16[%c0_309, %c0_310], %505 {strides = array<i32>} : memref<2x128xf32, #tpu.memory_space<vmem>>, vector<2x128xf32>,
    return
  }
}

</mosaic_0001>

<bundles_post_ra>
// kernel: sacae_player_forward.1
= control target key start
LH: loop header
LB: loop body
LE: loop exit
PB: predicated region body
PF: predicated region fallthrough
CT: control target
= control target key end

     0   :  { %s17089_s0 = inlined_call_operand.vmem [shape: f32[4,128,4], index: 0, kind: input, shape index: {}]   ;;  %s17090_s1 = inlined_call_operand.vmem [shape: bf16[9,4,128], index: 1, kind: input, shape index: {}]   ;;  %s17091_s2 = inlined_call_operand.vmem [shape: f32[1,128], index: 2, kind: input, shape index: {}]   ;;  %s17092_s3 = inlined_call_operand.hbm [shape: bf16[9,128,128], index: 3, kind: input, shape index: {}]   ;;  %s17093_s4 = inlined_call_operand.vmem [shape: f32[1,128], index: 4, kind: input, shape index: {}]   ;;  %s17094_s5 = inlined_call_operand.vmem [shape: bf16[25,128,128], index: 5, kind: input, shape index: {}]   ;;  %s17095_s6 = inlined_call_operand.vmem [shape: f32[1,128], index: 6, kind: input, shape index: {}]   ;;  %s17096_s7 = inlined_call_operand.vmem [shape: f32[1,128], index: 7, kind: input, shape index: {}]   ;;  %s17097_s8 = inlined_call_operand.vmem [shape: f32[1,128], index: 8, kind: input, shape index: {}]   ;;  %s17098_s9 = inlined_call_operand.hbm [shape: bf16[128,128], index: 9, kind: input, shape index: {}]   ;;  %s17099_s10 = inlined_call_operand.vmem [shape: f32[1,128], index: 10, kind: input, shape index: {}]   ;;  %s17100_s11 = inlined_call_operand.hbm [shape: bf16[128,128], index: 11, kind: input, shape index: {}]   ;;  %s17101_s12 = inlined_call_operand.vmem [shape: f32[1,128], index: 12, kind: input, shape index: {}]   ;;  %s17102_s13 = inlined_call_operand.vmem [shape: bf16[128,256], index: 13, kind: input, shape index: {}]   ;;  %s17103_s14 = inlined_call_operand.vmem [shape: f32[1,256], index: 14, kind: input, shape index: {}]   ;;  %s17104_s15 = inlined_call_operand.vmem [shape: f32[2,128], index: 15, kind: input, shape index: {}]   ;;  %s17105_s16 = inlined_call_operand.hbm [shape: f32[2,128], index: 16, kind: output, shape index: {}]  }
   0x1   :  { %17107 = sst [smem:[#allocation13_spill]] %s17089_s0 }
   0x2   :  { %21 = vsyncpa [#allocation4], 0 }
   0x3   :  { %22 = vsyncpa [#allocation7], 0 }
   0x4   :  { %23 = vsyncpa [#allocation5], 0  ;;  %s13773_s21 = smov [#allocation6]   ;;  %s13774_s23 = smov [#allocation3]  }
   0x5   :  { %s57_s22 = sshll.u32 %s13773_s21, 4  ;;  %s35_s24 = sshll.u32 %s13774_s23, 4  ;;  %s58_s22 = int_to_ptr.vmem [resolvable:$true] %s57_s22  ;;  %s13867_s24 = int_to_ptr.vmem [resolvable:$true] %s35_s24 }
   0x6   :  { %s13679_s27 = scalar_lea.hbm %s17098_s9, 1024 }
   0x7   :  { %p13680_p0 = scmp.ne.s32.totalorder %s17098_s9, %s13679_s27  ;;  %p13683_p1 = scmp.lt.u32.totalorder %s13679_s27, %s17098_s9 }
   0x9   :  { %p13685_p2 = pnand %p13683_p1, %p13680_p0 }
   0xb   :  { %13688 = shalt.err (!%p13685_p2)
}
   0xc   :  { %s13689_s17 = scalar_lea.vmem %s58_s22, 1024  ;;  %p13694_p4 = scmp.lt.s32.totalorder %s58_s22, %s58_s22 }
   0xd   :  { %p13690_p3 = scmp.ne.s32.totalorder %s58_s22, %s13689_s17  ;;  %p13695_p5 = scmp.lt.s32.totalorder %s13689_s17, %s13689_s17 }
   0xf   :  { %p13696_p6 = por %p13695_p5, %p13694_p4 }
  0x11   :  { %p13697_p7 = pnand %p13696_p6, %p13690_p3 }
  0x13   :  { %13700 = shalt.err (!%p13697_p7)
}
  0x14   :  { %s13775_s18 = smov 64   ;;  %s13776_s19 = smov 4  }
  0x15   :  { %63 = dma.hbm_to_vmem [thread:$0]  %s17098_s9, 1024, %s58_s22, [#allocation7], %s13775_s18, %s13775_s18, %s13776_s19  }
  0x16   :  { %s13701_s26 = scalar_lea.hbm %s17092_s3, 9216 }
  0x17   :  { %p13702_p8 = scmp.ne.s32.totalorder %s17092_s3, %s13701_s26  ;;  %p13705_p9 = scmp.lt.u32.totalorder %s13701_s26, %s17092_s3 }
  0x19   :  { %p13707_p10 = pnand %p13705_p9, %p13702_p8 }
  0x1b   :  { %13710 = shalt.err (!%p13707_p10)
}
  0x1c   :  { %s13711_s0 = scalar_lea.vmem %s13867_s24, 9216  ;;  %p13716_p12 = scmp.lt.s32.totalorder %s13867_s24, %s13867_s24 }
  0x1d   :  { %p13712_p11 = scmp.ne.s32.totalorder %s13867_s24, %s13711_s0  ;;  %p13717_p13 = scmp.lt.s32.totalorder %s13711_s0, %s13711_s0 }
  0x1f   :  { %p13718_p0 = por %p13717_p13, %p13716_p12 }
  0x21   :  { %p13719_p1 = pnand %p13718_p0, %p13712_p11 }
  0x23   :  { %13722 = shalt.err (!%p13719_p1)
}
  0x24   :  { %41 = dma.hbm_to_vmem [thread:$0]  %s17092_s3, 9216, %s13867_s24, [#allocation4], %s13775_s18, %s13775_s18, %s13776_s19  }
  0x25   :  { %s13777_s17 = smov [#allocation8]   ;;  %s13723_s25 = scalar_lea.hbm %s17100_s11, 1024 }
  0x26   :  { %s71_s20 = sshll.u32 %s13777_s17, 4  ;;  %p13724_p2 = scmp.ne.s32.totalorder %s17100_s11, %s13723_s25  ;;  %s72_s20 = int_to_ptr.vmem [resolvable:$true] %s71_s20 }
  0x27   :  { %p13727_p3 = scmp.lt.u32.totalorder %s13723_s25, %s17100_s11 }
  0x29   :  { %p13729_p4 = pnand %p13727_p3, %p13724_p2 }
  0x2b   :  { %13732 = shalt.err (!%p13729_p4)
}
  0x2c   :  { %s13733_s30 = scalar_lea.vmem %s72_s20, 1024  ;;  %p13738_p6 = scmp.lt.s32.totalorder %s72_s20, %s72_s20 }
  0x2d   :  { %p13734_p5 = scmp.ne.s32.totalorder %s72_s20, %s13733_s30  ;;  %p13739_p7 = scmp.lt.s32.totalorder %s13733_s30, %s13733_s30 }
  0x2f   :  { %p13740_p8 = por %p13739_p7, %p13738_p6 }
  0x31   :  { %p13741_p9 = pnand %p13740_p8, %p13734_p5 }
  0x33   :  { %13744 = shalt.err (!%p13741_p9)
}
  0x34   :  { %77 = dma.hbm_to_vmem [thread:$0]  %s17100_s11, 1024, %s72_s20, [#allocation7], %s13775_s18, %s13775_s18, %s13776_s19  }
  0x35   :  { %13767 = dma.done.wait [#allocation4], 9216  }
  0x36   :  { %13768 = vsyncadd [#allocation4], 4294958080 }
  0x37   :  { %13769 = dma.done.wait [#allocation7], 2048  }
  0x38   :  { %13770 = vsyncadd [#allocation7], 4294965248  ;;  %vm205_vm0 = vcmask 1041408   ;;  %v9199_v0 = vld [vmem:[%s17090_s1 + $0x2] sm:$0x3]  ;;  %s17108_s25 = sld [smem:[#allocation13_spill]] }
  0x39   :  { %v169_v1 = vld [vmem:[%s17090_s1] sm:$0x3]  ;;  %13129 = vmatprep.subr.msk.bf16.mxu1 %vm205_vm0, %v9199_v0  ;;  %v207_v3 = vsel %vm205_vm0, %v9199_v0, 0  ;;  %vm180_vm1 = vcmask 31744   ;;  %v9216_v18 = vld [vmem:[%s17090_s1 + $0x4] sm:$0x3] }
  0x3a   :  { %13130 = vmatprep.subr.msk.bf16.mxu0 %vm205_vm0, %v169_v1  ;;  %v330_v4 = vsel %vm205_vm0, %v169_v1, 0  ;;  %11244 = vmatpush3.bf16.msra.mxu1 %v207_v3  ;;  %v511_v21 = vsel %vm205_vm0, %v9216_v18, 0  ;;  %v9225_v40 = vld [vmem:[%s17090_s1 + $0x6] sm:$0x3]  ;;  %vm430_vm2 = vsmask.f32 7424 }
  0x3b   :  { %11262 = vmatpush3.bf16.msra.mxu0 %v330_v4  ;;  %vm13779_vm3 = vmmov 0   ;;  %vm2035_vm4 = vcmask 1046528  }
  0x3c   :  { %13131 = vmatprep.subr.msk.bf16.mxu0 %vm205_vm0, %v9216_v18 }
  0x3e   :  { %v9153_v2 = vld [vmem:[%s17108_s25 + $0x80] sm:$0xff]  ;;  %v13935_v5 = vld [vmem:[%s17108_s25 + $0x88] sm:$0xff]  ;;  %v13940_v6 = vld [vmem:[%s17108_s25 + $0x90] sm:$0xff] }
  0x3f   :  { %v13945_v7 = vld [vmem:[%s17108_s25 + $0x98] sm:$0xff]  ;;  %v13950_v8 = vld [vmem:[%s17108_s25 + $0xa0] sm:$0xff]  ;;  %v170_v9 = vpack.c.bf16 %v13935_v5, %v9153_v2  ;;  %v1263_v11 = vpack.c.bf16 %v13940_v6, %v13935_v5  ;;  %v97_v13 = vld [vmem:[%s17108_s25 + $0x8] sm:$0xff] }
  0x40   :  { %v171_v10 = vpack.c.bf16 %v13945_v7, %v13940_v6  ;;  %v96_v12 = vld [vmem:[%s17108_s25] sm:$0xff]  ;;  %v1264_v14 = vpack.c.bf16 %v13950_v8, %v13945_v7  ;;  %v98_v15 = vld [vmem:[%s17108_s25 + $0x10] sm:$0xff]  ;;  %v99_v17 = vld [vmem:[%s17108_s25 + $0x18] sm:$0xff] }
  0x41   :  { %v13968_v16 = vpack.c.bf16 %v97_v13, %v96_v12  ;;  %11245 = vmatprep.mubr.msk.bf16.mxu1 %vm180_vm1, %v170_v9  ;;  %v13977_v19 = vpack.c.bf16 %v98_v15, %v97_v13  ;;  %v13979_v20 = vpack.c.bf16 %v99_v17, %v98_v15  ;;  %v9158_v22 = vld [vmem:[%s17108_s25 + $0xa8] sm:$0xff]  ;;  %v100_v23 = vld [vmem:[%s17108_s25 + $0x20] sm:$0xff]  ;;  %v9159_v28 = vld [vmem:[%s17108_s25 + $0xb0] sm:$0xff]  ;;  %v659_v13 = vsel %vm205_vm0, %v9225_v40, 0 }
  0x42   :  { %v13992_v24 = vld [vmem:[%s17108_s25 + $0x28] sm:$0xff]  ;;  %11246 = vmatmul.mubr.msk.bf16.vlgmr.msra.gmra.mrb[0].mxu1 %vm180_vm1, %v171_v10  ;;  %v172_v25 = vpack.c.bf16 %v9158_v22, %v13950_v8  ;;  %v14003_v27 = vpack.c.bf16 %v100_v23, %v99_v17  ;;  %v9160_v29 = vld [vmem:[%s17108_s25 + $0xb8] sm:$0xff]  ;;  %v14014_v30 = vld [vmem:[%s17108_s25 + $0x30] sm:$0xff] }
  0x43   :  { %11263 = vmatprep.mubr.msk.bf16.mxu0 %vm180_vm1, %v13968_v16  ;;  %v13999_v26 = vpack.c.bf16 %v13992_v24, %v100_v23  ;;  %v14020_v31 = vld [vmem:[%s17108_s25 + $0x38] sm:$0xff]  ;;  %v9161_v32 = vld [vmem:[%s17108_s25 + $0xc0] sm:$0xff]  ;;  %v9162_v33 = vld [vmem:[%s17108_s25 + $0xc8] sm:$0xff]  ;;  %v173_v36 = vpack.c.bf16 %v9160_v29, %v9159_v28  ;;  %v433_v41 = vshll.u32 %v13968_v16, 16  ;;  %v437_v45 = vshll.u32 %v13979_v20, 16 }
  0x44   :  { %11264 = vmatmul.mubr.msk.bf16.vlgmr.msra.gmra.mrb[0].mxu0 %vm180_vm1, %v13979_v20  ;;  %11249 = vmatprep.mubr.msk.bf16.mxu1 %vm180_vm1, %v172_v25  ;;  %v14033_v34 = vld [vmem:[%s17108_s25 + $0x40] sm:$0xff]  ;;  %v14038_v35 = vld [vmem:[%s17108_s25 + $0x48] sm:$0xff]  ;;  %v14042_v37 = vpack.c.bf16 %v14020_v31, %v14014_v30  ;;  %v174_v38 = vpack.c.bf16 %v9162_v33, %v9161_v32  ;;  %v9163_v42 = vld [vmem:[%s17108_s25 + $0xd0] sm:$0xff]  ;;  %v431_v52 = vshrl.u32 %v13968_v16, 16  ;;  %v441_v55 = vshrl.u32 %v13979_v20, 16 }
  0x45   :  { %11280 = vmatpush3.bf16.msra.mxu0 %v511_v21  ;;  %11267 = vmatprep.mubr.msk.bf16.mxu0 %vm180_vm1, %v13999_v26  ;;  %v14046_v39 = vpack.c.bf16 %v14038_v35, %v14033_v34  ;;  %v9164_v43 = vld [vmem:[%s17108_s25 + $0xd8] sm:$0xff]  ;;  %v14066_v44 = vld [vmem:[%s17108_s25 + $0x50] sm:$0xff]  ;;  %v444_v46 = vshll.u32 %v13999_v26, 16  ;;  %v9165_v48 = vld [vmem:[%s17108_s25 + $0xe0] sm:$0xff]  ;;  %v435_v59 = vrot.slane %v433_v41, 1  ;;  %v439_v62 = vrot.slane %v437_v45, 1 }
  0x46   :  { %13132 = vmatprep.subr.msk.bf16.mxu0 %vm205_vm0, %v9225_v40  ;;  %v14075_v47 = vld [vmem:[%s17108_s25 + $0x58] sm:$0xff]  ;;  %v9166_v49 = vld [vmem:[%s17108_s25 + $0xe8] sm:$0xff]  ;;  %v14086_v50 = vld [vmem:[%s17108_s25 + $0x60] sm:$0xff]  ;;  %v175_v53 = vpack.c.bf16 %v9164_v43, %v9163_v42  ;;  %v451_v56 = vshll.u32 %v14042_v37, 16  ;;  %v448_v1 = vshrl.u32 %v13999_v26, 16  ;;  %v455_v2 = vshrl.u32 %v14042_v37, 16 }
  0x47   :  { %v14091_v51 = vld [vmem:[%s17108_s25 + $0x68] sm:$0xff]  ;;  %v14097_v54 = vld [vmem:[%s17108_s25 + $0x70] sm:$0xff]  ;;  %v9173_v57 = vld [vmem:[%s17108_s25 + $0x120] sm:$0xff]  ;;  %v14109_v60 = vpack.c.bf16 %v14075_v47, %v14066_v44  ;;  %v176_v61 = vpack.c.bf16 %v9166_v49, %v9165_v48  ;;  %v446_v63 = vrot.slane %v444_v46, 1  ;;  %v458_v9 = vshll.u32 %v14046_v39, 16 }
  0x48   :  { %v9174_v58 = vld [vmem:[%s17108_s25 + $0x128] sm:$0xff]  ;;  %v14113_v0 = vpack.c.bf16 %v14091_v51, %v14086_v50  ;;  %v9167_v3 = vld [vmem:[%s17108_s25 + $0xf0] sm:$0xff]  ;;  %v14122_v4 = vpack.c.bf16 %v14097_v54, %v14097_v54  ;;  %v453_v15 = vrot.slane %v451_v56, 1  ;;  %v9169_v17 = vld [vmem:[%s17108_s25 + $0x100] sm:$0xff]  ;;  %v462_v21 = vshrl.u32 %v14046_v39, 16 }
  0x49   :  { %v465_v10 = vshll.u32 %v14109_v60, 16  ;;  %v14126_v12 = vpack.c.bf16 %v9174_v58, %v9173_v57  ;;  %v9170_v18 = vld [vmem:[%s17108_s25 + $0x108] sm:$0xff]  ;;  %v9171_v20 = vld [vmem:[%s17108_s25 + $0x110] sm:$0xff]  ;;  %v9172_v23 = vld [vmem:[%s17108_s25 + $0x118] sm:$0xff]  ;;  %v177_v28 = vpack.c.bf16 %v9167_v3, %v9167_v3  ;;  %v436_v29 = vor.u32 %v435_v59, %v431_v52 }
  0x4a   :  { %11250 = vmatmul.mubr.msk.bf16.gmra.mrb[4].mxu1 %vm180_vm1, %v173_v36  ;;  %v472_v16 = vshll.u32 %v14113_v0, 16  ;;  %v479_v22 = vshll.u32 %v14122_v4, 16  ;;  %v9234_v25 = vld [vmem:[%s17090_s1 + $0x8] sm:$0x3]  ;;  %v14157_v32 = vld [vmem:[%s17090_s1 + $0xa] sm:$0x3]  ;;  %v14162_v42 = vpack.c.bf16 %v9170_v18, %v9169_v17  ;;  %v14173_v49 = vpack.c.bf16 %v9172_v23, %v9171_v20 }
  0x4b   :  { %11253 = vmatprep.mubr.msk.bf16.mxu1 %vm180_vm1, %v174_v38  ;;  %v935_v26 = vshll.u32 %v14126_v12, 16  ;;  %v460_v33 = vrot.slane %v458_v9, 1  ;;  %v467_v36 = vrot.slane %v465_v10, 1  ;;  %v469_v38 = vshrl.u32 %v14109_v60, 16  ;;  %v9175_v45 = vld [vmem:[%s17108_s25 + $0x130] sm:$0xff]  ;;  %v9176_v46 = vld [vmem:[%s17108_s25 + $0x138] sm:$0xff] }
  0x4c   :  { %11268 = vmatmul.mubr.msk.bf16.gmra.mrb[4].mxu0 %vm180_vm1, %v14042_v37  ;;  %v474_v40 = vrot.slane %v472_v16, 1  ;;  %v483_v41 = vshrl.u32 %v14122_v4, 16  ;;  %v14165_v43 = vsel %vm205_vm0, %v9234_v25, 0  ;;  %v481_v48 = vrot.slane %v479_v22, 1  ;;  %v14185_v57 = vld [vmem:[%s17090_s1 + $0xc] sm:$0x3] }
  0x4d   :  { %11271 = vmatprep.mubr.msk.bf16.mxu0 %vm180_vm1, %v14046_v39  ;;  %v476_v39 = vshrl.u32 %v14113_v0, 16  ;;  %v14175_v52 = vrot.slane %v935_v26, 1  ;;  %v924_v56 = vshll.u32 %v14162_v42, 16  ;;  %v440_v58 = vsel %vm430_vm2, %v436_v29, %v439_v62  ;;  %v9177_v16 = vld [vmem:[%s17108_s25 + $0x140] sm:$0xff]  ;;  %v9178_v17 = vld [vmem:[%s17108_s25 + $0x148] sm:$0xff]  ;;  %v9180_v26 = vld [vmem:[%s17108_s25 + $0x158] sm:$0xff] }
  0x4e   :  { %v922_v59 = vshrl.u32 %v14162_v42, 16  ;;  %v14198_v3 = vsel %vm205_vm0, %v14185_v57, 0  ;;  %v939_v9 = vshrl.u32 %v14126_v12, 16  ;;  %v443_v10 = vor.u32 %v441_v55, %v439_v62  ;;  %v9179_v62 = vld [vmem:[%s17108_s25 + $0x150] sm:$0xff]  ;;  %v13671_v5 = vld [vmem:[%s17108_s25 + $0xb8] sm:$0xff]  ;;  %v13672_v6 = vld [vmem:[%s17108_s25 + $0xc0] sm:$0xff] }
  0x4f   :  { %v450_v18 = vor.u32 %v448_v1, %v446_v63  ;;  %v14213_v55 = vpack.c.bf16 %v9178_v17, %v9177_v16  ;;  %v9186_v16 = vld [vmem:[%s17108_s25 + $0x190] sm:$0xff]  ;;  %v9187_v17 = vld [vmem:[%s17108_s25 + $0x198] sm:$0xff] }
  0x50   :  { %v447_v22 = vsel %vm430_vm2, %v443_v10, %v446_v63  ;;  %v457_v63 = vor.u32 %v455_v2, %v453_v15  ;;  %v13674_v7 = vld [vmem:[%s17108_s25 + $0xd0] sm:$0xff] }
  0x51   :  { %v454_v23 = vsel %vm430_vm2, %v450_v18, %v453_v15  ;;  %v9188_v18 = vld [vmem:[%s17108_s25 + $0x1a0] sm:$0xff] }
  0x52   :  { %11254 = vmatmul.mubr.msk.bf16.gmra.mrb[8].mxu1 %vm180_vm1, %v175_v53  ;;  %v14179_v53 = vsel %vm205_vm0, %v14157_v32, 0  ;;  %v461_v37 = vsel %vm430_vm2, %v457_v63, %v460_v33 }
  0x53   :  { %11257 = vmatprep.mubr.msk.bf16.mxu1 %vm180_vm1, %v176_v61  ;;  %v932_v61 = vshrl.u32 %v14173_v49, 16 }
  0x54   :  { %11272 = vmatmul.mubr.msk.bf16.gmra.mrb[8].mxu0 %vm180_vm1, %v14109_v60  ;;  %v928_v60 = vshll.u32 %v14173_v49, 16 }
  0x55   :  { %11275 = vmatprep.mubr.msk.bf16.mxu0 %vm180_vm1, %v14113_v0  ;;  %v14194_v0 = vpack.c.bf16 %v9176_v46, %v9175_v45  ;;  %v14231_v45 = vpack.c.bf16 %v14014_v30, %v13992_v24  ;;  %v14235_v46 = vpack.c.bf16 %v14033_v34, %v14020_v31  ;;  %v14247_v24 = vpack.c.bf16 %v14066_v44, %v14038_v35 }
  0x56   :  { %v14227_v29 = vrot.slane %v928_v60, 1  ;;  %v471_v30 = vor.u32 %v469_v38, %v467_v36  ;;  %v14252_v31 = vpack.c.bf16 %v14086_v50, %v14075_v47  ;;  %v478_v34 = vor.u32 %v476_v39, %v474_v40  ;;  %v9182_v38 = vld [vmem:[%s17108_s25 + $0x168] sm:$0xff] }
  0x57   :  { %v942_v20 = vshll.u32 %v14194_v0, 16  ;;  %v946_v1 = vshrl.u32 %v14194_v0, 16 }
  0x59   :  { %v14262_v35 = vrot.slane %v942_v20, 1  ;;  %v9189_v20 = vld [vmem:[%s17108_s25 + $0x1a8] sm:$0xff] }
  0x5a   :  { %11258 = vmatmul.mubr.msk.bf16.gmra.mrb[12].mxu1 %vm180_vm1, %v177_v28  ;;  %v949_v28 = vshll.u32 %v14213_v55, 16 }
  0x5c   :  { %11276 = vmatmul.mubr.msk.bf16.gmra.mrb[12].mxu0 %vm180_vm1, %v14122_v4  ;;  %v14208_v4 = vrot.slane %v924_v56, 1  ;;  %v464_v56 = vor.u32 %v462_v21, %v460_v33  ;;  %v475_v21 = vsel %vm430_vm2, %v471_v30, %v474_v40  ;;  %v14259_v33 = vpack.c.bf16 %v14097_v54, %v14091_v51  ;;  %v9181_v54 = vld [vmem:[%s17108_s25 + $0x160] sm:$0xff] }
  0x5d   :  { %11281 = vmatprep.mubr.msk.bf16.mxu0 %vm180_vm1, %v440_v58  ;;  %v14238_v58 = vpack.c.bf16 %v9180_v26, %v9179_v62  ;;  %v14264_v44 = vrot.slane %v949_v28, 1  ;;  %v1426_v51 = vshll.u32 %v14231_v45, 16  ;;  %v14290_v39 = vpack.c.bf16 %v9182_v38, %v9181_v54  ;;  %v9184_v40 = vld [vmem:[%s17108_s25 + $0x180] sm:$0xff] }
  0x5e   :  { %v468_v15 = vsel %vm430_vm2, %v464_v56, %v467_v36  ;;  %v485_v36 = vor.u32 %v483_v41, %v481_v48  ;;  %v9185_v41 = vld [vmem:[%s17108_s25 + $0x188] sm:$0xff]  ;;  %v1419_v62 = vshll.u32 %v14003_v27, 16  ;;  %v1423_v26 = vshrl.u32 %v14003_v27, 16 }
  0x5f   :  { %v956_v2 = vshll.u32 %v14238_v58, 16  ;;  %v960_v50 = vshrl.u32 %v14238_v58, 16  ;;  %v772_v10 = vpack.c.bf16 %v9185_v41, %v9184_v40  ;;  %v773_v56 = vpack.c.bf16 %v9187_v17, %v9186_v16 }
  0x60   :  { %v1421_v63 = vrot.slane %v1419_v62, 1  ;;  %v1433_v54 = vshll.u32 %v14235_v46, 16  ;;  %v1430_v38 = vshrl.u32 %v14231_v45, 16  ;;  %v1437_v40 = vshrl.u32 %v14235_v46, 16  ;;  %v9197_v62 = vld [vmem:[%s17108_s25 + $0x1e8] sm:$0xff] }
  0x61   :  { %v14271_v47 = vrot.slane %v956_v2, 1  ;;  %v1440_v41 = vshll.u32 %v14247_v24, 16 }
  0x62   :  { %v1425_v2 = vor.u32 %v1423_v26, %v1421_v63  ;;  %v1447_v26 = vshll.u32 %v14252_v31, 16 }
  0x64   :  { %11282 = vmatmul.mubr.msk.bf16.vlgmr.msra.gmra.mrb[0].mxu0 %vm180_vm1, %v447_v22  ;;  %v1413_v22 = vshrl.u32 %v13977_v19, 16 }
  0x65   :  { %11298 = vmatpush3.bf16.msra.mxu0 %v659_v13  ;;  %11285 = vmatprep.mubr.msk.bf16.mxu0 %vm180_vm1, %v454_v23  ;;  %v953_v13 = vshrl.u32 %v14213_v55, 16  ;;  %v1415_v23 = vshll.u32 %v13977_v19, 16 }
  0x66   :  { %13133 = vmatprep.subr.msk.bf16.mxu0 %vm205_vm0, %v9234_v25  ;;  %v482_v25 = vsel %vm430_vm2, %v478_v34, %v481_v48  ;;  %v1428_v48 = vrot.slane %v1426_v51, 1  ;;  %v9193_v51 = vld [vmem:[%s17108_s25 + $0x1c8] sm:$0xff] }
  0x67   :  { %v1417_v28 = vrot.slane %v1415_v23, 1 }
  0x68   :  { %v14331_v34 = vsel %vm430_vm2, %v1425_v2, %v1428_v48  ;;  %v1432_v16 = vor.u32 %v1430_v38, %v1428_v48  ;;  %v9196_v48 = vld [vmem:[%s17108_s25 + $0x1e0] sm:$0xff] }
  0x6c   :  { %11286 = vmatmul.mubr.msk.bf16.gmra.mrb[4].mxu0 %vm180_vm1, %v461_v37  ;;  %v1418_v37 = vor.u32 %v1417_v28, %v1413_v22  ;;  %v9194_v22 = vld [vmem:[%s17108_s25 + $0x1d0] sm:$0xff]  ;;  %v1444_v28 = vshrl.u32 %v14247_v24, 16 }
  0x6d   :  { %11289 = vmatprep.mubr.msk.bf16.mxu0 %vm180_vm1, %v468_v15  ;;  %v774_v15 = vpack.c.bf16 %v9189_v20, %v9188_v18  ;;  %v1442_v20 = vrot.slane %v1440_v41, 1 }
  0x6e   :  { %v14328_v30 = vsel %vm430_vm2, %v1418_v37, %v1421_v63  ;;  %v1449_v63 = vrot.slane %v1447_v26, 1  ;;  %v1454_v37 = vshll.u32 %v14259_v33, 16 }
  0x70   :  { %v14385_v38 = vrot.slane %v1454_v37, 1 }
  0x74   :  { %11290 = vmatmul.mubr.msk.bf16.gmra.mrb[8].mxu0 %vm180_vm1, %v475_v21  ;;  %v9190_v21 = vld [vmem:[%s17108_s25 + $0x1b0] sm:$0xff] }
  0x75   :  { %11293 = vmatprep.mubr.msk.bf16.mxu0 %vm180_vm1, %v482_v25  ;;  %v9191_v25 = vld [vmem:[%s17108_s25 + $0x1b8] sm:$0xff] }
  0x7c   :  { %11294 = vmatmul.mubr.msk.bf16.gmra.mrb[16].mxu0 %vm180_vm1, %v485_v36  ;;  %v9192_v36 = vld [vmem:[%s17108_s25 + $0x1c0] sm:$0xff] }
  0x7d   :  { %11299 = vmatprep.mubr.msk.bf16.mxu0 %vm180_vm1, %v14162_v42  ;;  %v776_v17 = vpack.c.bf16 %v9193_v51, %v9192_v36  ;;  %v9261_v36 = vld [vmem:[%s17090_s1 + $0xe] sm:$0x3]  ;;  %v9270_v51 = vld [vmem:[%s17090_s1 + $0x10] sm:$0x3]  ;;  %v941_v42 = vor.u32 %v939_v9, %v14175_v52 }
  0x84   :  { %11300 = vmatmul.mubr.msk.bf16.vlgmr.msra.gmra.mrb[0].mxu0 %vm180_vm1, %v14173_v49  ;;  %v948_v49 = vor.u32 %v946_v1, %v14262_v35 }
  0x85   :  { %11316 = vmatpush3.bf16.msra.mxu0 %v14165_v43  ;;  %11303 = vmatprep.mubr.msk.bf16.mxu0 %vm180_vm1, %v14126_v12  ;;  %v963_v43 = vshll.u32 %v14290_v39, 16  ;;  %v955_v12 = vor.u32 %v953_v13, %v14264_v44  ;;  %v13676_v13 = vld [vmem:[%s17108_s25 + $0xe0] sm:$0xff] }
  0x86   :  { %13134 = vmatprep.subr.msk.bf16.mxu0 %vm205_vm0, %v14157_v32  ;;  %v9183_v32 = vld [vmem:[%s17108_s25 + $0x170] sm:$0xff] }
  0x87   :  { %v14306_v60 = vpack.c.bf16 %v9183_v32, %v9183_v32  ;;  %v1435_v32 = vrot.slane %v1433_v54, 1 }
  0x89   :  { %v1439_v18 = vor.u32 %v1437_v40, %v1435_v32  ;;  %v9198_v40 = vld [vmem:[%s17108_s25 + $0x1f0] sm:$0xff] }
  0x8b   :  { %v14364_v23 = vsel %vm430_vm2, %v1439_v18, %v1442_v20  ;;  %v974_v18 = vshrl.u32 %v14306_v60, 16 }
  0x8c   :  { %11304 = vmatmul.mubr.msk.bf16.gmra.mrb[4].mxu0 %vm180_vm1, %v14194_v0  ;;  %v962_v0 = vor.u32 %v960_v50, %v14271_v47 }
  0x8d   :  { %11307 = vmatprep.mubr.msk.bf16.mxu0 %vm180_vm1, %v14213_v55 }
  0x94   :  { %11308 = vmatmul.mubr.msk.bf16.gmra.mrb[8].mxu0 %vm180_vm1, %v14238_v58  ;;  %v13673_v58 = vld [vmem:[%s17108_s25 + $0xc8] sm:$0xff] }
  0x95   :  { %11311 = vmatprep.mubr.msk.bf16.mxu0 %vm180_vm1, %v14290_v39  ;;  %v1267_v8 = vpack.c.bf16 %v13674_v7, %v13673_v58  ;;  %v13155_v58 = vld [vmem:[#allocation3 + $0x60] sm:$0xff]  }
  0x96   :  { %v13156_v7 = vld [vmem:[#allocation3 + $0x160] sm:$0xff]  }
  0x9c   :  { %11312 = vmatmul.mubr.msk.bf16.gmra.mrb[20].mxu0 %vm180_vm1, %v14306_v60 }
  0x9d   :  { %11317 = vmatprep.mubr.msk.bf16.mxu0 %vm180_vm1, %v772_v10  ;;  %v775_v10 = vpack.c.bf16 %v9191_v25, %v9190_v21  ;;  %v778_v21 = vpack.c.bf16 %v9197_v62, %v9196_v48  ;;  %v970_v25 = vshll.u32 %v14306_v60, 16  ;;  %v779_v48 = vpack.c.bf16 %v9198_v40, %v9198_v40 }
  0xa4   :  { %11318 = vmatmul.mubr.msk.bf16.vlgmr.msra.gmra.mrb[0].mxu0 %vm180_vm1, %v773_v56  ;;  %v1451_v56 = vshrl.u32 %v14252_v31, 16 }
  0xa5   :  { %11334 = vmatpush3.bf16.msra.mxu0 %v14179_v53  ;;  %11321 = vmatprep.mubr.msk.bf16.mxu0 %vm180_vm1, %v774_v15  ;;  %v14355_v53 = vsel %vm430_vm2, %v1432_v16, %v1435_v32  ;;  %v1446_v15 = vor.u32 %v1444_v28, %v1442_v20  ;;  %v967_v16 = vshrl.u32 %v14290_v39, 16  ;;  %v927_v20 = vor.u32 %v14208_v4, %v922_v59 }
  0xa6   :  { %13135 = vmatprep.subr.msk.bf16.mxu0 %vm205_vm0, %v14185_v57  ;;  %v9195_v57 = vld [vmem:[%s17108_s25 + $0x1d8] sm:$0xff]  ;;  %v1453_v54 = vor.u32 %v1451_v56, %v1449_v63  ;;  %v934_v39 = vor.u32 %v932_v61, %v14227_v29  ;;  %v945_v4 = vsel %vm430_vm2, %v941_v42, %v14262_v35  ;;  %v959_v61 = vsel %vm430_vm2, %v955_v12, %v14271_v47  ;;  %v13678_v35 = vld [vmem:[%s17108_s25 + $0xf0] sm:$0xff] }
  0xa7   :  { %v777_v2 = vpack.c.bf16 %v9195_v57, %v9194_v22  ;;  %v14388_v32 = vsel %vm430_vm2, %v1446_v15, %v1449_v63  ;;  %v1298_v22 = vsel %vm205_vm0, %v9261_v36, 0  ;;  %v1493_v57 = vsel %vm205_vm0, %v9270_v51, 0  ;;  %v9168_v47 = vld [vmem:[%s17108_s25 + $0xf8] sm:$0xff] }
  0xa8   :  { %v14395_v41 = vsel %vm430_vm2, %v1453_v54, %v14385_v38  ;;  %v931_v62 = vsel %vm430_vm2, %v927_v20, %v14227_v29  ;;  %v938_v59 = vsel %vm430_vm2, %v934_v39, %v14175_v52  ;;  %v952_v52 = vsel %vm430_vm2, %v948_v49, %v14264_v44  ;;  %v111_v29 = vld [vmem:[%s17108_s25 + $0x78] sm:$0xff] }
  0xa9   :  { %v1270_v60 = vpack.c.bf16 %v9168_v47, %v9168_v47 }
  0xac   :  { %11322 = vmatmul.mubr.msk.bf16.gmra.mrb[4].mxu0 %vm180_vm1, %v775_v10  ;;  %v965_v10 = vrot.slane %v963_v43, 1 }
  0xad   :  { %11325 = vmatprep.mubr.msk.bf16.mxu0 %vm180_vm1, %v776_v17  ;;  %v972_v17 = vrot.slane %v970_v25, 1 }
  0xae   :  { %v966_v9 = vsel %vm430_vm2, %v962_v0, %v965_v10  ;;  %v13778_v0 = vmov 0.0  }
  0xaf   :  { %v976_v1 = vor.u32 %v974_v18, %v972_v17  ;;  %11405 = vmatprep.subr.bf16.mxu1 %v13778_v0  ;;  %11421 = vmatprep.mubr.msk.bf16.mxu1 %vm13779_vm3, %v13778_v0 }
  0xb4   :  { %11326 = vmatmul.mubr.msk.bf16.gmra.mrb[8].mxu0 %vm180_vm1, %v777_v2 }
  0xb5   :  { %11329 = vmatprep.mubr.msk.bf16.mxu0 %vm180_vm1, %v778_v21 }
  0xbc   :  { %11330 = vmatmul.mubr.msk.bf16.gmra.mrb[24].mxu0 %vm180_vm1, %v779_v48 }
  0xbd   :  { %11335 = vmatprep.mubr.msk.bf16.mxu0 %vm180_vm1, %v931_v62 }
  0xc4   :  { %11336 = vmatmul.mubr.msk.bf16.vlgmr.msra.gmra.mrb[0].mxu0 %vm180_vm1, %v938_v59 }
  0xc5   :  { %11352 = vmatpush3.bf16.msra.mxu0 %v14198_v3  ;;  %11339 = vmatprep.mubr.msk.bf16.mxu0 %vm180_vm1, %v945_v4  ;;  %v969_v3 = vor.u32 %v967_v16, %v965_v10 }
  0xc6   :  { %13136 = vmatprep.subr.msk.bf16.mxu0 %vm205_vm0, %v9261_v36 }
  0xc7   :  { %v973_v55 = vsel %vm430_vm2, %v969_v3, %v972_v17 }
  0xcc   :  { %11340 = vmatmul.mubr.msk.bf16.gmra.mrb[4].mxu0 %vm180_vm1, %v952_v52  ;;  %v13147_v52 = vld [vmem:[#allocation3 + $0x40] sm:$0xff]  }
  0xcd   :  { %11343 = vmatprep.mubr.msk.bf16.mxu0 %vm180_vm1, %v959_v61  ;;  %v13148_v61 = vld [vmem:[#allocation3 + $0x140] sm:$0xff]   ;;  %11406 = vmatpush3.bf16.msra.mxu1 %v13147_v52 }
  0xce   :  { %11407 = vmatprep.subr.bf16.mxu1 %v13778_v0 }
  0xd4   :  { %11344 = vmatmul.mubr.msk.bf16.gmra.mrb[8].mxu0 %vm180_vm1, %v966_v9  ;;  %v13150_v9 = vld [vmem:[#allocation3 + $0x148] sm:$0xff]  }
  0xd5   :  { %11347 = vmatprep.mubr.msk.bf16.mxu0 %vm180_vm1, %v973_v55 }
  0xdc   :  { %11348 = vmatmul.mubr.msk.bf16.gmra.mrb[28].mxu0 %vm180_vm1, %v976_v1 }
  0xdd   :  { %11353 = vmatprep.mubr.msk.bf16.mxu0 %vm180_vm1, %v13977_v19  ;;  %v14464_v19 = vpack.c.bf16 %v111_v29, %v111_v29 }
  0xe4   :  { %11354 = vmatmul.mubr.msk.bf16.vlgmr.msra.gmra.mrb[0].mxu0 %vm180_vm1, %v14003_v27  ;;  %v13669_v27 = vld [vmem:[%s17108_s25 + $0xa8] sm:$0xff] }
  0xe5   :  { %11370 = vmatpush3.bf16.msra.mxu0 %v1298_v22  ;;  %11357 = vmatprep.mubr.msk.bf16.mxu0 %vm180_vm1, %v14231_v45  ;;  %v13670_v45 = vld [vmem:[%s17108_s25 + $0xb0] sm:$0xff] }
  0xe6   :  { %13137 = vmatprep.subr.msk.bf16.mxu0 %vm205_vm0, %v9270_v51  ;;  %v1461_v51 = vshll.u32 %v14464_v19, 16 }
  0xe8   :  { %v1463_v54 = vrot.slane %v1461_v51, 1 }
  0xec   :  { %11358 = vmatmul.mubr.msk.bf16.gmra.mrb[4].mxu0 %vm180_vm1, %v14235_v46  ;;  %v1265_v46 = vpack.c.bf16 %v13670_v45, %v13669_v27  ;;  %v13151_v27 = vld [vmem:[#allocation3 + $0x50] sm:$0xff]  }
  0xed   :  { %11361 = vmatprep.mubr.msk.bf16.mxu0 %vm180_vm1, %v14247_v24 }
  0xf4   :  { %11362 = vmatmul.mubr.msk.bf16.gmra.mrb[8].mxu0 %vm180_vm1, %v14252_v31  ;;  %v13677_v31 = vld [vmem:[%s17108_s25 + $0xe8] sm:$0xff] }
  0xf5   :  { %11365 = vmatprep.mubr.msk.bf16.mxu0 %vm180_vm1, %v14259_v33  ;;  %v1269_v44 = vpack.c.bf16 %v13678_v35, %v13677_v31  ;;  %v13161_v31 = vld [vmem:[#allocation3 + $0x78] sm:$0xff]  }
  0xf6   :  { %v13162_v35 = vld [vmem:[#allocation3 + $0x178] sm:$0xff]  }
  0xfc   :  { %11366 = vmatmul.mubr.msk.bf16.gmra.mrb[32].mxu0 %vm180_vm1, %v14464_v19 }
  0xfd   :  { %11371 = vmatprep.mubr.msk.bf16.mxu0 %vm180_vm1, %v1263_v11  ;;  %v1266_v11 = vpack.c.bf16 %v13672_v6, %v13671_v5  ;;  %v13152_v5 = vld [vmem:[#allocation3 + $0x150] sm:$0xff]   ;;  %v13153_v6 = vld [vmem:[#allocation3 + $0x58] sm:$0xff]  }
 0x104   :  { %11372 = vmatmul.mubr.msk.bf16.vlgmr.msra.gmra.mrb[0].mxu0 %vm180_vm1, %v1264_v14  ;;  %v13675_v14 = vld [vmem:[%s17108_s25 + $0xd8] sm:$0xff] }
 0x105   :  { %11388 = vmatpush3.bf16.msra.mxu0 %v1493_v57  ;;  %11375 = vmatprep.mubr.msk.bf16.mxu0 %vm180_vm1, %v1265_v46  ;;  %v1268_v24 = vpack.c.bf16 %v13676_v13, %v13675_v14  ;;  %v13158_v14 = vld [vmem:[#allocation3 + $0x168] sm:$0xff]   ;;  %v13159_v13 = vld [vmem:[#allocation3 + $0x70] sm:$0xff]  }
 0x106   :  { %11625 = vmatprep.subr.bf16.mxu0 %v13778_v0 }
 0x10c   :  { %11376 = vmatmul.mubr.msk.bf16.gmra.mrb[4].mxu0 %vm180_vm1, %v1266_v11  ;;  %v13154_v11 = vld [vmem:[#allocation3 + $0x158] sm:$0xff]  }
 0x10d   :  { %11379 = vmatprep.mubr.msk.bf16.mxu0 %vm180_vm1, %v1267_v8  ;;  %v13157_v8 = vld [vmem:[#allocation3 + $0x68] sm:$0xff]  }
 0x114   :  { %11380 = vmatmul.mubr.msk.bf16.gmra.mrb[8].mxu0 %vm180_vm1, %v1268_v24  ;;  %v13160_v24 = vld [vmem:[#allocation3 + $0x170] sm:$0xff]  }
 0x115   :  { %11383 = vmatprep.mubr.msk.bf16.mxu0 %vm180_vm1, %v1269_v44  ;;  %v14514_v50 = vpop.f32.mrb[0].mxu1 }
 0x116   :  { %v14516_v43 = vpop.f32.mrb[1].mxu1 }
 0x117   :  { %v14518_v26 = vpop.f32.mrb[2].mxu1 }
 0x118   :  { %v14520_v28 = vpop.f32.mrb[3].mxu1 }
 0x11c   :  { %11384 = vmatmul.mubr.msk.bf16.gmra.mrb[36].mxu0 %vm180_vm1, %v1270_v60 }
 0x11d   :  { %11389 = vmatprep.mubr.msk.bf16.mxu0 %vm180_vm1, %v14328_v30  ;;  %v14525_v63 = vpop.f32.mrb[4].mxu1  ;;  %v1458_v30 = vshrl.u32 %v14259_v33, 16 }
 0x11e   :  { %v14527_v56 = vpop.f32.mrb[5].mxu1 }
 0x11f   :  { %v14529_v37 = vpop.f32.mrb[6].mxu1 }
 0x120   :  { %v14531_v2 = vpop.f32.mrb[7].mxu1 }
 0x124   :  { %11390 = vmatmul.mubr.msk.bf16.vlgmr.msra.gmra.mrb[0].mxu0 %vm180_vm1, %v14331_v34 }
 0x125   :  { %11393 = vmatprep.mubr.msk.bf16.mxu0 %vm180_vm1, %v14355_v53  ;;  %v14537_v15 = vpop.f32.mrb[8].mxu1  ;;  %v1460_v53 = vor.u32 %v1458_v30, %v14385_v38  ;;  %11626 = vmatpush3.bf16.msra.mxu0 %v13148_v61  ;;  %v14589_v61 = vld [vmem:[%s17091_s2] ss:$0 sm:$0xff] }
 0x126   :  { %v14539_v21 = vpop.f32.mrb[9].mxu1  ;;  %11627 = vmatprep.subr.bf16.mxu0 %v13778_v0 }
 0x127   :  { %v14541_v25 = vpop.f32.mrb[10].mxu1  ;;  %v1464_v48 = vsel %vm430_vm2, %v1460_v53, %v1463_v54 }
 0x128   :  { %v14544_v36 = vpop.f32.mrb[11].mxu1 }
 0x129   :  { %11628 = vmatpush3.bf16.msra.mxu0 %v13150_v9 }
 0x12a   :  { %11629 = vmatprep.subr.bf16.mxu0 %v13778_v0 }
 0x12c   :  { %11394 = vmatmul.mubr.msk.bf16.gmra.mrb[4].mxu0 %vm180_vm1, %v14364_v23  ;;  %v1465_v23 = vshrl.u32 %v14464_v19, 16 }
 0x12d   :  { %11397 = vmatprep.mubr.msk.bf16.mxu0 %vm180_vm1, %v14388_v32  ;;  %v11259_v34 = vpop.f32.mrb[12].mxu1  ;;  %11630 = vmatpush3.bf16.msra.mxu0 %v13152_v5 }
 0x12e   :  { %v291_v10 = vpop.f32.mrb[13].mxu1  ;;  %v1467_v38 = vor.u32 %v1465_v23, %v1463_v54  ;;  %11631 = vmatprep.subr.bf16.mxu0 %v13778_v0 }
 0x12f   :  { %v11277_v40 = vpop.f32.mrb[12].mxu0  ;;  %v11260_v18 = vpop.f32.mrb[14].mxu1 }
 0x130   :  { %v423_v16 = vadd.f32 %v11277_v40, %v11259_v34  ;;  %v414_v17 = vpop.f32.mrb[13].mxu0  ;;  %v294_v22 = vpop.f32.mrb[15].mxu1 }
 0x131   :  { %v415_v33 = vadd.f32 %v414_v17, %v291_v10  ;;  %v11278_v20 = vpop.f32.mrb[14].mxu0  ;;  %11632 = vmatpush3.bf16.msra.mxu0 %v13154_v11 }
 0x132   :  { %v417_v57 = vpop.f32.mrb[15].mxu0  ;;  %11633 = vmatprep.subr.bf16.mxu0 %v13778_v0 }
 0x133   :  { %v418_v62 = vadd.f32 %v417_v57, %v294_v22 }
 0x134   :  { %11398 = vmatmul.mubr.msk.bf16.gmra.mrb[8].mxu0 %vm180_vm1, %v14395_v41  ;;  %v13149_v41 = vld [vmem:[#allocation3 + $0x48] sm:$0xff]  }
 0x135   :  { %11401 = vmatprep.mubr.msk.bf16.mxu0 %vm180_vm1, %v1464_v48  ;;  %11408 = vmatpush3.bf16.msra.mxu1 %v13149_v41 }
 0x136   :  { %11409 = vmatprep.subr.bf16.mxu1 %v13778_v0  ;;  %11634 = vmatpush3.bf16.msra.mxu0 %v13156_v7 }
 0x137   :  { %11635 = vmatprep.subr.bf16.mxu0 %v13778_v0 }
 0x139   :  { %11410 = vmatpush3.bf16.msra.mxu1 %v13151_v27 }
 0x13a   :  { %11411 = vmatprep.subr.bf16.mxu1 %v13778_v0  ;;  %11636 = vmatpush3.bf16.msra.mxu0 %v13158_v14 }
 0x13b   :  { %11637 = vmatprep.subr.bf16.mxu0 %v13778_v0 }
 0x13c   :  { %11402 = vmatmul.mubr.msk.bf16.gmra.mrb[40].mxu0 %vm180_vm1, %v1467_v38 }
 0x13d   :  { %11412 = vmatpush3.bf16.msra.mxu1 %v13153_v6  ;;  %11641 = vmatprep.mubr.msk.bf16.mxu0 %vm13779_vm3, %v13778_v0 }
 0x13e   :  { %11413 = vmatprep.subr.bf16.mxu1 %v13778_v0  ;;  %11638 = vmatpush3.bf16.msra.mxu0 %v13160_v24 }
 0x13f   :  { %11639 = vmatprep.subr.bf16.mxu0 %v13778_v0 }
 0x141   :  { %11414 = vmatpush3.bf16.msra.mxu1 %v13155_v58 }
 0x142   :  { %11415 = vmatprep.subr.bf16.mxu1 %v13778_v0  ;;  %11640 = vmatpush3.bf16.msra.mxu0 %v13162_v35 }
 0x143   :  { %11713 = vmatprep.subr.bf16.mxu0 %v13778_v0 }
 0x145   :  { %11416 = vmatpush3.bf16.msra.mxu1 %v13157_v8 }
 0x146   :  { %11417 = vmatprep.subr.bf16.mxu1 %v13778_v0 }
 0x149   :  { %11418 = vmatpush3.bf16.msra.mxu1 %v13159_v13 }
 0x14a   :  { %11419 = vmatprep.subr.bf16.mxu1 %v13778_v0 }
 0x14d   :  { %11420 = vmatpush3.bf16.msra.mxu1 %v13161_v31 }
 0x14e   :  { %11449 = vmatprep.subr.bf16.mxu1 %v13778_v0 }
 0x14f   :  { %v11295_v32 = vpop.f32.mrb[16].mxu0 }
 0x150   :  { %v623_v39 = vadd.f32 %v11295_v32, %v423_v16  ;;  %v595_v42 = vpop.f32.mrb[17].mxu0 }
 0x151   :  { %v621_v59 = vadd.f32 %v595_v42, %v415_v33  ;;  %v11296_v4 = vpop.f32.mrb[18].mxu0 }
 0x152   :  { %v598_v49 = vpop.f32.mrb[19].mxu0 }
 0x153   :  { %v622_v12 = vadd.f32 %v598_v49, %v418_v62 }
 0x16f   :  { %v11313_v3 = vpop.f32.mrb[20].mxu0 }
 0x170   :  { %v771_v55 = vadd.f32 %v11313_v3, %v623_v39  ;;  %v743_v1 = vpop.f32.mrb[21].mxu0 }
 0x171   :  { %v769_v29 = vadd.f32 %v743_v1, %v621_v59  ;;  %v11314_v19 = vpop.f32.mrb[22].mxu0 }
 0x172   :  { %v746_v45 = vpop.f32.mrb[23].mxu0 }
 0x173   :  { %v770_v46 = vadd.f32 %v746_v45, %v622_v12 }
 0x18f   :  { %v11331_v44 = vpop.f32.mrb[24].mxu0 }
 0x190   :  { %v919_v47 = vadd.f32 %v11331_v44, %v771_v55  ;;  %v891_v60 = vpop.f32.mrb[25].mxu0 }
 0x191   :  { %v917_v30 = vadd.f32 %v891_v60, %v769_v29  ;;  %v11332_v51 = vpop.f32.mrb[26].mxu0 }
 0x192   :  { %v894_v34 = vpop.f32.mrb[27].mxu0 }
 0x193   :  { %v918_v53 = vadd.f32 %v894_v34, %v770_v46 }
 0x1af   :  { %v11349_v54 = vpop.f32.mrb[28].mxu0 }
 0x1b0   :  { %v1114_v40 = vadd.f32 %v11349_v54, %v919_v47  ;;  %v1086_v10 = vpop.f32.mrb[29].mxu0 }
 0x1b1   :  { %v1112_v16 = vadd.f32 %v1086_v10, %v917_v30  ;;  %v11350_v17 = vpop.f32.mrb[30].mxu0 }
 0x1b2   :  { %v1089_v18 = vpop.f32.mrb[31].mxu0 }
 0x1b3   :  { %v1113_v33 = vadd.f32 %v1089_v18, %v918_v53 }
 0x1cf   :  { %v11367_v20 = vpop.f32.mrb[32].mxu0 }
 0x1d0   :  { %v1262_v22 = vadd.f32 %v11367_v20, %v1114_v40  ;;  %v1234_v57 = vpop.f32.mrb[33].mxu0 }
 0x1d1   :  { %v1260_v48 = vadd.f32 %v1234_v57, %v1112_v16  ;;  %v11368_v23 = vpop.f32.mrb[34].mxu0 }
 0x1d2   :  { %v1237_v62 = vpop.f32.mrb[35].mxu0 }
 0x1d3   :  { %v1261_v38 = vadd.f32 %v1237_v62, %v1113_v33 }
 0x1ef   :  { %v11385_v32 = vpop.f32.mrb[36].mxu0 }
 0x1f0   :  { %v14580_v39 = vadd.f32 %v11385_v32, %v1262_v22  ;;  %v1382_v42 = vpop.f32.mrb[37].mxu0  ;;  %v13163_v22 = vld [vmem:[#allocation3] sm:$0xff]  }
 0x1f1   :  { %v14582_v59 = vadd.f32 %v1382_v42, %v1260_v48  ;;  %v11386_v4 = vpop.f32.mrb[38].mxu0 }
 0x1f2   :  { %v1385_v49 = vpop.f32.mrb[39].mxu0 }
 0x1f3   :  { %v14584_v12 = vadd.f32 %v1385_v49, %v1261_v38 }
 0x1f7   :  { %v11391_v52 = vpop.f32.mrb[0].mxu0 }
 0x1f8   :  { %v12841_v41 = vadd.f32 %v11391_v52, %v14514_v50  ;;  %v1529_v3 = vpop.f32.mrb[1].mxu0 }
 0x1f9   :  { %v12842_v9 = vadd.f32 %v1529_v3, %v14516_v43  ;;  %v11392_v55 = vpop.f32.mrb[2].mxu0 }
 0x1fa   :  { %v1615_v1 = vadd.f32 %v12841_v41, %v14589_v61  ;;  %v12843_v29 = vadd.f32 %v11392_v55, %v14518_v26  ;;  %v1532_v19 = vpop.f32.mrb[3].mxu0  ;;  %v13167_v55 = vld [vmem:[#allocation3 + $0x1c0] sm:$0xff]  }
 0x1fb   :  { %v1613_v27 = vadd.f32 %v12842_v9, %v14589_v61  ;;  %v12844_v45 = vadd.f32 %v1532_v19, %v14520_v28  ;;  %v13164_v19 = vld [vmem:[#allocation3 + $0x8] sm:$0xff]  }
 0x1fc   :  { %v1616_v46 = vadd.f32 %v12843_v29, %v14589_v61  ;;  %v1630_v6 = vmax.f32 %v1615_v1, 0.0 }
 0x1fd   :  { %v1614_v5 = vadd.f32 %v12844_v45, %v14589_v61  ;;  %v1628_v50 = vmax.f32 %v1613_v27, 0.0 }
 0x1fe   :  { %v1631_v11 = vmax.f32 %v1616_v46, 0.0 }
 0x1ff   :  { %v1629_v58 = vmax.f32 %v1614_v5, 0.0  ;;  %v11395_v7 = vpop.f32.mrb[4].mxu0 }
 0x200   :  { %v14599_v43 = vpack.c.bf16 %v1631_v11, %v1630_v6  ;;  %v12845_v8 = vadd.f32 %v11395_v7, %v14525_v63  ;;  %v1545_v14 = vpop.f32.mrb[5].mxu0 }
 0x201   :  { %v14602_v26 = vpack.c.bf16 %v1629_v58, %v1628_v50  ;;  %v14604_v13 = vpack.c.bf16 %v1630_v6, %v1629_v58  ;;  %v12846_v28 = vadd.f32 %v1545_v14, %v14527_v56  ;;  %v11396_v24 = vpop.f32.mrb[6].mxu0  ;;  %v13169_v50 = vld [vmem:[#allocation3 + $0x1c8] sm:$0xff]  }
 0x202   :  { %v1619_v31 = vadd.f32 %v12845_v8, %v14589_v61  ;;  %v12847_v35 = vadd.f32 %v11396_v24, %v14529_v37  ;;  %v1548_v44 = vpop.f32.mrb[7].mxu0  ;;  %v1691_v63 = vshll.u32 %v14599_v43, 16  ;;  %v2037_v16 = vrot.slane %v14599_v43, 1 }
 0x203   :  { %v1617_v47 = vadd.f32 %v12846_v28, %v14589_v61  ;;  %v12848_v60 = vadd.f32 %v1548_v44, %v14531_v2  ;;  %v1686_v30 = vshll.u32 %v14602_v26, 16  ;;  %v1684_v34 = vshrl.u32 %v14602_v26, 16  ;;  %v13165_v28 = vld [vmem:[#allocation3 + $0x10] sm:$0xff]  }
 0x204   :  { %v1620_v51 = vadd.f32 %v12847_v35, %v14589_v61  ;;  %v2036_v37 = vrot.slane %v14602_v26, 1  ;;  %v1634_v40 = vmax.f32 %v1619_v31, 0.0  ;;  %v1693_v20 = vrot.slane %v1691_v63, 1 }
 0x205   :  { %v1632_v56 = vmax.f32 %v1617_v47, 0.0  ;;  %v1618_v53 = vadd.f32 %v12848_v60, %v14589_v61  ;;  %v1688_v54 = vrot.slane %v1686_v30, 1  ;;  %v2612_v3 = vrot.slane %v14604_v13, 1 }
 0x206   :  { %v1635_v10 = vmax.f32 %v1620_v51, 0.0  ;;  %v14626_v62 = vsel %vm2035_vm4, %v2036_v37, %v2037_v16  ;;  %v1695_v5 = vshrl.u32 %v14599_v43, 16 }
 0x207   :  { %v14618_v2 = vpack.c.bf16 %v1632_v56, %v1631_v11  ;;  %v1633_v17 = vmax.f32 %v1618_v53, 0.0  ;;  %v11399_v18 = vpop.f32.mrb[8].mxu0  ;;  %v1689_v33 = vor.u32 %v1688_v54, %v1684_v34 }
 0x208   :  { %v14620_v57 = vpack.c.bf16 %v1635_v10, %v1634_v40  ;;  %v12849_v48 = vadd.f32 %v11399_v18, %v14537_v15  ;;  %v1561_v23 = vpop.f32.mrb[9].mxu0  ;;  %v1697_v14 = vor.u32 %v1695_v5, %v1693_v20 }
 0x209   :  { %v14628_v38 = vpack.c.bf16 %v1633_v17, %v1632_v56  ;;  %v14630_v32 = vpack.c.bf16 %v1634_v40, %v1633_v17  ;;  %v12850_v42 = vadd.f32 %v1561_v23, %v14539_v21  ;;  %v11400_v4 = vpop.f32.mrb[10].mxu0  ;;  %v1694_v49 = vsel %vm430_vm2, %v1689_v33, %v1693_v20  ;;  %v13166_v40 = vld [vmem:[#allocation3 + $0x18] sm:$0xff]   ;;  %v13168_v23 = vld [vmem:[#allocation3 + $0x20] sm:$0xff]  }
 0x20a   :  { %v1623_v52 = vadd.f32 %v12849_v48, %v14589_v61  ;;  %v12851_v41 = vadd.f32 %v11400_v4, %v14541_v25  ;;  %v1564_v15 = vpop.f32.mrb[11].mxu0  ;;  %11422 = vmatmul.mubr.bf16.vlgmr.msra.gmra.mrb[16].mxu1 %v1694_v49  ;;  %v2613_v9 = vrot.slane %v14618_v2, 1  ;;  %v1707_v37 = vshll.u32 %v14620_v57, 16  ;;  %v13172_v33 = vld [vmem:[#allocation3 + $0x1d8] sm:$0xff]  }
 0x20b   :  { %v1621_v1 = vadd.f32 %v12850_v42, %v14589_v61  ;;  %v12852_v29 = vadd.f32 %v1564_v15, %v14544_v36  ;;  %11450 = vmatpush3.bf16.msra.mxu1 %v13163_v22  ;;  %11425 = vmatprep.mubr.msk.bf16.mxu1 %vm13779_vm3, %v13778_v0  ;;  %v1699_v21 = vshll.u32 %v14628_v38, 16  ;;  %v2615_v44 = vrot.slane %v14630_v32, 1 }
 0x20c   :  { %v1624_v25 = vadd.f32 %v12851_v41, %v14589_v61  ;;  %v2614_v27 = vsel %vm2035_vm4, %v2612_v3, %v2613_v9  ;;  %11451 = vmatprep.subr.bf16.mxu1 %v13778_v0  ;;  %v1638_v6 = vmax.f32 %v1623_v52, 0.0  ;;  %v1709_v48 = vrot.slane %v1707_v37, 1  ;;  %v13174_v52 = vld [vmem:[#allocation3 + $0x1e0] sm:$0xff]   ;;  %v13171_v41 = vld [vmem:[#allocation3 + $0x28] sm:$0xff]  }
 0x20d   :  { %v1636_v45 = vmax.f32 %v1621_v1, 0.0  ;;  %v1622_v46 = vadd.f32 %v12852_v29, %v14589_v61  ;;  %11642 = vmatmul.mubr.bf16.vlgmr.msra.gmra.mrb[44].mxu0 %v2614_v27  ;;  %v1701_v36 = vrot.slane %v1699_v21, 1  ;;  %v1711_v3 = vshrl.u32 %v14620_v57, 16  ;;  %v13173_v29 = vld [vmem:[#allocation3 + $0x30] sm:$0xff]  }
 0x20e   :  { %v1639_v11 = vmax.f32 %v1624_v25, 0.0  ;;  %11645 = vmatprep.mubr.msk.bf16.mxu0 %vm13779_vm3, %v13778_v0  ;;  %11714 = vmatpush3.bf16.msra.mxu0 %v13167_v55  ;;  %v13175_v55 = vld [vmem:[#allocation3 + $0x1e8] sm:$0xff]   ;;  %v13177_v25 = vld [vmem:[#allocation3 + $0x1f0] sm:$0xff]  }
 0x20f   :  { %v14650_v58 = vpack.c.bf16 %v1636_v45, %v1635_v10  ;;  %v1637_v7 = vmax.f32 %v1622_v46, 0.0  ;;  %v11403_v8 = vpop.f32.mrb[40].mxu0  ;;  %11452 = vmatpush3.bf16.msra.mxu1 %v13164_v19  ;;  %11715 = vmatprep.subr.bf16.mxu0 %v13778_v0  ;;  %v14664_v51 = vsel %vm430_vm2, %v1697_v14, %v1701_v36  ;;  %v2616_v10 = vsel %vm2035_vm4, %v2613_v9, %v2615_v44  ;;  %v13176_v46 = vld [vmem:[#allocation3 + $0x38] sm:$0xff]  }
 0x210   :  { %v14653_v24 = vpack.c.bf16 %v1639_v11, %v1638_v6  ;;  %v1605_v31 = vadd.f32 %v11403_v8, %v14580_v39  ;;  %v1577_v35 = vpop.f32.mrb[41].mxu0  ;;  %11453 = vmatprep.subr.bf16.mxu1 %v13778_v0  ;;  %v13170_v39 = vld [vmem:[#allocation3 + $0x1d0] sm:$0xff]   ;;  %v1713_v1 = vor.u32 %v1711_v3, %v1709_v48 }
 0x211   :  { %v14658_v47 = vpack.c.bf16 %v1637_v7, %v1636_v45  ;;  %v14660_v60 = vpack.c.bf16 %v1638_v6, %v1637_v7  ;;  %v1603_v30 = vadd.f32 %v1577_v35, %v14582_v59  ;;  %v11404_v63 = vpop.f32.mrb[42].mxu0  ;;  %v1703_v59 = vshrl.u32 %v14628_v38, 16  ;;  %v13178_v7 = vld [vmem:[#allocation3 + $0x1f8] sm:$0xff]  }
 0x212   :  { %v14667_v34 = vadd.f32 %v14589_v61, %v1605_v31  ;;  %v1580_v56 = vpop.f32.mrb[43].mxu0  ;;  %11426 = vmatmul.mubr.bf16.gmra.mrb[20].mxu1 %v14664_v51  ;;  %11716 = vmatpush3.bf16.msra.mxu0 %v13169_v50  ;;  %v2617_v42 = vrot.slane %v14650_v58, 1  ;;  %v1723_v45 = vshll.u32 %v14653_v24, 16  ;;  %v1727_v63 = vshrl.u32 %v14653_v24, 16 }
 0x213   :  { %v1625_v53 = vadd.f32 %v14589_v61, %v1603_v30  ;;  %v1604_v54 = vadd.f32 %v1580_v56, %v14584_v12  ;;  %11429 = vmatprep.mubr.msk.bf16.mxu1 %vm13779_vm3, %v13778_v0  ;;  %11454 = vmatpush3.bf16.msra.mxu1 %v13165_v28  ;;  %v1705_v12 = vor.u32 %v1703_v59, %v1701_v36  ;;  %v1715_v49 = vshll.u32 %v14658_v47, 16 }
 0x214   :  { %11455 = vmatprep.subr.bf16.mxu1 %v13778_v0  ;;  %11717 = vmatprep.subr.bf16.mxu0 %v13778_v0  ;;  %v2618_v15 = vsel %vm2035_vm4, %v2615_v44, %v2617_v42  ;;  %v2619_v21 = vrot.slane %v14660_v60, 1  ;;  %v1719_v27 = vshrl.u32 %v14658_v47, 16  ;;  %v1725_v8 = vrot.slane %v1723_v45, 1  ;;  %v13191_v45 = vld [vmem:[#allocation3 + $0xe0] sm:$0xff]  }
 0x215   :  { %v1640_v17 = vmax.f32 %v1625_v53, 0.0  ;;  %v1626_v18 = vadd.f32 %v14589_v61, %v1604_v54  ;;  %11646 = vmatmul.mubr.bf16.gmra.mrb[48].mxu0 %v2616_v10  ;;  %v14690_v4 = vsel %vm430_vm2, %v1705_v12, %v1709_v48  ;;  %v1717_v9 = vrot.slane %v1715_v49, 1  ;;  %v13179_v10 = vld [vmem:[#allocation3 + $0x80] sm:$0xff]   ;;  %v13184_v12 = vld [vmem:[#allocation3 + $0xa8] sm:$0xff]  }
 0x216   :  { %11649 = vmatprep.mubr.msk.bf16.mxu0 %vm13779_vm3, %v13778_v0  ;;  %11718 = vmatpush3.bf16.msra.mxu0 %v13170_v39  ;;  %v2620_v5 = vsel %vm2035_vm4, %v2617_v42, %v2619_v21  ;;  %v1729_v39 = vor.u32 %v1727_v63, %v1725_v8  ;;  %v13196_v63 = vld [vmem:[#allocation3 + $0x108] sm:$0xff]  }
 0x217   :  { %v14682_v20 = vpack.c.bf16 %v1640_v17, %v1639_v11  ;;  %v1641_v22 = vmax.f32 %v1626_v18, 0.0  ;;  %11456 = vmatpush3.bf16.msra.mxu1 %v13166_v40  ;;  %11719 = vmatprep.subr.bf16.mxu0 %v13778_v0  ;;  %v14706_v19 = vsel %vm430_vm2, %v1713_v1, %v1717_v9  ;;  %v14716_v36 = vpack.c.bf16 %v1640_v17, %v1640_v17  ;;  %v13181_v18 = vld [vmem:[#allocation3 + $0x90] sm:$0xff]   ;;  %v13187_v1 = vld [vmem:[#allocation3 + $0xc0] sm:$0xff]  }
 0x218   :  { %11457 = vmatprep.subr.bf16.mxu1 %v13778_v0  ;;  %v1721_v6 = vor.u32 %v1719_v27, %v1717_v9  ;;  %v14719_v11 = vrot.slane %v14653_v24, 1  ;;  %v2041_v27 = vrot.slane %v14620_v57, 1 }
 0x219   :  { %v14687_v61 = vpack.c.bf16 %v1641_v22, %v1640_v17  ;;  %v2621_v28 = vrot.slane %v14682_v20, 1  ;;  %v1731_v35 = vshll.u32 %v14716_v36, 16  ;;  %v14738_v44 = vpack.c.bf16 %v1641_v22, %v1641_v22  ;;  %v13180_v17 = vld [vmem:[#allocation3 + $0x88] sm:$0xff]   ;;  %v13186_v22 = vld [vmem:[#allocation3 + $0xb8] sm:$0xff]  }
 0x21a   :  { %11430 = vmatmul.mubr.bf16.gmra.mrb[24].mxu1 %v14690_v4  ;;  %11720 = vmatpush3.bf16.msra.mxu0 %v13172_v33  ;;  %v1726_v31 = vsel %vm430_vm2, %v1721_v6, %v1725_v8  ;;  %v1735_v37 = vshrl.u32 %v14716_v36, 16  ;;  %v13185_v33 = vld [vmem:[#allocation3 + $0xb0] sm:$0xff]   ;;  %v13194_v8 = vld [vmem:[#allocation3 + $0xf8] sm:$0xff]  }
 0x21b   :  { %11433 = vmatprep.mubr.msk.bf16.mxu1 %vm13779_vm3, %v13778_v0  ;;  %11458 = vmatpush3.bf16.msra.mxu1 %v13168_v23  ;;  %v3135_v50 = vrot.slane %v14687_v61, 1  ;;  %v2622_v30 = vsel %vm2035_vm4, %v2619_v21, %v2621_v28  ;;  %v1733_v56 = vrot.slane %v1731_v35, 1  ;;  %v2623_v53 = vrot.slane %v14738_v44, 1  ;;  %v13193_v6 = vld [vmem:[#allocation3 + $0xf0] sm:$0xff]  }
 0x21c   :  { %11459 = vmatprep.subr.bf16.mxu1 %v13778_v0  ;;  %11721 = vmatprep.subr.bf16.mxu0 %v13778_v0  ;;  %v2955_v48 = vshll.u32 %v14687_v61, 16  ;;  %v1642_v23 = vmax.f32 %v14667_v34, 0.0  ;;  %v2959_v34 = vshrl.u32 %v14687_v61, 16  ;;  %v2039_v21 = vrot.slane %v14628_v38, 1 }
 0x21d   :  { %11650 = vmatmul.mubr.bf16.gmra.mrb[52].mxu0 %v2618_v15  ;;  %v14729_v14 = vsel %vm2035_vm4, %v14719_v11, %v3135_v50  ;;  %v1734_v54 = vsel %vm430_vm2, %v1729_v39, %v1733_v56  ;;  %v2624_v59 = vsel %vm2035_vm4, %v2621_v28, %v2623_v53  ;;  %v1737_v40 = vor.u32 %v1735_v37, %v1733_v56  ;;  %v13199_v56 = vld [vmem:[#allocation3 + $0x120] sm:$0xff]  }
 0x21e   :  { %11653 = vmatprep.mubr.msk.bf16.mxu0 %vm13779_vm3, %v13778_v0  ;;  %11722 = vmatpush3.bf16.msra.mxu0 %v13174_v52  ;;  %v2957_v42 = vrot.slane %v2955_v48, 1 }
 0x21f   :  { %11460 = vmatpush3.bf16.msra.mxu1 %v13171_v41  ;;  %11723 = vmatprep.subr.bf16.mxu0 %v13778_v0 }
 0x220   :  { %11461 = vmatprep.subr.bf16.mxu1 %v13778_v0  ;;  %v2958_v49 = vsel %vm430_vm2, %v1729_v39, %v2957_v42  ;;  %v2961_v41 = vor.u32 %v2959_v34, %v2957_v42  ;;  %v13200_v39 = vld [vmem:[#allocation3 + $0x128] sm:$0xff]  }
 0x222   :  { %11434 = vmatmul.mubr.bf16.gmra.mrb[28].mxu1 %v14706_v19  ;;  %11724 = vmatpush3.bf16.msra.mxu0 %v13175_v55 }
 0x223   :  { %11437 = vmatprep.mubr.msk.bf16.mxu1 %vm13779_vm3, %v13778_v0  ;;  %11462 = vmatpush3.bf16.msra.mxu1 %v13173_v29  ;;  %v13188_v29 = vld [vmem:[#allocation3 + $0xc8] sm:$0xff]  }
 0x224   :  { %11463 = vmatprep.subr.bf16.mxu1 %v13778_v0  ;;  %11725 = vmatprep.subr.bf16.mxu0 %v13778_v0 }
 0x225   :  { %11654 = vmatmul.mubr.bf16.gmra.mrb[56].mxu0 %v2620_v5  ;;  %v2043_v5 = vrot.slane %v14658_v47, 1 }
 0x226   :  { %11657 = vmatprep.mubr.msk.bf16.mxu0 %vm13779_vm3, %v13778_v0  ;;  %11726 = vmatpush3.bf16.msra.mxu0 %v13177_v25  ;;  %v14820_v25 = vsel %vm2035_vm4, %v2037_v16, %v2039_v21  ;;  %v13192_v16 = vld [vmem:[#allocation3 + $0xe8] sm:$0xff]  }
 0x227   :  { %11464 = vmatpush3.bf16.msra.mxu1 %v13176_v46  ;;  %11727 = vmatprep.subr.bf16.mxu0 %v13778_v0  ;;  %v14829_v46 = vsel %vm2035_vm4, %v2039_v21, %v2041_v27  ;;  %v14847_v28 = vsel %vm2035_vm4, %v2043_v5, %v14719_v11 }
 0x228   :  { %11493 = vmatprep.subr.bf16.mxu1 %v13778_v0 }
 0x22a   :  { %11438 = vmatmul.mubr.bf16.gmra.mrb[32].mxu1 %v1726_v31  ;;  %11728 = vmatpush3.bf16.msra.mxu0 %v13178_v7  ;;  %v14838_v7 = vsel %vm2035_vm4, %v2041_v27, %v2043_v5 }
 0x22b   :  { %11441 = vmatprep.mubr.msk.bf16.mxu1 %vm13779_vm3, %v13778_v0  ;;  %11801 = vmatprep.subr.bf16.mxu0 %v13778_v0 }
 0x22d   :  { %11658 = vmatmul.mubr.bf16.gmra.mrb[60].mxu0 %v2622_v30  ;;  %v13195_v30 = vld [vmem:[#allocation3 + $0x100] sm:$0xff]  }
 0x22e   :  { %11661 = vmatprep.mubr.msk.bf16.mxu0 %vm13779_vm3, %v13778_v0 }
 0x232   :  { %11442 = vmatmul.mubr.bf16.gmra.mrb[36].mxu1 %v1734_v54  ;;  %v13202_v54 = vld [vmem:[#allocation3 + $0x138] sm:$0xff]  }
 0x233   :  { %11445 = vmatprep.mubr.msk.bf16.mxu1 %vm13779_vm3, %v13778_v0 }
 0x235   :  { %11662 = vmatmul.mubr.bf16.gmra.mrb[64].mxu0 %v2624_v59 }
 0x236   :  { %11665 = vmatprep.mubr.msk.bf16.mxu0 %vm13779_vm3, %v13778_v0 }
 0x23a   :  { %11446 = vmatmul.mubr.bf16.gmra.mrb[40].mxu1 %v1737_v40 }
 0x23b   :  { %11465 = vmatprep.mubr.msk.bf16.mxu1 %vm13779_vm3, %v13778_v0 }
 0x23d   :  { %11666 = vmatmul.mubr.bf16.gmra.mrb[68].mxu0 %v2623_v53  ;;  %v13201_v53 = vld [vmem:[#allocation3 + $0x130] sm:$0xff]  }
 0x23e   :  { %11729 = vmatprep.mubr.msk.bf16.mxu0 %vm13779_vm3, %v13778_v0 }
 0x242   :  { %11466 = vmatmul.mubr.bf16.vlgmr.msra.gmra.mrb[44].mxu1 %v14602_v26  ;;  %v13182_v26 = vld [vmem:[#allocation3 + $0x98] sm:$0xff]  }
 0x243   :  { %11494 = vmatpush3.bf16.msra.mxu1 %v13179_v10  ;;  %11469 = vmatprep.mubr.msk.bf16.mxu1 %vm13779_vm3, %v13778_v0  ;;  %v2386_v10 = vshll.u32 %v14604_v13, 16 }
 0x244   :  { %11495 = vmatprep.subr.bf16.mxu1 %v13778_v0 }
 0x245   :  { %11730 = vmatmul.mubr.bf16.vlgmr.msra.gmra.mrb[72].mxu0 %v14664_v51  ;;  %v13183_v51 = vld [vmem:[#allocation3 + $0xa0] sm:$0xff]  }
 0x246   :  { %11733 = vmatprep.mubr.msk.bf16.mxu0 %vm13779_vm3, %v13778_v0 }
 0x247   :  { %11496 = vmatpush3.bf16.msra.mxu1 %v13180_v17 }
 0x248   :  { %11497 = vmatprep.subr.bf16.mxu1 %v13778_v0 }
 0x24a   :  { %11470 = vmatmul.mubr.bf16.gmra.mrb[48].mxu1 %v14599_v43 }
 0x24b   :  { %11473 = vmatprep.mubr.msk.bf16.mxu1 %vm13779_vm3, %v13778_v0  ;;  %11498 = vmatpush3.bf16.msra.mxu1 %v13181_v18 }
 0x24c   :  { %11499 = vmatprep.subr.bf16.mxu1 %v13778_v0 }
 0x24d   :  { %11734 = vmatmul.mubr.bf16.gmra.mrb[76].mxu0 %v14690_v4  ;;  %v14789_v4 = vpack.c.bf16 %v1642_v23, %v1642_v23  ;;  %v2384_v23 = vshrl.u32 %v14604_v13, 16 }
 0x24e   :  { %11737 = vmatprep.mubr.msk.bf16.mxu0 %vm13779_vm3, %v13778_v0 }
 0x24f   :  { %11500 = vmatpush3.bf16.msra.mxu1 %v13182_v26  ;;  %v2963_v52 = vshll.u32 %v14789_v4, 16  ;;  %v2967_v9 = vshrl.u32 %v14789_v4, 16 }
 0x250   :  { %11501 = vmatprep.subr.bf16.mxu1 %v13778_v0 }
 0x251   :  { %v2965_v15 = vrot.slane %v2963_v52, 1 }
 0x252   :  { %11474 = vmatmul.mubr.bf16.gmra.mrb[52].mxu1 %v14628_v38 }
 0x253   :  { %11477 = vmatprep.mubr.msk.bf16.mxu1 %vm13779_vm3, %v13778_v0  ;;  %11502 = vmatpush3.bf16.msra.mxu1 %v13183_v51  ;;  %v2966_v3 = vsel %vm430_vm2, %v2961_v41, %v2965_v15  ;;  %v2969_v55 = vor.u32 %v2967_v9, %v2965_v15  ;;  %v2391_v51 = vshll.u32 %v14618_v2, 16  ;;  %v13203_v41 = vld [vmem:[#allocation3 + $0x180] sm:$0xff]  }
 0x254   :  { %11503 = vmatprep.subr.bf16.mxu1 %v13778_v0 }
 0x255   :  { %11738 = vmatmul.mubr.bf16.gmra.mrb[80].mxu0 %v14706_v19  ;;  %v13189_v19 = vld [vmem:[#allocation3 + $0xd0] sm:$0xff]   ;;  %v2393_v42 = vrot.slane %v2391_v51, 1 }
 0x256   :  { %11741 = vmatprep.mubr.msk.bf16.mxu0 %vm13779_vm3, %v13778_v0 }
 0x257   :  { %11504 = vmatpush3.bf16.msra.mxu1 %v13184_v12 }
 0x258   :  { %11505 = vmatprep.subr.bf16.mxu1 %v13778_v0 }
 0x25a   :  { %11478 = vmatmul.mubr.bf16.gmra.mrb[56].mxu1 %v14620_v57 }
 0x25b   :  { %11481 = vmatprep.mubr.msk.bf16.mxu1 %vm13779_vm3, %v13778_v0  ;;  %11506 = vmatpush3.bf16.msra.mxu1 %v13185_v33 }
 0x25c   :  { %11507 = vmatprep.subr.bf16.mxu1 %v13778_v0 }
 0x25d   :  { %11742 = vmatmul.mubr.bf16.gmra.mrb[84].mxu0 %v1726_v31  ;;  %v2047_v31 = vrot.slane %v14716_v36, 1 }
 0x25e   :  { %11745 = vmatprep.mubr.msk.bf16.mxu0 %vm13779_vm3, %v13778_v0 }
 0x25f   :  { %11508 = vmatpush3.bf16.msra.mxu1 %v13186_v22  ;;  %v2048_v35 = vsel %vm2035_vm4, %v14719_v11, %v2047_v31  ;;  %v13198_v11 = vld [vmem:[#allocation3 + $0x118] sm:$0xff]   ;;  %v2388_v22 = vrot.slane %v2386_v10, 1 }
 0x260   :  { %11537 = vmatprep.subr.bf16.mxu1 %v13778_v0 }
 0x261   :  { %v2389_v52 = vor.u32 %v2388_v22, %v2384_v23  ;;  %v2415_v23 = vshll.u32 %v14660_v60, 16 }
 0x262   :  { %11482 = vmatmul.mubr.bf16.gmra.mrb[60].mxu1 %v14658_v47 }
 0x263   :  { %11485 = vmatprep.mubr.msk.bf16.mxu1 %vm13779_vm3, %v13778_v0 }
 0x265   :  { %11746 = vmatmul.mubr.bf16.gmra.mrb[88].mxu0 %v2958_v49 }
 0x266   :  { %11749 = vmatprep.mubr.msk.bf16.mxu0 %vm13779_vm3, %v13778_v0 }
 0x26a   :  { %11486 = vmatmul.mubr.bf16.gmra.mrb[64].mxu1 %v14653_v24 }
 0x26b   :  { %11489 = vmatprep.mubr.msk.bf16.mxu1 %vm13779_vm3, %v13778_v0 }
 0x26d   :  { %11750 = vmatmul.mubr.bf16.gmra.mrb[92].mxu0 %v2966_v3 }
 0x26e   :  { %11753 = vmatprep.mubr.msk.bf16.mxu0 %vm13779_vm3, %v13778_v0 }
 0x272   :  { %11490 = vmatmul.mubr.bf16.gmra.mrb[68].mxu1 %v14716_v36  ;;  %v13197_v36 = vld [vmem:[#allocation3 + $0x110] sm:$0xff]  }
 0x273   :  { %11509 = vmatprep.mubr.msk.bf16.mxu1 %vm13779_vm3, %v13778_v0 }
 0x275   :  { %11754 = vmatmul.mubr.bf16.gmra.mrb[96].mxu0 %v2969_v55  ;;  %v2394_v55 = vsel %vm430_vm2, %v2389_v52, %v2393_v42  ;;  %v13208_v52 = vld [vmem:[#allocation3 + $0x1a8] sm:$0xff]  }
 0x276   :  { %11817 = vmatprep.mubr.msk.bf16.mxu0 %vm13779_vm3, %v13778_v0 }
 0x27a   :  { %11510 = vmatmul.mubr.bf16.vlgmr.msra.gmra.mrb[72].mxu1 %v14626_v62  ;;  %v13190_v62 = vld [vmem:[#allocation3 + $0xd8] sm:$0xff]  }
 0x27b   :  { %11538 = vmatpush3.bf16.msra.mxu1 %v13187_v1  ;;  %11513 = vmatprep.mubr.msk.bf16.mxu1 %vm13779_vm3, %v13778_v0  ;;  %v2399_v1 = vshll.u32 %v14630_v32, 16 }
 0x27c   :  { %11539 = vmatprep.subr.bf16.mxu1 %v13778_v0 }
 0x27f   :  { %11540 = vmatpush3.bf16.msra.mxu1 %v13188_v29 }
 0x280   :  { %11541 = vmatprep.subr.bf16.mxu1 %v13778_v0 }
 0x282   :  { %11514 = vmatmul.mubr.bf16.gmra.mrb[76].mxu1 %v14820_v25 }
 0x283   :  { %11517 = vmatprep.mubr.msk.bf16.mxu1 %vm13779_vm3, %v13778_v0  ;;  %11542 = vmatpush3.bf16.msra.mxu1 %v13189_v19  ;;  %v13204_v19 = vld [vmem:[#allocation3 + $0x188] sm:$0xff]  }
 0x284   :  { %11543 = vmatprep.subr.bf16.mxu1 %v13778_v0 }
 0x287   :  { %11544 = vmatpush3.bf16.msra.mxu1 %v13190_v62 }
 0x288   :  { %11545 = vmatprep.subr.bf16.mxu1 %v13778_v0 }
 0x28a   :  { %11518 = vmatmul.mubr.bf16.gmra.mrb[80].mxu1 %v14829_v46 }
 0x28b   :  { %11521 = vmatprep.mubr.msk.bf16.mxu1 %vm13779_vm3, %v13778_v0  ;;  %11546 = vmatpush3.bf16.msra.mxu1 %v13191_v45  ;;  %v2401_v45 = vrot.slane %v2399_v1, 1 }
 0x28c   :  { %11547 = vmatprep.subr.bf16.mxu1 %v13778_v0 }
 0x28f   :  { %11548 = vmatpush3.bf16.msra.mxu1 %v13192_v16 }
 0x290   :  { %11549 = vmatprep.subr.bf16.mxu1 %v13778_v0 }
 0x292   :  { %11522 = vmatmul.mubr.bf16.gmra.mrb[84].mxu1 %v14838_v7 }
 0x293   :  { %11525 = vmatprep.mubr.msk.bf16.mxu1 %vm13779_vm3, %v13778_v0  ;;  %11550 = vmatpush3.bf16.msra.mxu1 %v13193_v6  ;;  %v13205_v6 = vld [vmem:[#allocation3 + $0x190] sm:$0xff]  }
 0x294   :  { %11551 = vmatprep.subr.bf16.mxu1 %v13778_v0 }
 0x297   :  { %11552 = vmatpush3.bf16.msra.mxu1 %v13194_v8 }
 0x298   :  { %11581 = vmatprep.subr.bf16.mxu1 %v13778_v0 }
 0x29a   :  { %11526 = vmatmul.mubr.bf16.gmra.mrb[88].mxu1 %v14847_v28 }
 0x29b   :  { %11529 = vmatprep.mubr.msk.bf16.mxu1 %vm13779_vm3, %v13778_v0 }
 0x2a2   :  { %11530 = vmatmul.mubr.bf16.gmra.mrb[92].mxu1 %v2048_v35 }
 0x2a3   :  { %11533 = vmatprep.mubr.msk.bf16.mxu1 %vm13779_vm3, %v13778_v0 }
 0x2aa   :  { %11534 = vmatmul.mubr.bf16.gmra.mrb[96].mxu1 %v2047_v31 }
 0x2ab   :  { %11553 = vmatprep.mubr.msk.bf16.mxu1 %vm13779_vm3, %v13778_v0 }
 0x2b2   :  { %11554 = vmatmul.mubr.bf16.vlgmr.msra.gmra.mrb[100].mxu1 %v14604_v13  ;;  %v2395_v13 = vshrl.u32 %v14618_v2, 16 }
 0x2b3   :  { %11582 = vmatpush3.bf16.msra.mxu1 %v13195_v30  ;;  %11557 = vmatprep.mubr.msk.bf16.mxu1 %vm13779_vm3, %v13778_v0 }
 0x2b4   :  { %11583 = vmatprep.subr.bf16.mxu1 %v13778_v0  ;;  %v2397_v27 = vor.u32 %v2395_v13, %v2393_v42 }
 0x2b6   :  { %v2402_v30 = vsel %vm430_vm2, %v2397_v27, %v2401_v45 }
 0x2b7   :  { %11584 = vmatpush3.bf16.msra.mxu1 %v13196_v63 }
 0x2b8   :  { %11585 = vmatprep.subr.bf16.mxu1 %v13778_v0 }
 0x2ba   :  { %11558 = vmatmul.mubr.bf16.gmra.mrb[104].mxu1 %v14618_v2  ;;  %v2407_v2 = vshll.u32 %v14650_v58, 16 }
 0x2bb   :  { %11561 = vmatprep.mubr.msk.bf16.mxu1 %vm13779_vm3, %v13778_v0  ;;  %11586 = vmatpush3.bf16.msra.mxu1 %v13197_v36 }
 0x2bc   :  { %11587 = vmatprep.subr.bf16.mxu1 %v13778_v0 }
 0x2bf   :  { %11588 = vmatpush3.bf16.msra.mxu1 %v13198_v11  ;;  %v13206_v11 = vld [vmem:[#allocation3 + $0x198] sm:$0xff]  }
 0x2c0   :  { %11589 = vmatprep.subr.bf16.mxu1 %v13778_v0 }
 0x2c2   :  { %11562 = vmatmul.mubr.bf16.gmra.mrb[108].mxu1 %v14630_v32 }
 0x2c3   :  { %11565 = vmatprep.mubr.msk.bf16.mxu1 %vm13779_vm3, %v13778_v0  ;;  %11590 = vmatpush3.bf16.msra.mxu1 %v13199_v56 }
 0x2c4   :  { %11591 = vmatprep.subr.bf16.mxu1 %v13778_v0 }
 0x2c7   :  { %11592 = vmatpush3.bf16.msra.mxu1 %v13200_v39  ;;  %v2403_v39 = vshrl.u32 %v14630_v32, 16  ;;  %v2411_v32 = vshrl.u32 %v14650_v58, 16 }
 0x2c8   :  { %11593 = vmatprep.subr.bf16.mxu1 %v13778_v0 }
 0x2c9   :  { %v2405_v10 = vor.u32 %v2403_v39, %v2401_v45  ;;  %v2423_v45 = vshll.u32 %v14682_v20, 16 }
 0x2ca   :  { %11566 = vmatmul.mubr.bf16.gmra.mrb[112].mxu1 %v14650_v58 }
 0x2cb   :  { %11569 = vmatprep.mubr.msk.bf16.mxu1 %vm13779_vm3, %v13778_v0  ;;  %11594 = vmatpush3.bf16.msra.mxu1 %v13201_v53  ;;  %v2409_v53 = vrot.slane %v2407_v2, 1 }
 0x2cc   :  { %11595 = vmatprep.subr.bf16.mxu1 %v13778_v0 }
 0x2cd   :  { %v2410_v22 = vsel %vm430_vm2, %v2405_v10, %v2409_v53  ;;  %v2427_v10 = vshrl.u32 %v14682_v20, 16 }
 0x2cf   :  { %11596 = vmatpush3.bf16.msra.mxu1 %v13202_v54 }
 0x2d0   :  { %11669 = vmatprep.subr.bf16.mxu1 %v13778_v0 }
 0x2d2   :  { %11570 = vmatmul.mubr.bf16.gmra.mrb[116].mxu1 %v14660_v60 }
 0x2d3   :  { %11573 = vmatprep.mubr.msk.bf16.mxu1 %vm13779_vm3, %v13778_v0 }
 0x2da   :  { %11574 = vmatmul.mubr.bf16.gmra.mrb[120].mxu1 %v14682_v20 }
 0x2db   :  { %11577 = vmatprep.mubr.msk.bf16.mxu1 %vm13779_vm3, %v13778_v0 }
 0x2dd   :  { %v14885_v59 = vpop.f32.mrb[16].mxu1 }
 0x2de   :  { %v11423_v37 = vpop.f32.mrb[17].mxu1 }
 0x2df   :  { %v14887_v40 = vpop.f32.mrb[18].mxu1 }
 0x2e0   :  { %v14890_v17 = vpop.f32.mrb[44].mxu0  ;;  %v11424_v18 = vpop.f32.mrb[19].mxu1 }
 0x2e1   :  { %v11643_v26 = vpop.f32.mrb[45].mxu0  ;;  %v13207_v18 = vld [vmem:[#allocation3 + $0x1a0] sm:$0xff]  }
 0x2e2   :  { %v14893_v12 = vpop.f32.mrb[46].mxu0  ;;  %11578 = vmatmul.mubr.bf16.gmra.mrb[124].mxu1 %v14738_v44 }
 0x2e3   :  { %v11644_v33 = vpop.f32.mrb[47].mxu0  ;;  %11597 = vmatprep.mubr.msk.bf16.mxu1 %vm13779_vm3, %v13778_v0 }
 0x2e5   :  { %v14898_v48 = vpop.f32.mrb[20].mxu1 }
 0x2e6   :  { %v11427_v49 = vpop.f32.mrb[21].mxu1 }
 0x2e7   :  { %v14901_v34 = vpop.f32.mrb[22].mxu1 }
 0x2e8   :  { %v14903_v15 = vpop.f32.mrb[48].mxu0  ;;  %v11428_v3 = vpop.f32.mrb[23].mxu1 }
 0x2e9   :  { %v11647_v9 = vpop.f32.mrb[49].mxu0  ;;  %v2413_v3 = vor.u32 %v2411_v32, %v2409_v53 }
 0x2ea   :  { %v14907_v29 = vpop.f32.mrb[50].mxu0  ;;  %11598 = vmatmul.mubr.bf16.vlgmr.msra.gmra.mrb[128].mxu1 %v2394_v55  ;;  %v2417_v9 = vrot.slane %v2415_v23, 1 }
 0x2eb   :  { %v11648_v21 = vpop.f32.mrb[51].mxu0  ;;  %11670 = vmatpush3.bf16.msra.mxu1 %v13203_v41  ;;  %11601 = vmatprep.mubr.msk.bf16.mxu1 %vm13779_vm3, %v13778_v0 }
 0x2ec   :  { %11671 = vmatprep.subr.bf16.mxu1 %v13778_v0  ;;  %v13209_v21 = vld [vmem:[#allocation3 + $0x1b0] sm:$0xff]   ;;  %v2418_v58 = vsel %vm430_vm2, %v2413_v3, %v2417_v9 }
 0x2ed   :  { %v14913_v62 = vpop.f32.mrb[24].mxu1 }
 0x2ee   :  { %v11431_v16 = vpop.f32.mrb[25].mxu1 }
 0x2ef   :  { %v1846_v5 = vpop.f32.mrb[26].mxu1  ;;  %11672 = vmatpush3.bf16.msra.mxu1 %v13204_v19 }
 0x2f0   :  { %v14915_v8 = vpop.f32.mrb[52].mxu0  ;;  %v11432_v31 = vpop.f32.mrb[27].mxu1  ;;  %11673 = vmatprep.subr.bf16.mxu1 %v13778_v0 }
 0x2f1   :  { %v11651_v35 = vpop.f32.mrb[53].mxu0 }
 0x2f2   :  { %v2733_v63 = vpop.f32.mrb[54].mxu0  ;;  %11602 = vmatmul.mubr.bf16.gmra.mrb[132].mxu1 %v2402_v30  ;;  %v2419_v35 = vshrl.u32 %v14660_v60, 16  ;;  %v2425_v30 = vrot.slane %v2423_v45, 1 }
 0x2f3   :  { %v11652_v36 = vpop.f32.mrb[55].mxu0  ;;  %11605 = vmatprep.mubr.msk.bf16.mxu1 %vm13779_vm3, %v13778_v0  ;;  %11674 = vmatpush3.bf16.msra.mxu1 %v13205_v6  ;;  %v13210_v6 = vld [vmem:[#allocation3 + $0x1b8] sm:$0xff]  }
 0x2f4   :  { %11675 = vmatprep.subr.bf16.mxu1 %v13778_v0  ;;  %v2421_v36 = vor.u32 %v2419_v35, %v2417_v9 }
 0x2f5   :  { %v1850_v56 = vpop.f32.mrb[28].mxu1 }
 0x2f6   :  { %v11435_v54 = vpop.f32.mrb[29].mxu1  ;;  %v2426_v53 = vsel %vm430_vm2, %v2421_v36, %v2425_v30 }
 0x2f7   :  { %v1852_v37 = vpop.f32.mrb[30].mxu1  ;;  %11676 = vmatpush3.bf16.msra.mxu1 %v13206_v11  ;;  %v2431_v54 = vshll.u32 %v14738_v44, 16 }
 0x2f8   :  { %v2737_v26 = vpop.f32.mrb[56].mxu0  ;;  %v11436_v51 = vpop.f32.mrb[31].mxu1  ;;  %11677 = vmatprep.subr.bf16.mxu1 %v13778_v0 }
 0x2f9   :  { %v11655_v33 = vpop.f32.mrb[57].mxu0  ;;  %v2429_v26 = vor.u32 %v2427_v10, %v2425_v30  ;;  %v2433_v51 = vrot.slane %v2431_v54, 1 }
 0x2fa   :  { %v2739_v42 = vpop.f32.mrb[58].mxu0  ;;  %11606 = vmatmul.mubr.bf16.gmra.mrb[136].mxu1 %v2410_v22 }
 0x2fb   :  { %v11656_v49 = vpop.f32.mrb[59].mxu0  ;;  %11609 = vmatprep.mubr.msk.bf16.mxu1 %vm13779_vm3, %v13778_v0  ;;  %11678 = vmatpush3.bf16.msra.mxu1 %v13207_v18  ;;  %v2434_v32 = vsel %vm430_vm2, %v2429_v26, %v2433_v51 }
 0x2fc   :  { %11679 = vmatprep.subr.bf16.mxu1 %v13778_v0 }
 0x2fd   :  { %v14931_v41 = vpop.f32.mrb[32].mxu1 }
 0x2fe   :  { %v11439_v55 = vpop.f32.mrb[33].mxu1 }
 0x2ff   :  { %v14933_v1 = vpop.f32.mrb[34].mxu1  ;;  %11680 = vmatpush3.bf16.msra.mxu1 %v13208_v52 }
 0x300   :  { %v14935_v13 = vpop.f32.mrb[60].mxu0  ;;  %v11440_v19 = vpop.f32.mrb[35].mxu1  ;;  %11681 = vmatprep.subr.bf16.mxu1 %v13778_v0 }
 0x301   :  { %v11659_v27 = vpop.f32.mrb[61].mxu0 }
 0x302   :  { %v14940_v16 = vpop.f32.mrb[62].mxu0  ;;  %11610 = vmatmul.mubr.bf16.gmra.mrb[140].mxu1 %v2418_v58 }
 0x303   :  { %v11660_v5 = vpop.f32.mrb[63].mxu0  ;;  %11613 = vmatprep.mubr.msk.bf16.mxu1 %vm13779_vm3, %v13778_v0  ;;  %11682 = vmatpush3.bf16.msra.mxu1 %v13209_v21  ;;  %v2435_v21 = vshrl.u32 %v14738_v44, 16 }
 0x304   :  { %11683 = vmatprep.subr.bf16.mxu1 %v13778_v0 }
 0x305   :  { %v14945_v31 = vpop.f32.mrb[36].mxu1  ;;  %v2437_v5 = vor.u32 %v2435_v21, %v2433_v51  ;;  %v13215_v21 = vld [vmem:[#allocation3 + $0x220] sm:$0xff]  }
 0x306   :  { %v11443_v2 = vpop.f32.mrb[37].mxu1 }
 0x307   :  { %v14948_v63 = vpop.f32.mrb[38].mxu1  ;;  %11684 = vmatpush3.bf16.msra.mxu1 %v13210_v6 }
 0x308   :  { %v14950_v11 = vpop.f32.mrb[64].mxu0  ;;  %v11444_v56 = vpop.f32.mrb[39].mxu1  ;;  %11757 = vmatprep.subr.bf16.mxu1 %v13778_v0 }
 0x309   :  { %v11663_v39 = vpop.f32.mrb[65].mxu0 }
 0x30a   :  { %v14955_v37 = vpop.f32.mrb[66].mxu0  ;;  %11614 = vmatmul.mubr.bf16.gmra.mrb[144].mxu1 %v2426_v53 }
 0x30b   :  { %v11664_v60 = vpop.f32.mrb[67].mxu0  ;;  %11617 = vmatprep.mubr.msk.bf16.mxu1 %vm13779_vm3, %v13778_v0 }
 0x30d   :  { %v14960_v18 = vpop.f32.mrb[40].mxu1 }
 0x30e   :  { %v11447_v33 = vpop.f32.mrb[41].mxu1 }
 0x30f   :  { %v1875_v22 = vpop.f32.mrb[42].mxu1 }
 0x310   :  { %v14962_v23 = vpop.f32.mrb[68].mxu0  ;;  %v11448_v42 = vpop.f32.mrb[43].mxu1  ;;  %v13213_v22 = vld [vmem:[#allocation3 + $0x210] sm:$0xff]  }
 0x311   :  { %v11667_v49 = vpop.f32.mrb[69].mxu0 }
 0x312   :  { %v2762_v52 = vpop.f32.mrb[70].mxu0  ;;  %11618 = vmatmul.mubr.bf16.gmra.mrb[148].mxu1 %v2434_v32 }
 0x313   :  { %v11668_v3 = vpop.f32.mrb[71].mxu0  ;;  %11621 = vmatprep.mubr.msk.bf16.mxu1 %vm13779_vm3, %v13778_v0 }
 0x315   :  { %v1960_v9 = vpop.f32.mrb[44].mxu1 }
 0x316   :  { %v14968_v20 = vadd.f32 %v1960_v9, %v14885_v59  ;;  %v11467_v55 = vpop.f32.mrb[45].mxu1 }
 0x317   :  { %v1963_v19 = vpop.f32.mrb[46].mxu1 }
 0x318   :  { %v14972_v27 = vadd.f32 %v1963_v19, %v14887_v40  ;;  %v14974_v58 = vpop.f32.mrb[72].mxu0  ;;  %v11468_v45 = vpop.f32.mrb[47].mxu1  ;;  %v13211_v40 = vld [vmem:[#allocation3 + $0x200] sm:$0xff]  }
 0x319   :  { %v11731_v6 = vpop.f32.mrb[73].mxu0 }
 0x31a   :  { %v14976_v35 = vpop.f32.mrb[74].mxu0  ;;  %11622 = vmatmul.mubr.bf16.gmra.mrb[152].mxu1 %v2437_v5 }
 0x31b   :  { %v11732_v30 = vpop.f32.mrb[75].mxu0  ;;  %11685 = vmatprep.mubr.msk.bf16.mxu1 %vm13779_vm3, %v13778_v0 }
 0x31c   :  { %v13216_v30 = vld [vmem:[#allocation3 + $0x228] sm:$0xff]  }
 0x31d   :  { %v1968_v59 = vpop.f32.mrb[48].mxu1 }
 0x31e   :  { %v14981_v2 = vadd.f32 %v1968_v59, %v14898_v48  ;;  %v11471_v44 = vpop.f32.mrb[49].mxu1  ;;  %v13212_v48 = vld [vmem:[#allocation3 + $0x208] sm:$0xff]  }
 0x31f   :  { %v1971_v36 = vpop.f32.mrb[50].mxu1 }
 0x320   :  { %v14984_v56 = vadd.f32 %v1971_v36, %v14901_v34  ;;  %v14986_v39 = vpop.f32.mrb[76].mxu0  ;;  %v11472_v53 = vpop.f32.mrb[51].mxu1 }
 0x321   :  { %v11735_v54 = vpop.f32.mrb[77].mxu0  ;;  %v13217_v53 = vld [vmem:[#allocation3 + $0x230] sm:$0xff]  }
 0x322   :  { %v14988_v60 = vpop.f32.mrb[78].mxu0  ;;  %11686 = vmatmul.mubr.bf16.vlgmr.msra.gmra.mrb[156].mxu1 %v14599_v43 }
 0x323   :  { %v11736_v10 = vpop.f32.mrb[79].mxu0  ;;  %11758 = vmatpush3.bf16.msra.mxu1 %v13211_v40  ;;  %11689 = vmatprep.mubr.msk.bf16.mxu1 %vm13779_vm3, %v13778_v0 }
 0x324   :  { %11759 = vmatprep.subr.bf16.mxu1 %v13778_v0 }
 0x325   :  { %v1976_v26 = vpop.f32.mrb[52].mxu1 }
 0x326   :  { %v14995_v34 = vadd.f32 %v1976_v26, %v14913_v62  ;;  %v11475_v51 = vpop.f32.mrb[53].mxu1  ;;  %v13214_v62 = vld [vmem:[#allocation3 + $0x218] sm:$0xff]  }
 0x327   :  { %v1979_v33 = vpop.f32.mrb[54].mxu1  ;;  %11760 = vmatpush3.bf16.msra.mxu1 %v13212_v48 }
 0x328   :  { %v14997_v42 = vpop.f32.mrb[80].mxu0  ;;  %v11476_v49 = vpop.f32.mrb[55].mxu1  ;;  %11761 = vmatprep.subr.bf16.mxu1 %v13778_v0 }
 0x329   :  { %v11739_v43 = vpop.f32.mrb[81].mxu0 }
 0x32a   :  { %v3074_v32 = vpop.f32.mrb[82].mxu0  ;;  %11690 = vmatmul.mubr.bf16.gmra.mrb[160].mxu1 %v14628_v38 }
 0x32b   :  { %v11740_v52 = vpop.f32.mrb[83].mxu0  ;;  %11693 = vmatprep.mubr.msk.bf16.mxu1 %vm13779_vm3, %v13778_v0  ;;  %11762 = vmatpush3.bf16.msra.mxu1 %v13213_v22 }
 0x32c   :  { %11763 = vmatprep.subr.bf16.mxu1 %v13778_v0 }
 0x32d   :  { %v1983_v3 = vpop.f32.mrb[56].mxu1 }
 0x32e   :  { %v11479_v9 = vpop.f32.mrb[57].mxu1 }
 0x32f   :  { %v1985_v55 = vpop.f32.mrb[58].mxu1  ;;  %11764 = vmatpush3.bf16.msra.mxu1 %v13214_v62 }
 0x330   :  { %v3078_v19 = vpop.f32.mrb[84].mxu0  ;;  %v11480_v45 = vpop.f32.mrb[59].mxu1  ;;  %11765 = vmatprep.subr.bf16.mxu1 %v13778_v0 }
 0x331   :  { %v11743_v5 = vpop.f32.mrb[85].mxu0 }
 0x332   :  { %v3080_v6 = vpop.f32.mrb[86].mxu0  ;;  %11694 = vmatmul.mubr.bf16.gmra.mrb[164].mxu1 %v14620_v57 }
 0x333   :  { %v11744_v38 = vpop.f32.mrb[87].mxu0  ;;  %11697 = vmatprep.mubr.msk.bf16.mxu1 %vm13779_vm3, %v13778_v0  ;;  %11766 = vmatpush3.bf16.msra.mxu1 %v13215_v21 }
 0x334   :  { %11767 = vmatprep.subr.bf16.mxu1 %v13778_v0 }
 0x335   :  { %v1989_v59 = vpop.f32.mrb[60].mxu1 }
 0x336   :  { %v15010_v44 = vadd.f32 %v1989_v59, %v14931_v41  ;;  %v11483_v36 = vpop.f32.mrb[61].mxu1  ;;  %v13218_v41 = vld [vmem:[#allocation3 + $0x238] sm:$0xff]  }
 0x337   :  { %v1992_v40 = vpop.f32.mrb[62].mxu1  ;;  %11768 = vmatpush3.bf16.msra.mxu1 %v13216_v30 }
 0x338   :  { %v15013_v54 = vadd.f32 %v1992_v40, %v14933_v1  ;;  %v15015_v57 = vpop.f32.mrb[88].mxu0  ;;  %v11484_v10 = vpop.f32.mrb[63].mxu1  ;;  %11769 = vmatprep.subr.bf16.mxu1 %v13778_v0 }
 0x339   :  { %v11747_v48 = vpop.f32.mrb[89].mxu0 }
 0x33a   :  { %v15018_v26 = vpop.f32.mrb[90].mxu0  ;;  %11698 = vmatmul.mubr.bf16.gmra.mrb[168].mxu1 %v14658_v47 }
 0x33b   :  { %v11748_v51 = vpop.f32.mrb[91].mxu0  ;;  %11701 = vmatprep.mubr.msk.bf16.mxu1 %vm13779_vm3, %v13778_v0  ;;  %11770 = vmatpush3.bf16.msra.mxu1 %v13217_v53 }
 0x33c   :  { %11771 = vmatprep.subr.bf16.mxu1 %v13778_v0 }
 0x33d   :  { %v1997_v1 = vpop.f32.mrb[64].mxu1 }
 0x33e   :  { %v1998_v33 = vadd.f32 %v1997_v1, %v14945_v31  ;;  %v11487_v22 = vpop.f32.mrb[65].mxu1 }
 0x33f   :  { %v2000_v49 = vpop.f32.mrb[66].mxu1  ;;  %11772 = vmatpush3.bf16.msra.mxu1 %v13218_v41 }
 0x340   :  { %v2001_v43 = vadd.f32 %v2000_v49, %v14948_v63  ;;  %v15026_v32 = vpop.f32.mrb[92].mxu0  ;;  %v11488_v52 = vpop.f32.mrb[67].mxu1  ;;  %12301 = vmatprep.subr.bf16.mxu1 %v13778_v0 }
 0x341   :  { %v11751_v47 = vpop.f32.mrb[93].mxu0 }
 0x342   :  { %v15029_v62 = vpop.f32.mrb[94].mxu0  ;;  %11702 = vmatmul.mubr.bf16.gmra.mrb[172].mxu1 %v14653_v24 }
 0x343   :  { %v11752_v3 = vpop.f32.mrb[95].mxu0  ;;  %11705 = vmatprep.mubr.msk.bf16.mxu1 %vm13779_vm3, %v13778_v0 }
 0x345   :  { %v2005_v31 = vpop.f32.mrb[68].mxu1 }
 0x346   :  { %v2006_v9 = vadd.f32 %v2005_v31, %v14960_v18  ;;  %v11491_v55 = vpop.f32.mrb[69].mxu1 }
 0x347   :  { %v2008_v21 = vpop.f32.mrb[70].mxu1 }
 0x348   :  { %v15035_v63 = vpop.f32.mrb[96].mxu0  ;;  %v11492_v19 = vpop.f32.mrb[71].mxu1 }
 0x349   :  { %v11755_v45 = vpop.f32.mrb[97].mxu0 }
 0x34a   :  { %v3103_v5 = vpop.f32.mrb[98].mxu0  ;;  %11706 = vmatmul.mubr.bf16.gmra.mrb[176].mxu1 %v14687_v61 }
 0x34b   :  { %v11756_v6 = vpop.f32.mrb[99].mxu0  ;;  %11709 = vmatprep.mubr.msk.bf16.mxu1 %vm13779_vm3, %v13778_v0 }
 0x34d   :  { %v2138_v24 = vpop.f32.mrb[72].mxu1 }
 0x34e   :  { %v2189_v38 = vadd.f32 %v2138_v24, %v14968_v20  ;;  %v11511_v30 = vpop.f32.mrb[73].mxu1 }
 0x34f   :  { %v2141_v59 = vpop.f32.mrb[74].mxu1  ;;  %v3137_v30 = vrot.slane %v14789_v4, 1 }
 0x350   :  { %v2190_v18 = vadd.f32 %v2141_v59, %v14972_v27  ;;  %v11512_v36 = vpop.f32.mrb[75].mxu1 }
 0x352   :  { %11710 = vmatmul.mubr.bf16.gmra.mrb[180].mxu1 %v14789_v4 }
 0x353   :  { %11773 = vmatprep.mubr.msk.bf16.mxu1 %vm13779_vm3, %v13778_v0 }
 0x355   :  { %v2146_v40 = vpop.f32.mrb[76].mxu1 }
 0x356   :  { %v2191_v53 = vadd.f32 %v2146_v40, %v14981_v2  ;;  %v11515_v10 = vpop.f32.mrb[77].mxu1 }
 0x357   :  { %v2149_v48 = vpop.f32.mrb[78].mxu1 }
 0x358   :  { %v2192_v51 = vadd.f32 %v2149_v48, %v14984_v56  ;;  %v11516_v41 = vpop.f32.mrb[79].mxu1 }
 0x35a   :  { %11774 = vmatmul.mubr.bf16.vlgmr.msra.gmra.mrb[184].mxu1 %v14820_v25 }
 0x35b   :  { %11777 = vmatprep.mubr.msk.bf16.mxu1 %vm13779_vm3, %v13778_v0 }
 0x35d   :  { %v2154_v20 = vpop.f32.mrb[80].mxu1 }
 0x35e   :  { %v2193_v27 = vadd.f32 %v2154_v20, %v14995_v34  ;;  %v11519_v1 = vpop.f32.mrb[81].mxu1 }
 0x35f   :  { %v2157_v22 = vpop.f32.mrb[82].mxu1 }
 0x360   :  { %v11520_v49 = vpop.f32.mrb[83].mxu1 }
 0x362   :  { %11778 = vmatmul.mubr.bf16.gmra.mrb[188].mxu1 %v14829_v46 }
 0x363   :  { %11781 = vmatprep.mubr.msk.bf16.mxu1 %vm13779_vm3, %v13778_v0 }
 0x365   :  { %v2161_v2 = vpop.f32.mrb[84].mxu1 }
 0x366   :  { %v11523_v52 = vpop.f32.mrb[85].mxu1  ;;  %v13219_v2 = vld [vmem:[%s17094_s5 + $0x40] sm:$0xff]  }
 0x367   :  { %v2163_v56 = vpop.f32.mrb[86].mxu1  ;;  %11802 = vmatpush3.bf16.msra.mxu0 %v13219_v2 }
 0x368   :  { %v11524_v47 = vpop.f32.mrb[87].mxu1  ;;  %11803 = vmatprep.subr.bf16.mxu0 %v13778_v0 }
 0x369   :  { %v13221_v47 = vld [vmem:[%s17094_s5 + $0x50] sm:$0xff]  }
 0x36a   :  { %11782 = vmatmul.mubr.bf16.gmra.mrb[192].mxu1 %v14838_v7 }
 0x36b   :  { %11785 = vmatprep.mubr.msk.bf16.mxu1 %vm13779_vm3, %v13778_v0 }
 0x36d   :  { %v2167_v25 = vpop.f32.mrb[88].mxu1 }
 0x36e   :  { %v2194_v34 = vadd.f32 %v2167_v25, %v15010_v44  ;;  %v11527_v3 = vpop.f32.mrb[89].mxu1  ;;  %v13222_v25 = vld [vmem:[%s17094_s5 + $0x40] sm:$0xff]  }
 0x36f   :  { %v2170_v31 = vpop.f32.mrb[90].mxu1  ;;  %12302 = vmatpush3.bf16.msra.mxu1 %v13222_v25  ;;  %v13223_v3 = vld [vmem:[%s17094_s5 + $0x58] sm:$0xff]  }
 0x370   :  { %v15059_v55 = vadd.f32 %v2170_v31, %v15013_v54  ;;  %v11528_v46 = vpop.f32.mrb[91].mxu1  ;;  %12303 = vmatprep.subr.bf16.mxu1 %v13778_v0 }
 0x372   :  { %11786 = vmatmul.mubr.bf16.gmra.mrb[196].mxu1 %v14847_v28 }
 0x373   :  { %11789 = vmatprep.mubr.msk.bf16.mxu1 %vm13779_vm3, %v13778_v0 }
 0x375   :  { %v2175_v21 = vpop.f32.mrb[92].mxu1 }
 0x376   :  { %v15064_v19 = vadd.f32 %v2175_v21, %v1998_v33  ;;  %v11531_v7 = vpop.f32.mrb[93].mxu1  ;;  %v3138_v33 = vsel %vm2035_vm4, %v3135_v50, %v3137_v30 }
 0x377   :  { %v2178_v45 = vpop.f32.mrb[94].mxu1 }
 0x378   :  { %v15066_v5 = vadd.f32 %v2178_v45, %v2001_v43  ;;  %v11532_v6 = vpop.f32.mrb[95].mxu1 }
 0x37a   :  { %11790 = vmatmul.mubr.bf16.gmra.mrb[200].mxu1 %v14729_v14 }
 0x37b   :  { %11793 = vmatprep.mubr.msk.bf16.mxu1 %vm13779_vm3, %v13778_v0 }
 0x37d   :  { %v2183_v44 = vpop.f32.mrb[96].mxu1 }
 0x37e   :  { %v15071_v54 = vadd.f32 %v2183_v44, %v2006_v9  ;;  %v11535_v28 = vpop.f32.mrb[97].mxu1  ;;  %v13224_v44 = vld [vmem:[%s17094_s5 + $0x60] sm:$0xff]  }
 0x37f   :  { %v2186_v24 = vpop.f32.mrb[98].mxu1  ;;  %v13225_v28 = vld [vmem:[%s17094_s5 + $0x48] sm:$0xff]  }
 0x380   :  { %v11536_v59 = vpop.f32.mrb[99].mxu1  ;;  %12304 = vmatpush3.bf16.msra.mxu1 %v13225_v28  ;;  %v13241_v28 = vld [vmem:[%s17094_s5 + $0x78] sm:$0xff]  }
 0x381   :  { %12305 = vmatprep.subr.bf16.mxu1 %v13778_v0 }
 0x382   :  { %11794 = vmatmul.mubr.bf16.gmra.mrb[204].mxu1 %v3138_v33 }
 0x383   :  { %11797 = vmatprep.mubr.msk.bf16.mxu1 %vm13779_vm3, %v13778_v0 }
 0x385   :  { %v2305_v14 = vpop.f32.mrb[100].mxu1 }
 0x386   :  { %v15079_v43 = vadd.f32 %v2305_v14, %v2189_v38  ;;  %v11555_v36 = vpop.f32.mrb[101].mxu1 }
 0x387   :  { %v2308_v40 = vpop.f32.mrb[102].mxu1 }
 0x388   :  { %v15081_v9 = vadd.f32 %v2308_v40, %v2190_v18  ;;  %v11556_v10 = vpop.f32.mrb[103].mxu1 }
 0x38a   :  { %11798 = vmatmul.mubr.bf16.gmra.mrb[208].mxu1 %v3137_v30 }
 0x38b   :  { %12317 = vmatprep.mubr.msk.bf16.mxu1 %vm13779_vm3, %v13778_v0 }
 0x38d   :  { %v2313_v4 = vpop.f32.mrb[104].mxu1 }
 0x38e   :  { %v15085_v61 = vadd.f32 %v2313_v4, %v2191_v53  ;;  %v11559_v50 = vpop.f32.mrb[105].mxu1  ;;  %v13220_v53 = vld [vmem:[%s17094_s5 + $0x48] sm:$0xff]   ;;  %v13227_v4 = vld [vmem:[%s17094_s5 + $0x50] sm:$0xff]  }
 0x38f   :  { %v2316_v48 = vpop.f32.mrb[106].mxu1  ;;  %11804 = vmatpush3.bf16.msra.mxu0 %v13220_v53  ;;  %12306 = vmatpush3.bf16.msra.mxu1 %v13227_v4 }
 0x390   :  { %v15087_v41 = vadd.f32 %v2316_v48, %v2192_v51  ;;  %v11560_v20 = vpop.f32.mrb[107].mxu1  ;;  %11805 = vmatprep.subr.bf16.mxu0 %v13778_v0  ;;  %12307 = vmatprep.subr.bf16.mxu1 %v13778_v0 }
 0x393   :  { %11806 = vmatpush3.bf16.msra.mxu0 %v13221_v47  ;;  %v13236_v47 = vld [vmem:[%s17094_s5 + $0x68] sm:$0xff]  }
 0x394   :  { %11807 = vmatprep.subr.bf16.mxu0 %v13778_v0 }
 0x395   :  { %v2321_v1 = vpop.f32.mrb[108].mxu1 }
 0x396   :  { %v15089_v38 = vadd.f32 %v2321_v1, %v2193_v27  ;;  %v11563_v22 = vpop.f32.mrb[109].mxu1 }
 0x397   :  { %v2324_v49 = vpop.f32.mrb[110].mxu1  ;;  %11808 = vmatpush3.bf16.msra.mxu0 %v13223_v3 }
 0x398   :  { %v11564_v18 = vpop.f32.mrb[111].mxu1  ;;  %11809 = vmatprep.subr.bf16.mxu0 %v13778_v0 }
 0x39b   :  { %11810 = vmatpush3.bf16.msra.mxu0 %v13224_v44 }
 0x39c   :  { %11811 = vmatprep.subr.bf16.mxu0 %v13778_v0 }
 0x39d   :  { %v2328_v51 = vpop.f32.mrb[112].mxu1 }
 0x39e   :  { %v11567_v52 = vpop.f32.mrb[113].mxu1 }
 0x39f   :  { %v2330_v56 = vpop.f32.mrb[114].mxu1  ;;  %v13233_v52 = vld [vmem:[%s17094_s5 + $0x60] sm:$0xff]  }
 0x3a0   :  { %v11568_v27 = vpop.f32.mrb[115].mxu1 }
 0x3a5   :  { %v2334_v31 = vpop.f32.mrb[116].mxu1 }
 0x3a6   :  { %v15110_v46 = vadd.f32 %v2334_v31, %v2194_v34  ;;  %v11571_v21 = vpop.f32.mrb[117].mxu1  ;;  %v13226_v34 = vld [vmem:[%s17094_s5 + $0x68] sm:$0xff]  }
 0x3a7   :  { %v2337_v7 = vpop.f32.mrb[118].mxu1  ;;  %11812 = vmatpush3.bf16.msra.mxu0 %v13226_v34 }
 0x3a8   :  { %v15114_v45 = vadd.f32 %v2337_v7, %v15059_v55  ;;  %v11572_v6 = vpop.f32.mrb[119].mxu1  ;;  %11813 = vmatprep.subr.bf16.mxu0 %v13778_v0 }
 0x3ad   :  { %v2342_v55 = vpop.f32.mrb[120].mxu1 }
 0x3ae   :  { %v15128_v24 = vadd.f32 %v2342_v55, %v15064_v19  ;;  %v11575_v30 = vpop.f32.mrb[121].mxu1  ;;  %v13228_v19 = vld [vmem:[%s17094_s5 + $0x70] sm:$0xff]  }
 0x3af   :  { %v2345_v59 = vpop.f32.mrb[122].mxu1  ;;  %11814 = vmatpush3.bf16.msra.mxu0 %v13228_v19 }
 0x3b0   :  { %v15132_v33 = vadd.f32 %v2345_v59, %v15066_v5  ;;  %v11576_v14 = vpop.f32.mrb[123].mxu1  ;;  %v13229_v5 = vld [vmem:[%s17094_s5 + $0x78] sm:$0xff]   ;;  %11815 = vmatprep.subr.bf16.mxu0 %v13778_v0 }
 0x3b3   :  { %11816 = vmatpush3.bf16.msra.mxu0 %v13229_v5 }
 0x3b4   :  { %11821 = vmatprep.subr.bf16.mxu0 %v13778_v0 }
 0x3b5   :  { %v2350_v36 = vpop.f32.mrb[124].mxu1 }
 0x3b6   :  { %v15135_v40 = vadd.f32 %v2350_v36, %v15071_v54  ;;  %v11579_v10 = vpop.f32.mrb[125].mxu1  ;;  %v13230_v54 = vld [vmem:[%s17094_s5 + $0x58] sm:$0xff]  }
 0x3b7   :  { %v2353_v50 = vpop.f32.mrb[126].mxu1  ;;  %12308 = vmatpush3.bf16.msra.mxu1 %v13230_v54 }
 0x3b8   :  { %v11580_v48 = vpop.f32.mrb[127].mxu1  ;;  %12309 = vmatprep.subr.bf16.mxu1 %v13778_v0 }
 0x3bb   :  { %12310 = vmatpush3.bf16.msra.mxu1 %v13233_v52 }
 0x3bc   :  { %12311 = vmatprep.subr.bf16.mxu1 %v13778_v0 }
 0x3bd   :  { %v2527_v20 = vpop.f32.mrb[128].mxu1 }
 0x3be   :  { %v2578_v1 = vadd.f32 %v2527_v20, %v15079_v43  ;;  %v11599_v22 = vpop.f32.mrb[129].mxu1 }
 0x3bf   :  { %v2530_v49 = vpop.f32.mrb[130].mxu1  ;;  %12312 = vmatpush3.bf16.msra.mxu1 %v13236_v47 }
 0x3c0   :  { %v2579_v18 = vadd.f32 %v2530_v49, %v15081_v9  ;;  %v11600_v2 = vpop.f32.mrb[131].mxu1  ;;  %v2765_v53 = vadd.f32 %v14890_v17, %v2578_v1  ;;  %12313 = vmatprep.subr.bf16.mxu1 %v13778_v0 }
 0x3c2   :  { %v2766_v51 = vadd.f32 %v14893_v12, %v2579_v18 }
 0x3c5   :  { %v2535_v56 = vpop.f32.mrb[132].mxu1 }
 0x3c6   :  { %v2580_v27 = vadd.f32 %v2535_v56, %v15085_v61  ;;  %v11603_v43 = vpop.f32.mrb[133].mxu1  ;;  %v13238_v61 = vld [vmem:[%s17094_s5 + $0x70] sm:$0xff]  }
 0x3c7   :  { %v2538_v25 = vpop.f32.mrb[134].mxu1  ;;  %12314 = vmatpush3.bf16.msra.mxu1 %v13238_v61 }
 0x3c8   :  { %v2581_v17 = vadd.f32 %v2538_v25, %v15087_v41  ;;  %v11604_v9 = vpop.f32.mrb[135].mxu1  ;;  %v2767_v12 = vadd.f32 %v14903_v15, %v2580_v27  ;;  %12315 = vmatprep.subr.bf16.mxu1 %v13778_v0 }
 0x3ca   :  { %v2768_v3 = vadd.f32 %v14907_v29, %v2581_v17 }
 0x3cb   :  { %12316 = vmatpush3.bf16.msra.mxu1 %v13241_v28 }
 0x3cc   :  { %12321 = vmatprep.subr.bf16.mxu1 %v13778_v0 }
 0x3cd   :  { %v2543_v31 = vpop.f32.mrb[136].mxu1 }
 0x3ce   :  { %v2582_v21 = vadd.f32 %v2543_v31, %v15089_v38  ;;  %v11607_v7 = vpop.f32.mrb[137].mxu1 }
 0x3cf   :  { %v2546_v6 = vpop.f32.mrb[138].mxu1 }
 0x3d0   :  { %v11608_v41 = vpop.f32.mrb[139].mxu1  ;;  %v2769_v15 = vadd.f32 %v14915_v8, %v2582_v21 }
 0x3d5   :  { %v2550_v44 = vpop.f32.mrb[140].mxu1 }
 0x3d6   :  { %v11611_v29 = vpop.f32.mrb[141].mxu1 }
 0x3d7   :  { %v2552_v34 = vpop.f32.mrb[142].mxu1 }
 0x3d8   :  { %v11612_v55 = vpop.f32.mrb[143].mxu1 }
 0x3dd   :  { %v2556_v38 = vpop.f32.mrb[144].mxu1 }
 0x3de   :  { %v2583_v30 = vadd.f32 %v2556_v38, %v15110_v46  ;;  %v11615_v59 = vpop.f32.mrb[145].mxu1 }
 0x3df   :  { %v2559_v14 = vpop.f32.mrb[146].mxu1 }
 0x3e0   :  { %v2584_v36 = vadd.f32 %v2559_v14, %v15114_v45  ;;  %v11616_v10 = vpop.f32.mrb[147].mxu1  ;;  %v2770_v8 = vadd.f32 %v14935_v13, %v2583_v30 }
 0x3e2   :  { %v2771_v4 = vadd.f32 %v14940_v16, %v2584_v36 }
 0x3e5   :  { %v2564_v19 = vpop.f32.mrb[148].mxu1 }
 0x3e6   :  { %v2585_v50 = vadd.f32 %v2564_v19, %v15128_v24  ;;  %v11619_v48 = vpop.f32.mrb[149].mxu1 }
 0x3e7   :  { %v2567_v5 = vpop.f32.mrb[150].mxu1 }
 0x3e8   :  { %v2586_v54 = vadd.f32 %v2567_v5, %v15132_v33  ;;  %v11620_v20 = vpop.f32.mrb[151].mxu1  ;;  %v2772_v1 = vadd.f32 %v14950_v11, %v2585_v50  ;;  %v15212_v5 = vld [vmem:[%s17093_s4] ss:$0 sm:$0xff] }
 0x3ea   :  { %v2773_v46 = vadd.f32 %v14955_v37, %v2586_v54 }
 0x3ed   :  { %v2572_v22 = vpop.f32.mrb[152].mxu1 }
 0x3ee   :  { %v2587_v45 = vadd.f32 %v2572_v22, %v15135_v40  ;;  %v11623_v49 = vpop.f32.mrb[153].mxu1 }
 0x3ef   :  { %v2575_v18 = vpop.f32.mrb[154].mxu1 }
 0x3f0   :  { %v11624_v13 = vpop.f32.mrb[155].mxu1  ;;  %v2774_v16 = vadd.f32 %v14962_v23, %v2587_v45  ;;  %v13231_v18 = vld [vmem:[%s17094_s5] sm:$0xff]  }
 0x3f5   :  { %v2876_v2 = vpop.f32.mrb[156].mxu1 }
 0x3f6   :  { %v2927_v52 = vadd.f32 %v2876_v2, %v2765_v53  ;;  %v11687_v24 = vpop.f32.mrb[157].mxu1 }
 0x3f7   :  { %v2879_v56 = vpop.f32.mrb[158].mxu1 }
 0x3f8   :  { %v2928_v27 = vadd.f32 %v2879_v56, %v2766_v51  ;;  %v11688_v43 = vpop.f32.mrb[159].mxu1  ;;  %v3106_v33 = vadd.f32 %v14974_v58, %v2927_v52 }
 0x3f9   :  { %v13232_v43 = vld [vmem:[%s17094_s5 + $0x8] sm:$0xff]  }
 0x3fa   :  { %v3107_v11 = vadd.f32 %v14976_v35, %v2928_v27 }
 0x3fd   :  { %v2884_v47 = vpop.f32.mrb[160].mxu1 }
 0x3fe   :  { %v2929_v37 = vadd.f32 %v2884_v47, %v2767_v12  ;;  %v11691_v25 = vpop.f32.mrb[161].mxu1  ;;  %v13234_v47 = vld [vmem:[%s17094_s5 + $0x10] sm:$0xff]  }
 0x3ff   :  { %v2887_v17 = vpop.f32.mrb[162].mxu1 }
 0x400   :  { %v2930_v40 = vadd.f32 %v2887_v17, %v2768_v3  ;;  %v11692_v9 = vpop.f32.mrb[163].mxu1  ;;  %v3108_v61 = vadd.f32 %v14986_v39, %v2929_v37 }
 0x402   :  { %v3109_v23 = vadd.f32 %v14988_v60, %v2930_v40 }
 0x405   :  { %v2892_v31 = vpop.f32.mrb[164].mxu1 }
 0x406   :  { %v2931_v53 = vadd.f32 %v2892_v31, %v2769_v15  ;;  %v11695_v21 = vpop.f32.mrb[165].mxu1  ;;  %v13237_v31 = vld [vmem:[%s17094_s5 + $0x20] sm:$0xff]  }
 0x407   :  { %v2895_v7 = vpop.f32.mrb[166].mxu1 }
 0x408   :  { %v11696_v51 = vpop.f32.mrb[167].mxu1  ;;  %v3110_v6 = vadd.f32 %v14997_v42, %v2931_v53 }
 0x409   :  { %v13239_v51 = vld [vmem:[%s17094_s5 + $0x28] sm:$0xff]  }
 0x40d   :  { %v2899_v58 = vpop.f32.mrb[168].mxu1 }
 0x40e   :  { %v11699_v41 = vpop.f32.mrb[169].mxu1  ;;  %v13240_v58 = vld [vmem:[%s17094_s5 + $0x30] sm:$0xff]  }
 0x40f   :  { %v2901_v35 = vpop.f32.mrb[170].mxu1 }
 0x410   :  { %v11700_v44 = vpop.f32.mrb[171].mxu1 }
 0x415   :  { %v2905_v12 = vpop.f32.mrb[172].mxu1 }
 0x416   :  { %v2932_v29 = vadd.f32 %v2905_v12, %v2770_v8  ;;  %v11703_v28 = vpop.f32.mrb[173].mxu1 }
 0x417   :  { %v2908_v3 = vpop.f32.mrb[174].mxu1 }
 0x418   :  { %v2933_v34 = vadd.f32 %v2908_v3, %v2771_v4  ;;  %v11704_v55 = vpop.f32.mrb[175].mxu1  ;;  %v15195_v39 = vadd.f32 %v15015_v57, %v2932_v29  ;;  %v13242_v3 = vld [vmem:[%s17094_s5 + $0x38] sm:$0xff]  }
 0x41a   :  { %v15198_v60 = vadd.f32 %v15018_v26, %v2933_v34 }
 0x41d   :  { %v2913_v15 = vpop.f32.mrb[176].mxu1 }
 0x41e   :  { %v2934_v38 = vadd.f32 %v2913_v15, %v2772_v1  ;;  %v11707_v30 = vpop.f32.mrb[177].mxu1 }
 0x41f   :  { %v2916_v42 = vpop.f32.mrb[178].mxu1 }
 0x420   :  { %v2935_v59 = vadd.f32 %v2916_v42, %v2773_v46  ;;  %v11708_v14 = vpop.f32.mrb[179].mxu1  ;;  %v15201_v36 = vadd.f32 %v15026_v32, %v2934_v38  ;;  %v13244_v38 = vld [vmem:[%s17094_s5] sm:$0xff]  }
 0x422   :  { %v15204_v10 = vadd.f32 %v15029_v62, %v2935_v59 }
 0x425   :  { %v2921_v8 = vpop.f32.mrb[180].mxu1 }
 0x426   :  { %v2936_v4 = vadd.f32 %v2921_v8, %v2774_v16  ;;  %v11711_v19 = vpop.f32.mrb[181].mxu1 }
 0x427   :  { %v2924_v57 = vpop.f32.mrb[182].mxu1 }
 0x428   :  { %v11712_v50 = vpop.f32.mrb[183].mxu1  ;;  %v15207_v26 = vadd.f32 %v15035_v63, %v2936_v4  ;;  %v13246_v57 = vld [vmem:[%s17094_s5 + $0x8] sm:$0xff]  }
 0x42d   :  { %v3224_v48 = vpop.f32.mrb[184].mxu1 }
 0x42e   :  { %v3275_v54 = vadd.f32 %v3224_v48, %v3106_v33  ;;  %v11775_v32 = vpop.f32.mrb[185].mxu1  ;;  %v13247_v48 = vld [vmem:[%s17094_s5 + $0x90] sm:$0xff]  }
 0x42f   :  { %v3227_v20 = vpop.f32.mrb[186].mxu1 }
 0x430   :  { %v3292_v62 = vadd.f32 %v15212_v5, %v3275_v54  ;;  %v3276_v1 = vadd.f32 %v3227_v20, %v3107_v11  ;;  %v11776_v46 = vpop.f32.mrb[187].mxu1  ;;  %v13248_v54 = vld [vmem:[%s17094_s5 + $0x10] sm:$0xff]  }
 0x432   :  { %v3302_v22 = vmax.f32 %v3292_v62, 0.0  ;;  %v15216_v45 = vadd.f32 %v15212_v5, %v3276_v1 }
 0x434   :  { %v15218_v49 = vpack.c.bf16 %v3302_v22, %v3302_v22  ;;  %v13249_v22 = vld [vmem:[%s17094_s5 + $0x98] sm:$0xff]  }
 0x435   :  { %v3232_v63 = vpop.f32.mrb[188].mxu1 }
 0x436   :  { %v3347_v13 = vshrl.u32 %v15218_v49, 16  ;;  %v3277_v16 = vadd.f32 %v3232_v63, %v3108_v61  ;;  %v11779_v2 = vpop.f32.mrb[189].mxu1  ;;  %v13235_v61 = vld [vmem:[%s17094_s5 + $0x18] sm:$0xff]   ;;  %v13252_v63 = vld [vmem:[%s17094_s5 + $0x20] sm:$0xff]  }
 0x437   :  { %v3235_v52 = vpop.f32.mrb[190].mxu1  ;;  %v13255_v2 = vld [vmem:[%s17094_s5 + $0xb0] sm:$0xff]  }
 0x438   :  { %v15225_v24 = vadd.f32 %v15212_v5, %v3277_v16  ;;  %v3278_v56 = vadd.f32 %v3235_v52, %v3109_v23  ;;  %v11780_v27 = vpop.f32.mrb[191].mxu1  ;;  %11818 = vmatmul.mubr.bf16.vlgmr.msra.gmra.mrb[100].mxu0 %v3347_v13  ;;  %v13254_v16 = vld [vmem:[%s17094_s5 + $0x28] sm:$0xff]   ;;  %v13256_v52 = vld [vmem:[%s17094_s5 + $0x30] sm:$0xff]  }
 0x439   :  { %11822 = vmatpush3.bf16.msra.mxu0 %v13231_v18  ;;  %11837 = vmatprep.mubr.msk.bf16.mxu0 %vm13779_vm3, %v13778_v0  ;;  %v13253_v18 = vld [vmem:[%s17094_s5 + $0xa8] sm:$0xff]   ;;  %v13258_v27 = vld [vmem:[%s17094_s5 + $0x38] sm:$0xff]  }
 0x43a   :  { %v15235_v33 = vadd.f32 %v15212_v5, %v3278_v56  ;;  %11823 = vmatprep.subr.bf16.mxu0 %v13778_v0  ;;  %v13257_v56 = vld [vmem:[%s17094_s5 + $0xb8] sm:$0xff]  }
 0x43d   :  { %11824 = vmatpush3.bf16.msra.mxu0 %v13232_v43  ;;  %v3240_v11 = vpop.f32.mrb[192].mxu1  ;;  %v13259_v43 = vld [vmem:[%s17094_s5 + $0xc0] sm:$0xff]  }
 0x43e   :  { %v3279_v37 = vadd.f32 %v3240_v11, %v3110_v6  ;;  %v11783_v25 = vpop.f32.mrb[193].mxu1  ;;  %11825 = vmatprep.subr.bf16.mxu0 %v13778_v0  ;;  %v13260_v11 = vld [vmem:[%s17094_s5 + $0x80] sm:$0xff]  }
 0x43f   :  { %v3243_v17 = vpop.f32.mrb[194].mxu1  ;;  %v13262_v25 = vld [vmem:[%s17094_s5 + $0x88] sm:$0xff]  }
 0x440   :  { %v15243_v40 = vadd.f32 %v15212_v5, %v3279_v37  ;;  %v11784_v9 = vpop.f32.mrb[195].mxu1  ;;  %v13261_v37 = vld [vmem:[%s17094_s5 + $0xc8] sm:$0xff]   ;;  %v13263_v17 = vld [vmem:[%s17094_s5 + $0xd0] sm:$0xff]  }
 0x441   :  { %11826 = vmatpush3.bf16.msra.mxu0 %v13234_v47  ;;  %v3544_v47 = vrot.slane %v15218_v49, 1  ;;  %v13264_v9 = vld [vmem:[%s17094_s5 + $0x90] sm:$0xff]  }
 0x442   :  { %11827 = vmatprep.subr.bf16.mxu0 %v13778_v0 }
 0x445   :  { %11828 = vmatpush3.bf16.msra.mxu0 %v13235_v61  ;;  %v3247_v23 = vpop.f32.mrb[196].mxu1  ;;  %v13265_v61 = vld [vmem:[%s17094_s5 + $0xd8] sm:$0xff]  }
 0x446   :  { %v11787_v53 = vpop.f32.mrb[197].mxu1  ;;  %11829 = vmatprep.subr.bf16.mxu0 %v13778_v0  ;;  %v13266_v23 = vld [vmem:[%s17094_s5 + $0x98] sm:$0xff]  }
 0x447   :  { %v3249_v21 = vpop.f32.mrb[198].mxu1  ;;  %v13268_v53 = vld [vmem:[%s17094_s5 + $0xa0] sm:$0xff]  }
 0x448   :  { %v11788_v7 = vpop.f32.mrb[199].mxu1  ;;  %v13269_v21 = vld [vmem:[%s17094_s5 + $0xe8] sm:$0xff]  }
 0x449   :  { %11830 = vmatpush3.bf16.msra.mxu0 %v13237_v31  ;;  %v13267_v31 = vld [vmem:[%s17094_s5 + $0xe0] sm:$0xff]   ;;  %v13270_v7 = vld [vmem:[%s17094_s5 + $0xa8] sm:$0xff]  }
 0x44a   :  { %11831 = vmatprep.subr.bf16.mxu0 %v13778_v0 }
 0x44d   :  { %11832 = vmatpush3.bf16.msra.mxu0 %v13239_v51  ;;  %v3253_v6 = vpop.f32.mrb[200].mxu1  ;;  %v13271_v51 = vld [vmem:[%s17094_s5 + $0xf0] sm:$0xff]  }
 0x44e   :  { %v3280_v41 = vadd.f32 %v3253_v6, %v15195_v39  ;;  %v11791_v35 = vpop.f32.mrb[201].mxu1  ;;  %11833 = vmatprep.subr.bf16.mxu0 %v13778_v0  ;;  %v13272_v6 = vld [vmem:[%s17094_s5 + $0xb0] sm:$0xff]  }
 0x44f   :  { %v3256_v44 = vpop.f32.mrb[202].mxu1  ;;  %v13275_v35 = vld [vmem:[%s17094_s5 + $0x100] sm:$0xff]  }
 0x450   :  { %v3297_v12 = vadd.f32 %v15212_v5, %v3280_v41  ;;  %v3281_v29 = vadd.f32 %v3256_v44, %v15198_v60  ;;  %v11792_v28 = vpop.f32.mrb[203].mxu1  ;;  %v13243_v60 = vld [vmem:[%s17094_s5 + $0x80] sm:$0xff]   ;;  %v13274_v41 = vld [vmem:[%s17094_s5 + $0xb8] sm:$0xff]  }
 0x451   :  { %11834 = vmatpush3.bf16.msra.mxu0 %v13240_v58  ;;  %v13273_v58 = vld [vmem:[%s17094_s5 + $0xf8] sm:$0xff]   ;;  %v13276_v44 = vld [vmem:[%s17094_s5 + $0xc0] sm:$0xff]   ;;  %v13277_v28 = vld [vmem:[%s17094_s5 + $0x108] sm:$0xff]  }
 0x452   :  { %v3307_v34 = vmax.f32 %v3297_v12, 0.0  ;;  %v15268_v55 = vadd.f32 %v15212_v5, %v3281_v29  ;;  %11835 = vmatprep.subr.bf16.mxu0 %v13778_v0  ;;  %v3652_v12 = vrot.slane %v3347_v13, 1  ;;  %v13279_v13 = vld [vmem:[%s17094_s5 + $0x110] sm:$0xff]  }
 0x454   :  { %v15271_v39 = vpack.c.bf16 %v3307_v34, %v3307_v34  ;;  %v13280_v34 = vld [vmem:[%s17094_s5 + $0xd0] sm:$0xff]  }
 0x455   :  { %11836 = vmatpush3.bf16.msra.mxu0 %v13242_v3  ;;  %v3261_v15 = vpop.f32.mrb[204].mxu1  ;;  %v13278_v3 = vld [vmem:[%s17094_s5 + $0xc8] sm:$0xff]  }
 0x456   :  { %v6054_v30 = vshrl.u32 %v15271_v39, 16  ;;  %v3282_v42 = vadd.f32 %v3261_v15, %v15201_v36  ;;  %v11795_v59 = vpop.f32.mrb[205].mxu1  ;;  %11841 = vmatprep.subr.bf16.mxu0 %v13778_v0  ;;  %v13245_v36 = vld [vmem:[%s17094_s5 + $0x88] sm:$0xff]   ;;  %v6250_v29 = vrot.slane %v15271_v39, 1  ;;  %v13281_v15 = vld [vmem:[%s17094_s5 + $0x118] sm:$0xff]  }
 0x457   :  { %v3264_v14 = vpop.f32.mrb[206].mxu1  ;;  %v13285_v59 = vld [vmem:[%s17094_s5 + $0x128] sm:$0xff]  }
 0x458   :  { %v15283_v8 = vadd.f32 %v15212_v5, %v3282_v42  ;;  %v3283_v4 = vadd.f32 %v3264_v14, %v15204_v10  ;;  %11838 = vmatmul.mubr.bf16.vlgmr.msra.gmra.mrb[100].mxu0 %v15218_v49  ;;  %v11796_v19 = vpop.f32.mrb[207].mxu1  ;;  %12318 = vmatmul.mubr.bf16.vlgmr.msra.gmra.mrb[212].mxu1 %v6054_v30  ;;  %v13284_v42 = vld [vmem:[%s17094_s5 + $0xe0] sm:$0xff]   ;;  %v13286_v14 = vld [vmem:[%s17094_s5 + $0xe8] sm:$0xff]  }
 0x459   :  { %11842 = vmatpush3.bf16.msra.mxu0 %v13243_v60  ;;  %12322 = vmatpush3.bf16.msra.mxu1 %v13244_v38  ;;  %v13282_v60 = vld [vmem:[%s17094_s5 + $0xd8] sm:$0xff]   ;;  %v13283_v38 = vld [vmem:[%s17094_s5 + $0x120] sm:$0xff]   ;;  %v13288_v19 = vld [vmem:[%s17094_s5 + $0xf0] sm:$0xff]  }
 0x45a   :  { %v15296_v50 = vadd.f32 %v15212_v5, %v3283_v4  ;;  %11843 = vmatprep.subr.bf16.mxu0 %v13778_v0  ;;  %12323 = vmatprep.subr.bf16.mxu1 %v13778_v0  ;;  %v13287_v4 = vld [vmem:[%s17094_s5 + $0x130] sm:$0xff]  }
 0x45b   :  { %11857 = vmatprep.mubr.msk.bf16.mxu0 %vm13779_vm3, %v13778_v0  ;;  %12337 = vmatprep.mubr.msk.bf16.mxu1 %vm13779_vm3, %v13778_v0 }
 0x45d   :  { %11844 = vmatpush3.bf16.msra.mxu0 %v13245_v36  ;;  %12324 = vmatpush3.bf16.msra.mxu1 %v13246_v57  ;;  %v3269_v10 = vpop.f32.mrb[208].mxu1  ;;  %v13289_v36 = vld [vmem:[%s17094_s5 + $0x138] sm:$0xff]  }
 0x45e   :  { %v3284_v32 = vadd.f32 %v3269_v10, %v15207_v26  ;;  %v11799_v20 = vpop.f32.mrb[209].mxu1  ;;  %11845 = vmatprep.subr.bf16.mxu0 %v13778_v0  ;;  %12325 = vmatprep.subr.bf16.mxu1 %v13778_v0  ;;  %v13250_v26 = vld [vmem:[%s17094_s5 + $0x18] sm:$0xff]   ;;  %v13291_v10 = vld [vmem:[%s17094_s5 + $0x140] sm:$0xff]  }
 0x45f   :  { %v3272_v62 = vpop.f32.mrb[210].mxu1  ;;  %v13290_v57 = vld [vmem:[%s17094_s5 + $0xf8] sm:$0xff]   ;;  %v13293_v20 = vld [vmem:[%s17094_s5 + $0x148] sm:$0xff]  }
 0x460   :  { %v15314_v1 = vadd.f32 %v15212_v5, %v3284_v32  ;;  %v11800_v46 = vpop.f32.mrb[211].mxu1  ;;  %v13251_v5 = vld [vmem:[%s17094_s5 + $0xa0] sm:$0xff]   ;;  %v6357_v32 = vrot.slane %v6054_v30, 1  ;;  %v13294_v62 = vld [vmem:[%s17094_s5 + $0x108] sm:$0xff]   ;;  %v13296_v30 = vld [vmem:[%s17094_s5 + $0x110] sm:$0xff]  }
 0x461   :  { %11846 = vmatpush3.bf16.msra.mxu0 %v13247_v48  ;;  %12326 = vmatpush3.bf16.msra.mxu1 %v13248_v54  ;;  %v13292_v48 = vld [vmem:[%s17094_s5 + $0x100] sm:$0xff]   ;;  %v3760_v54 = vrot.slane %v15218_v49, 2  ;;  %v13295_v49 = vld [vmem:[%s17094_s5 + $0x150] sm:$0xff]   ;;  %v13297_v46 = vld [vmem:[%s17094_s5 + $0x158] sm:$0xff]  }
 0x462   :  { %11847 = vmatprep.subr.bf16.mxu0 %v13778_v0  ;;  %12327 = vmatprep.subr.bf16.mxu1 %v13778_v0 }
 0x465   :  { %11848 = vmatpush3.bf16.msra.mxu0 %v13249_v22  ;;  %12328 = vmatpush3.bf16.msra.mxu1 %v13250_v26  ;;  %v13298_v22 = vld [vmem:[%s17094_s5 + $0x118] sm:$0xff]   ;;  %v13299_v26 = vld [vmem:[%s17094_s5 + $0x160] sm:$0xff]  }
 0x466   :  { %11849 = vmatprep.subr.bf16.mxu0 %v13778_v0  ;;  %12329 = vmatprep.subr.bf16.mxu1 %v13778_v0 }
 0x469   :  { %11850 = vmatpush3.bf16.msra.mxu0 %v13251_v5  ;;  %12330 = vmatpush3.bf16.msra.mxu1 %v13252_v63  ;;  %v13300_v5 = vld [vmem:[%s17094_s5 + $0x120] sm:$0xff]   ;;  %v13301_v63 = vld [vmem:[%s17094_s5 + $0x168] sm:$0xff]  }
 0x46a   :  { %11851 = vmatprep.subr.bf16.mxu0 %v13778_v0  ;;  %12331 = vmatprep.subr.bf16.mxu1 %v13778_v0 }
 0x46d   :  { %11852 = vmatpush3.bf16.msra.mxu0 %v13253_v18  ;;  %12332 = vmatpush3.bf16.msra.mxu1 %v13254_v16  ;;  %v13302_v18 = vld [vmem:[%s17094_s5 + $0x128] sm:$0xff]   ;;  %v13303_v16 = vld [vmem:[%s17094_s5 + $0x170] sm:$0xff]  }
 0x46e   :  { %11853 = vmatprep.subr.bf16.mxu0 %v13778_v0  ;;  %12333 = vmatprep.subr.bf16.mxu1 %v13778_v0 }
 0x471   :  { %11854 = vmatpush3.bf16.msra.mxu0 %v13255_v2  ;;  %12334 = vmatpush3.bf16.msra.mxu1 %v13256_v52  ;;  %v13304_v2 = vld [vmem:[%s17094_s5 + $0x130] sm:$0xff]   ;;  %v13305_v52 = vld [vmem:[%s17094_s5 + $0x178] sm:$0xff]  }
 0x472   :  { %11855 = vmatprep.subr.bf16.mxu0 %v13778_v0  ;;  %12335 = vmatprep.subr.bf16.mxu1 %v13778_v0 }
 0x475   :  { %11856 = vmatpush3.bf16.msra.mxu0 %v13257_v56  ;;  %12336 = vmatpush3.bf16.msra.mxu1 %v13258_v27  ;;  %v13306_v56 = vld [vmem:[%s17094_s5 + $0x138] sm:$0xff]   ;;  %v3303_v27 = vmax.f32 %v15216_v45, 0.0  ;;  %v6464_v45 = vrot.slane %v15271_v39, 2 }
 0x476   :  { %11861 = vmatprep.subr.bf16.mxu0 %v13778_v0  ;;  %12341 = vmatprep.subr.bf16.mxu1 %v13778_v0 }
 0x478   :  { %11858 = vmatmul.mubr.bf16.vlgmr.msra.gmra.mrb[100].mxu0 %v3544_v47  ;;  %12338 = vmatmul.mubr.bf16.vlgmr.msra.gmra.mrb[212].mxu1 %v15271_v39  ;;  %v15575_v47 = vpack.c.bf16 %v3303_v27, %v3303_v27  ;;  %v13311_v39 = vld [vmem:[%s17094_s5 + $0x190] sm:$0xff]   ;;  %v13356_v27 = vld [vmem:[%s17094_s5 + $0x200] sm:$0xff]  }
 0x479   :  { %11862 = vmatpush3.bf16.msra.mxu0 %v13259_v43  ;;  %12342 = vmatpush3.bf16.msra.mxu1 %v13260_v11  ;;  %v13307_v43 = vld [vmem:[%s17094_s5 + $0x180] sm:$0xff]  }
 0x47a   :  { %11863 = vmatprep.subr.bf16.mxu0 %v13778_v0  ;;  %12343 = vmatprep.subr.bf16.mxu1 %v13778_v0  ;;  %v13308_v11 = vld [vmem:[%s17094_s5 + $0x140] sm:$0xff]  }
 0x47b   :  { %11877 = vmatprep.mubr.msk.bf16.mxu0 %vm13779_vm3, %v13778_v0  ;;  %12357 = vmatprep.mubr.msk.bf16.mxu1 %vm13779_vm3, %v13778_v0 }
 0x47d   :  { %11864 = vmatpush3.bf16.msra.mxu0 %v13261_v37  ;;  %12344 = vmatpush3.bf16.msra.mxu1 %v13262_v25  ;;  %v13309_v37 = vld [vmem:[%s17094_s5 + $0x188] sm:$0xff]  }
 0x47e   :  { %11865 = vmatprep.subr.bf16.mxu0 %v13778_v0  ;;  %12345 = vmatprep.subr.bf16.mxu1 %v13778_v0  ;;  %v13310_v25 = vld [vmem:[%s17094_s5 + $0x148] sm:$0xff]  }
 0x481   :  { %11866 = vmatpush3.bf16.msra.mxu0 %v13263_v17  ;;  %12346 = vmatpush3.bf16.msra.mxu1 %v13264_v9  ;;  %v13312_v17 = vld [vmem:[%s17094_s5 + $0x150] sm:$0xff]   ;;  %v13313_v9 = vld [vmem:[%s17094_s5 + $0x198] sm:$0xff]  }
 0x482   :  { %11867 = vmatprep.subr.bf16.mxu0 %v13778_v0  ;;  %12347 = vmatprep.subr.bf16.mxu1 %v13778_v0 }
 0x485   :  { %11868 = vmatpush3.bf16.msra.mxu0 %v13265_v61  ;;  %12348 = vmatpush3.bf16.msra.mxu1 %v13266_v23  ;;  %v13314_v61 = vld [vmem:[%s17094_s5 + $0x158] sm:$0xff]   ;;  %v13315_v23 = vld [vmem:[%s17094_s5 + $0x1a0] sm:$0xff]  }
 0x486   :  { %11869 = vmatprep.subr.bf16.mxu0 %v13778_v0  ;;  %12349 = vmatprep.subr.bf16.mxu1 %v13778_v0 }
 0x489   :  { %11870 = vmatpush3.bf16.msra.mxu0 %v13267_v31  ;;  %12350 = vmatpush3.bf16.msra.mxu1 %v13268_v53  ;;  %v13316_v31 = vld [vmem:[%s17094_s5 + $0x160] sm:$0xff]   ;;  %v13317_v53 = vld [vmem:[%s17094_s5 + $0x1a8] sm:$0xff]  }
 0x48a   :  { %11871 = vmatprep.subr.bf16.mxu0 %v13778_v0  ;;  %12351 = vmatprep.subr.bf16.mxu1 %v13778_v0 }
 0x48d   :  { %11872 = vmatpush3.bf16.msra.mxu0 %v13269_v21  ;;  %12352 = vmatpush3.bf16.msra.mxu1 %v13270_v7  ;;  %v13318_v21 = vld [vmem:[%s17094_s5 + $0x168] sm:$0xff]   ;;  %v13319_v7 = vld [vmem:[%s17094_s5 + $0x1b0] sm:$0xff]  }
 0x48e   :  { %11873 = vmatprep.subr.bf16.mxu0 %v13778_v0  ;;  %12353 = vmatprep.subr.bf16.mxu1 %v13778_v0 }
 0x491   :  { %11874 = vmatpush3.bf16.msra.mxu0 %v13271_v51  ;;  %12354 = vmatpush3.bf16.msra.mxu1 %v13272_v6  ;;  %v13320_v51 = vld [vmem:[%s17094_s5 + $0x170] sm:$0xff]   ;;  %v13321_v6 = vld [vmem:[%s17094_s5 + $0x1b8] sm:$0xff]  }
 0x492   :  { %11875 = vmatprep.subr.bf16.mxu0 %v13778_v0  ;;  %12355 = vmatprep.subr.bf16.mxu1 %v13778_v0 }
 0x495   :  { %11876 = vmatpush3.bf16.msra.mxu0 %v13273_v58  ;;  %12356 = vmatpush3.bf16.msra.mxu1 %v13274_v41  ;;  %v13322_v58 = vld [vmem:[%s17094_s5 + $0x178] sm:$0xff]   ;;  %v3308_v41 = vmax.f32 %v15268_v55, 0.0  ;;  %v13325_v55 = vld [vmem:[%s17094_s5 + $0x1c8] sm:$0xff]  }
 0x496   :  { %11881 = vmatprep.subr.bf16.mxu0 %v13778_v0  ;;  %12361 = vmatprep.subr.bf16.mxu1 %v13778_v0 }
 0x498   :  { %11878 = vmatmul.mubr.bf16.vlgmr.msra.gmra.mrb[100].mxu0 %v3652_v12  ;;  %12358 = vmatmul.mubr.bf16.vlgmr.msra.gmra.mrb[212].mxu1 %v6250_v29  ;;  %v15648_v12 = vpack.c.bf16 %v3308_v41, %v3308_v41  ;;  %v3976_v29 = vshrl.u32 %v15575_v47, 16  ;;  %v13372_v41 = vld [vmem:[%s17094_s5 + $0x240] sm:$0xff]  }
 0x499   :  { %11882 = vmatpush3.bf16.msra.mxu0 %v13275_v35  ;;  %12362 = vmatpush3.bf16.msra.mxu1 %v13276_v44  ;;  %v13323_v35 = vld [vmem:[%s17094_s5 + $0x1c0] sm:$0xff]  }
 0x49a   :  { %11883 = vmatprep.subr.bf16.mxu0 %v13778_v0  ;;  %12363 = vmatprep.subr.bf16.mxu1 %v13778_v0  ;;  %v13324_v44 = vld [vmem:[%s17094_s5 + $0x180] sm:$0xff]  }
 0x49b   :  { %11897 = vmatprep.mubr.msk.bf16.mxu0 %vm13779_vm3, %v13778_v0  ;;  %12377 = vmatprep.mubr.msk.bf16.mxu1 %vm13779_vm3, %v13778_v0 }
 0x49d   :  { %11884 = vmatpush3.bf16.msra.mxu0 %v13277_v28  ;;  %12364 = vmatpush3.bf16.msra.mxu1 %v13278_v3  ;;  %v13326_v28 = vld [vmem:[%s17094_s5 + $0x188] sm:$0xff]   ;;  %v13327_v3 = vld [vmem:[%s17094_s5 + $0x1d0] sm:$0xff]  }
 0x49e   :  { %11885 = vmatprep.subr.bf16.mxu0 %v13778_v0  ;;  %12365 = vmatprep.subr.bf16.mxu1 %v13778_v0 }
 0x4a1   :  { %11886 = vmatpush3.bf16.msra.mxu0 %v13279_v13  ;;  %12366 = vmatpush3.bf16.msra.mxu1 %v13280_v34  ;;  %v13328_v13 = vld [vmem:[%s17094_s5 + $0x190] sm:$0xff]   ;;  %v13329_v34 = vld [vmem:[%s17094_s5 + $0x1d8] sm:$0xff]  }
 0x4a2   :  { %11887 = vmatprep.subr.bf16.mxu0 %v13778_v0  ;;  %12367 = vmatprep.subr.bf16.mxu1 %v13778_v0 }
 0x4a5   :  { %11888 = vmatpush3.bf16.msra.mxu0 %v13281_v15  ;;  %12368 = vmatpush3.bf16.msra.mxu1 %v13282_v60  ;;  %v13330_v15 = vld [vmem:[%s17094_s5 + $0x198] sm:$0xff]   ;;  %v13331_v60 = vld [vmem:[%s17094_s5 + $0x1e0] sm:$0xff]  }
 0x4a6   :  { %11889 = vmatprep.subr.bf16.mxu0 %v13778_v0  ;;  %12369 = vmatprep.subr.bf16.mxu1 %v13778_v0 }
 0x4a9   :  { %11890 = vmatpush3.bf16.msra.mxu0 %v13283_v38  ;;  %12370 = vmatpush3.bf16.msra.mxu1 %v13284_v42  ;;  %v13332_v38 = vld [vmem:[%s17094_s5 + $0x1a0] sm:$0xff]   ;;  %v13333_v42 = vld [vmem:[%s17094_s5 + $0x1e8] sm:$0xff]  }
 0x4aa   :  { %11891 = vmatprep.subr.bf16.mxu0 %v13778_v0  ;;  %12371 = vmatprep.subr.bf16.mxu1 %v13778_v0 }
 0x4ad   :  { %11892 = vmatpush3.bf16.msra.mxu0 %v13285_v59  ;;  %12372 = vmatpush3.bf16.msra.mxu1 %v13286_v14  ;;  %v13334_v59 = vld [vmem:[%s17094_s5 + $0x1a8] sm:$0xff]   ;;  %v13335_v14 = vld [vmem:[%s17094_s5 + $0x1f0] sm:$0xff]  }
 0x4ae   :  { %11893 = vmatprep.subr.bf16.mxu0 %v13778_v0  ;;  %12373 = vmatprep.subr.bf16.mxu1 %v13778_v0 }
 0x4b1   :  { %11894 = vmatpush3.bf16.msra.mxu0 %v13287_v4  ;;  %12374 = vmatpush3.bf16.msra.mxu1 %v13288_v19  ;;  %v13336_v4 = vld [vmem:[%s17094_s5 + $0x1b0] sm:$0xff]   ;;  %v13337_v19 = vld [vmem:[%s17094_s5 + $0x1f8] sm:$0xff]  }
 0x4b2   :  { %11895 = vmatprep.subr.bf16.mxu0 %v13778_v0  ;;  %12375 = vmatprep.subr.bf16.mxu1 %v13778_v0 }
 0x4b5   :  { %11896 = vmatpush3.bf16.msra.mxu0 %v13289_v36  ;;  %12376 = vmatpush3.bf16.msra.mxu1 %v13290_v57  ;;  %v13338_v36 = vld [vmem:[%s17094_s5 + $0x1b8] sm:$0xff]   ;;  %v13339_v57 = vld [vmem:[%s17094_s5 + $0x200] sm:$0xff]  }
 0x4b6   :  { %11901 = vmatprep.subr.bf16.mxu0 %v13778_v0  ;;  %12381 = vmatprep.subr.bf16.mxu1 %v13778_v0 }
 0x4b8   :  { %11898 = vmatmul.mubr.bf16.vlgmr.msra.gmra.mrb[100].mxu0 %v3760_v54  ;;  %12378 = vmatmul.mubr.bf16.vlgmr.msra.gmra.mrb[212].mxu1 %v6357_v32  ;;  %v6678_v54 = vshrl.u32 %v15648_v12, 16  ;;  %v13341_v32 = vld [vmem:[%s17094_s5 + $0x208] sm:$0xff]  }
 0x4b9   :  { %11902 = vmatpush3.bf16.msra.mxu0 %v13291_v10  ;;  %12382 = vmatpush3.bf16.msra.mxu1 %v13292_v48  ;;  %v13340_v10 = vld [vmem:[%s17094_s5 + $0x1c0] sm:$0xff]   ;;  %v4086_v48 = vrot.slane %v15575_v47, 1 }
 0x4ba   :  { %11903 = vmatprep.subr.bf16.mxu0 %v13778_v0  ;;  %12383 = vmatprep.subr.bf16.mxu1 %v13778_v0 }
 0x4bb   :  { %11917 = vmatprep.mubr.msk.bf16.mxu0 %vm13779_vm3, %v13778_v0  ;;  %12397 = vmatprep.mubr.msk.bf16.mxu1 %vm13779_vm3, %v13778_v0 }
 0x4bd   :  { %11904 = vmatpush3.bf16.msra.mxu0 %v13293_v20  ;;  %12384 = vmatpush3.bf16.msra.mxu1 %v13294_v62  ;;  %v13342_v20 = vld [vmem:[%s17094_s5 + $0x1c8] sm:$0xff]   ;;  %v13343_v62 = vld [vmem:[%s17094_s5 + $0x210] sm:$0xff]  }
 0x4be   :  { %11905 = vmatprep.subr.bf16.mxu0 %v13778_v0  ;;  %12385 = vmatprep.subr.bf16.mxu1 %v13778_v0 }
 0x4c1   :  { %11906 = vmatpush3.bf16.msra.mxu0 %v13295_v49  ;;  %12386 = vmatpush3.bf16.msra.mxu1 %v13296_v30  ;;  %v13344_v49 = vld [vmem:[%s17094_s5 + $0x1d0] sm:$0xff]   ;;  %v13345_v30 = vld [vmem:[%s17094_s5 + $0x218] sm:$0xff]  }
 0x4c2   :  { %11907 = vmatprep.subr.bf16.mxu0 %v13778_v0  ;;  %12387 = vmatprep.subr.bf16.mxu1 %v13778_v0 }
 0x4c5   :  { %11908 = vmatpush3.bf16.msra.mxu0 %v13297_v46  ;;  %12388 = vmatpush3.bf16.msra.mxu1 %v13298_v22  ;;  %v13346_v46 = vld [vmem:[%s17094_s5 + $0x1d8] sm:$0xff]   ;;  %v13347_v22 = vld [vmem:[%s17094_s5 + $0x220] sm:$0xff]  }
 0x4c6   :  { %11909 = vmatprep.subr.bf16.mxu0 %v13778_v0  ;;  %12389 = vmatprep.subr.bf16.mxu1 %v13778_v0 }
 0x4c9   :  { %11910 = vmatpush3.bf16.msra.mxu0 %v13299_v26  ;;  %12390 = vmatpush3.bf16.msra.mxu1 %v13300_v5  ;;  %v13348_v26 = vld [vmem:[%s17094_s5 + $0x1e0] sm:$0xff]   ;;  %v13349_v5 = vld [vmem:[%s17094_s5 + $0x228] sm:$0xff]  }
 0x4ca   :  { %11911 = vmatprep.subr.bf16.mxu0 %v13778_v0  ;;  %12391 = vmatprep.subr.bf16.mxu1 %v13778_v0 }
 0x4cd   :  { %11912 = vmatpush3.bf16.msra.mxu0 %v13301_v63  ;;  %12392 = vmatpush3.bf16.msra.mxu1 %v13302_v18  ;;  %v13350_v63 = vld [vmem:[%s17094_s5 + $0x1e8] sm:$0xff]   ;;  %v13351_v18 = vld [vmem:[%s17094_s5 + $0x230] sm:$0xff]  }
 0x4ce   :  { %11913 = vmatprep.subr.bf16.mxu0 %v13778_v0  ;;  %12393 = vmatprep.subr.bf16.mxu1 %v13778_v0 }
 0x4d1   :  { %11914 = vmatpush3.bf16.msra.mxu0 %v13303_v16  ;;  %12394 = vmatpush3.bf16.msra.mxu1 %v13304_v2  ;;  %v13352_v16 = vld [vmem:[%s17094_s5 + $0x1f0] sm:$0xff]   ;;  %v13353_v2 = vld [vmem:[%s17094_s5 + $0x238] sm:$0xff]  }
 0x4d2   :  { %11915 = vmatprep.subr.bf16.mxu0 %v13778_v0  ;;  %12395 = vmatprep.subr.bf16.mxu1 %v13778_v0 }
 0x4d5   :  { %11916 = vmatpush3.bf16.msra.mxu0 %v13305_v52  ;;  %12396 = vmatpush3.bf16.msra.mxu1 %v13306_v56  ;;  %v13354_v52 = vld [vmem:[%s17094_s5 + $0x1f8] sm:$0xff]   ;;  %v13355_v56 = vld [vmem:[%s17094_s5 + $0x240] sm:$0xff]  }
 0x4d6   :  { %11921 = vmatprep.subr.bf16.mxu0 %v13778_v0  ;;  %12401 = vmatprep.subr.bf16.mxu1 %v13778_v0 }
 0x4d8   :  { %11918 = vmatmul.mubr.bf16.vlgmr.msra.gmra.mrb[100].mxu0 %v15575_v47  ;;  %12398 = vmatmul.mubr.bf16.vlgmr.msra.gmra.mrb[212].mxu1 %v6464_v45  ;;  %v13357_v45 = vld [vmem:[%s17094_s5 + $0x248] sm:$0xff]  }
 0x4d9   :  { %11922 = vmatpush3.bf16.msra.mxu0 %v13307_v43  ;;  %12402 = vmatpush3.bf16.msra.mxu1 %v13308_v11  ;;  %v4194_v43 = vrot.slane %v3976_v29, 1  ;;  %v6787_v11 = vrot.slane %v15648_v12, 1 }
 0x4da   :  { %11923 = vmatprep.subr.bf16.mxu0 %v13778_v0  ;;  %12403 = vmatprep.subr.bf16.mxu1 %v13778_v0 }
 0x4db   :  { %11937 = vmatprep.mubr.msk.bf16.mxu0 %vm13779_vm3, %v13778_v0  ;;  %12417 = vmatprep.mubr.msk.bf16.mxu1 %vm13779_vm3, %v13778_v0 }
 0x4dd   :  { %11924 = vmatpush3.bf16.msra.mxu0 %v13309_v37  ;;  %12404 = vmatpush3.bf16.msra.mxu1 %v13310_v25  ;;  %v13358_v37 = vld [vmem:[%s17094_s5 + $0x208] sm:$0xff]   ;;  %v13359_v25 = vld [vmem:[%s17094_s5 + $0x250] sm:$0xff]  }
 0x4de   :  { %11925 = vmatprep.subr.bf16.mxu0 %v13778_v0  ;;  %12405 = vmatprep.subr.bf16.mxu1 %v13778_v0 }
 0x4e1   :  { %11926 = vmatpush3.bf16.msra.mxu0 %v13311_v39  ;;  %12406 = vmatpush3.bf16.msra.mxu1 %v13312_v17  ;;  %v13360_v39 = vld [vmem:[%s17094_s5 + $0x210] sm:$0xff]   ;;  %v13361_v17 = vld [vmem:[%s17094_s5 + $0x258] sm:$0xff]  }
 0x4e2   :  { %11927 = vmatprep.subr.bf16.mxu0 %v13778_v0  ;;  %12407 = vmatprep.subr.bf16.mxu1 %v13778_v0 }
 0x4e5   :  { %11928 = vmatpush3.bf16.msra.mxu0 %v13313_v9  ;;  %12408 = vmatpush3.bf16.msra.mxu1 %v13314_v61  ;;  %v13362_v9 = vld [vmem:[%s17094_s5 + $0x218] sm:$0xff]   ;;  %v13363_v61 = vld [vmem:[%s17094_s5 + $0x260] sm:$0xff]  }
 0x4e6   :  { %11929 = vmatprep.subr.bf16.mxu0 %v13778_v0  ;;  %12409 = vmatprep.subr.bf16.mxu1 %v13778_v0 }
 0x4e9   :  { %11930 = vmatpush3.bf16.msra.mxu0 %v13315_v23  ;;  %12410 = vmatpush3.bf16.msra.mxu1 %v13316_v31  ;;  %v13364_v23 = vld [vmem:[%s17094_s5 + $0x220] sm:$0xff]   ;;  %v13365_v31 = vld [vmem:[%s17094_s5 + $0x268] sm:$0xff]  }
 0x4ea   :  { %11931 = vmatprep.subr.bf16.mxu0 %v13778_v0  ;;  %12411 = vmatprep.subr.bf16.mxu1 %v13778_v0 }
 0x4ed   :  { %11932 = vmatpush3.bf16.msra.mxu0 %v13317_v53  ;;  %12412 = vmatpush3.bf16.msra.mxu1 %v13318_v21  ;;  %v13366_v53 = vld [vmem:[%s17094_s5 + $0x228] sm:$0xff]   ;;  %v13367_v21 = vld [vmem:[%s17094_s5 + $0x270] sm:$0xff]  }
 0x4ee   :  { %11933 = vmatprep.subr.bf16.mxu0 %v13778_v0  ;;  %12413 = vmatprep.subr.bf16.mxu1 %v13778_v0 }
 0x4f1   :  { %11934 = vmatpush3.bf16.msra.mxu0 %v13319_v7  ;;  %12414 = vmatpush3.bf16.msra.mxu1 %v13320_v51  ;;  %v13368_v7 = vld [vmem:[%s17094_s5 + $0x230] sm:$0xff]   ;;  %v13369_v51 = vld [vmem:[%s17094_s5 + $0x278] sm:$0xff]  }
 0x4f2   :  { %11935 = vmatprep.subr.bf16.mxu0 %v13778_v0  ;;  %12415 = vmatprep.subr.bf16.mxu1 %v13778_v0 }
 0x4f5   :  { %11936 = vmatpush3.bf16.msra.mxu0 %v13321_v6  ;;  %12416 = vmatpush3.bf16.msra.mxu1 %v13322_v58  ;;  %v13370_v6 = vld [vmem:[%s17094_s5 + $0x238] sm:$0xff]   ;;  %v13371_v58 = vld [vmem:[%s17094_s5 + $0x280] sm:$0xff]  }
 0x4f6   :  { %11941 = vmatprep.subr.bf16.mxu0 %v13778_v0  ;;  %12421 = vmatprep.subr.bf16.mxu1 %v13778_v0 }
 0x4f8   :  { %11938 = vmatmul.mubr.bf16.vlgmr.msra.gmra.mrb[100].mxu0 %v3976_v29  ;;  %12418 = vmatmul.mubr.bf16.vlgmr.msra.gmra.mrb[212].mxu1 %v15648_v12  ;;  %v13373_v29 = vld [vmem:[%s17094_s5 + $0x288] sm:$0xff]  }
 0x4f9   :  { %11942 = vmatpush3.bf16.msra.mxu0 %v13323_v35  ;;  %12422 = vmatpush3.bf16.msra.mxu1 %v13324_v44  ;;  %v4302_v35 = vrot.slane %v15575_v47, 2  ;;  %v6894_v44 = vrot.slane %v6678_v54, 1  ;;  %v13375_v47 = vld [vmem:[%s17094_s5 + $0x290] sm:$0xff]  }
 0x4fa   :  { %11943 = vmatprep.subr.bf16.mxu0 %v13778_v0  ;;  %12423 = vmatprep.subr.bf16.mxu1 %v13778_v0 }
 0x4fb   :  { %11957 = vmatprep.mubr.msk.bf16.mxu0 %vm13779_vm3, %v13778_v0  ;;  %12437 = vmatprep.mubr.msk.bf16.mxu1 %vm13779_vm3, %v13778_v0 }
 0x4fd   :  { %11944 = vmatpush3.bf16.msra.mxu0 %v13325_v55  ;;  %12424 = vmatpush3.bf16.msra.mxu1 %v13326_v28  ;;  %v13374_v55 = vld [vmem:[%s17094_s5 + $0x248] sm:$0xff]   ;;  %v13376_v28 = vld [vmem:[%s17094_s5 + $0x250] sm:$0xff]  }
 0x4fe   :  { %11945 = vmatprep.subr.bf16.mxu0 %v13778_v0  ;;  %12425 = vmatprep.subr.bf16.mxu1 %v13778_v0 }
 0x501   :  { %11946 = vmatpush3.bf16.msra.mxu0 %v13327_v3  ;;  %12426 = vmatpush3.bf16.msra.mxu1 %v13328_v13  ;;  %v13377_v3 = vld [vmem:[%s17094_s5 + $0x298] sm:$0xff]  }
 0x502   :  { %11947 = vmatprep.subr.bf16.mxu0 %v13778_v0  ;;  %12427 = vmatprep.subr.bf16.mxu1 %v13778_v0  ;;  %v13378_v13 = vld [vmem:[%s17094_s5 + $0x258] sm:$0xff]  }
 0x505   :  { %11948 = vmatpush3.bf16.msra.mxu0 %v13329_v34  ;;  %12428 = vmatpush3.bf16.msra.mxu1 %v13330_v15  ;;  %v13379_v34 = vld [vmem:[%s17094_s5 + $0x2a0] sm:$0xff]  }
 0x506   :  { %11949 = vmatprep.subr.bf16.mxu0 %v13778_v0  ;;  %12429 = vmatprep.subr.bf16.mxu1 %v13778_v0  ;;  %v13380_v15 = vld [vmem:[%s17094_s5 + $0x260] sm:$0xff]  }
 0x509   :  { %11950 = vmatpush3.bf16.msra.mxu0 %v13331_v60  ;;  %12430 = vmatpush3.bf16.msra.mxu1 %v13332_v38  ;;  %v13381_v60 = vld [vmem:[%s17094_s5 + $0x2a8] sm:$0xff]  }
 0x50a   :  { %11951 = vmatprep.subr.bf16.mxu0 %v13778_v0  ;;  %12431 = vmatprep.subr.bf16.mxu1 %v13778_v0  ;;  %v13382_v38 = vld [vmem:[%s17094_s5 + $0x268] sm:$0xff]  }
 0x50d   :  { %11952 = vmatpush3.bf16.msra.mxu0 %v13333_v42  ;;  %12432 = vmatpush3.bf16.msra.mxu1 %v13334_v59  ;;  %v13383_v42 = vld [vmem:[%s17094_s5 + $0x2b0] sm:$0xff]  }
 0x50e   :  { %11953 = vmatprep.subr.bf16.mxu0 %v13778_v0  ;;  %12433 = vmatprep.subr.bf16.mxu1 %v13778_v0  ;;  %v13384_v59 = vld [vmem:[%s17094_s5 + $0x270] sm:$0xff]  }
 0x511   :  { %11954 = vmatpush3.bf16.msra.mxu0 %v13335_v14  ;;  %12434 = vmatpush3.bf16.msra.mxu1 %v13336_v4  ;;  %v13385_v14 = vld [vmem:[%s17094_s5 + $0x2b8] sm:$0xff]  }
 0x512   :  { %11955 = vmatprep.subr.bf16.mxu0 %v13778_v0  ;;  %12435 = vmatprep.subr.bf16.mxu1 %v13778_v0  ;;  %v13386_v4 = vld [vmem:[%s17094_s5 + $0x278] sm:$0xff]  }
 0x515   :  { %11956 = vmatpush3.bf16.msra.mxu0 %v13337_v19  ;;  %12436 = vmatpush3.bf16.msra.mxu1 %v13338_v36  ;;  %v3304_v19 = vmax.f32 %v15225_v24, 0.0  ;;  %v13387_v36 = vld [vmem:[%s17094_s5 + $0x2c0] sm:$0xff]   ;;  %v7001_v24 = vrot.slane %v15648_v12, 2  ;;  %v13391_v12 = vld [vmem:[%s17094_s5 + $0x2d0] sm:$0xff]  }
 0x516   :  { %11961 = vmatprep.subr.bf16.mxu0 %v13778_v0  ;;  %12441 = vmatprep.subr.bf16.mxu1 %v13778_v0 }
 0x518   :  { %11958 = vmatmul.mubr.bf16.vlgmr.msra.gmra.mrb[100].mxu0 %v4086_v48  ;;  %12438 = vmatmul.mubr.bf16.vlgmr.msra.gmra.mrb[212].mxu1 %v6678_v54  ;;  %v13389_v48 = vld [vmem:[%s17094_s5 + $0x2c8] sm:$0xff]  }
 0x519   :  { %11962 = vmatpush3.bf16.msra.mxu0 %v13339_v57  ;;  %12442 = vmatpush3.bf16.msra.mxu1 %v13340_v10  ;;  %v13388_v57 = vld [vmem:[%s17094_s5 + $0x280] sm:$0xff]   ;;  %v15937_v10 = vpack.c.bf16 %v3304_v19, %v3304_v19  ;;  %v13390_v54 = vld [vmem:[%s17094_s5 + $0x288] sm:$0xff]  }
 0x51a   :  { %11963 = vmatprep.subr.bf16.mxu0 %v13778_v0  ;;  %12443 = vmatprep.subr.bf16.mxu1 %v13778_v0 }
 0x51b   :  { %11977 = vmatprep.mubr.msk.bf16.mxu0 %vm13779_vm3, %v13778_v0  ;;  %12457 = vmatprep.mubr.msk.bf16.mxu1 %vm13779_vm3, %v13778_v0 }
 0x51d   :  { %11964 = vmatpush3.bf16.msra.mxu0 %v13341_v32  ;;  %12444 = vmatpush3.bf16.msra.mxu1 %v13342_v20  ;;  %v13392_v32 = vld [vmem:[%s17094_s5 + $0x290] sm:$0xff]   ;;  %v13393_v20 = vld [vmem:[%s17094_s5 + $0x2d8] sm:$0xff]  }
 0x51e   :  { %11965 = vmatprep.subr.bf16.mxu0 %v13778_v0  ;;  %12445 = vmatprep.subr.bf16.mxu1 %v13778_v0 }
 0x521   :  { %11966 = vmatpush3.bf16.msra.mxu0 %v13343_v62  ;;  %12446 = vmatpush3.bf16.msra.mxu1 %v13344_v49  ;;  %v13394_v62 = vld [vmem:[%s17094_s5 + $0x298] sm:$0xff]   ;;  %v13395_v49 = vld [vmem:[%s17094_s5 + $0x2e0] sm:$0xff]  }
 0x522   :  { %11967 = vmatprep.subr.bf16.mxu0 %v13778_v0  ;;  %12447 = vmatprep.subr.bf16.mxu1 %v13778_v0 }
 0x525   :  { %11968 = vmatpush3.bf16.msra.mxu0 %v13345_v30  ;;  %12448 = vmatpush3.bf16.msra.mxu1 %v13346_v46  ;;  %v13396_v30 = vld [vmem:[%s17094_s5 + $0x2a0] sm:$0xff]   ;;  %v13397_v46 = vld [vmem:[%s17094_s5 + $0x2e8] sm:$0xff]  }
 0x526   :  { %11969 = vmatprep.subr.bf16.mxu0 %v13778_v0  ;;  %12449 = vmatprep.subr.bf16.mxu1 %v13778_v0 }
 0x529   :  { %11970 = vmatpush3.bf16.msra.mxu0 %v13347_v22  ;;  %12450 = vmatpush3.bf16.msra.mxu1 %v13348_v26  ;;  %v13398_v22 = vld [vmem:[%s17094_s5 + $0x2a8] sm:$0xff]   ;;  %v13399_v26 = vld [vmem:[%s17094_s5 + $0x2f0] sm:$0xff]  }
 0x52a   :  { %11971 = vmatprep.subr.bf16.mxu0 %v13778_v0  ;;  %12451 = vmatprep.subr.bf16.mxu1 %v13778_v0 }
 0x52d   :  { %11972 = vmatpush3.bf16.msra.mxu0 %v13349_v5  ;;  %12452 = vmatpush3.bf16.msra.mxu1 %v13350_v63  ;;  %v13400_v5 = vld [vmem:[%s17094_s5 + $0x2b0] sm:$0xff]   ;;  %v13401_v63 = vld [vmem:[%s17094_s5 + $0x2f8] sm:$0xff]  }
 0x52e   :  { %11973 = vmatprep.subr.bf16.mxu0 %v13778_v0  ;;  %12453 = vmatprep.subr.bf16.mxu1 %v13778_v0 }
 0x531   :  { %11974 = vmatpush3.bf16.msra.mxu0 %v13351_v18  ;;  %12454 = vmatpush3.bf16.msra.mxu1 %v13352_v16  ;;  %v13402_v18 = vld [vmem:[%s17094_s5 + $0x2b8] sm:$0xff]   ;;  %v3309_v16 = vmax.f32 %v15283_v8, 0.0  ;;  %v13405_v8 = vld [vmem:[%s17094_s5 + $0x308] sm:$0xff]  }
 0x532   :  { %11975 = vmatprep.subr.bf16.mxu0 %v13778_v0  ;;  %12455 = vmatprep.subr.bf16.mxu1 %v13778_v0 }
 0x535   :  { %11976 = vmatpush3.bf16.msra.mxu0 %v13353_v2  ;;  %12456 = vmatpush3.bf16.msra.mxu1 %v13354_v52  ;;  %v13403_v2 = vld [vmem:[%s17094_s5 + $0x300] sm:$0xff]  }
 0x536   :  { %11981 = vmatprep.subr.bf16.mxu0 %v13778_v0  ;;  %12461 = vmatprep.subr.bf16.mxu1 %v13778_v0  ;;  %v13404_v52 = vld [vmem:[%s17094_s5 + $0x2c0] sm:$0xff]  }
 0x538   :  { %11978 = vmatmul.mubr.bf16.vlgmr.msra.gmra.mrb[100].mxu0 %v4194_v43  ;;  %12458 = vmatmul.mubr.bf16.vlgmr.msra.gmra.mrb[212].mxu1 %v6787_v11  ;;  %v13406_v43 = vld [vmem:[%s17094_s5 + $0x2c8] sm:$0xff]   ;;  %v13407_v11 = vld [vmem:[%s17094_s5 + $0x310] sm:$0xff]  }
 0x539   :  { %11982 = vmatpush3.bf16.msra.mxu0 %v13355_v56  ;;  %12462 = vmatpush3.bf16.msra.mxu1 %v13356_v27  ;;  %v16010_v56 = vpack.c.bf16 %v3309_v16, %v3309_v16  ;;  %v4518_v27 = vshrl.u32 %v15937_v10, 16 }
 0x53a   :  { %11983 = vmatprep.subr.bf16.mxu0 %v13778_v0  ;;  %12463 = vmatprep.subr.bf16.mxu1 %v13778_v0 }
 0x53b   :  { %11997 = vmatprep.mubr.msk.bf16.mxu0 %vm13779_vm3, %v13778_v0  ;;  %12477 = vmatprep.mubr.msk.bf16.mxu1 %vm13779_vm3, %v13778_v0  ;;  %v7324_v19 = vrot.slane %v16010_v56, 1 }
 0x53d   :  { %11984 = vmatpush3.bf16.msra.mxu0 %v13357_v45  ;;  %12464 = vmatpush3.bf16.msra.mxu1 %v13358_v37  ;;  %v13408_v45 = vld [vmem:[%s17094_s5 + $0x2d0] sm:$0xff]   ;;  %v13409_v37 = vld [vmem:[%s17094_s5 + $0x318] sm:$0xff]  }
 0x53e   :  { %11985 = vmatprep.subr.bf16.mxu0 %v13778_v0  ;;  %12465 = vmatprep.subr.bf16.mxu1 %v13778_v0 }
 0x541   :  { %11986 = vmatpush3.bf16.msra.mxu0 %v13359_v25  ;;  %12466 = vmatpush3.bf16.msra.mxu1 %v13360_v39  ;;  %v13410_v25 = vld [vmem:[%s17094_s5 + $0x2d8] sm:$0xff]   ;;  %v13411_v39 = vld [vmem:[%s17094_s5 + $0x320] sm:$0xff]  }
 0x542   :  { %11987 = vmatprep.subr.bf16.mxu0 %v13778_v0  ;;  %12467 = vmatprep.subr.bf16.mxu1 %v13778_v0 }
 0x545   :  { %11988 = vmatpush3.bf16.msra.mxu0 %v13361_v17  ;;  %12468 = vmatpush3.bf16.msra.mxu1 %v13362_v9  ;;  %v13412_v17 = vld [vmem:[%s17094_s5 + $0x2e0] sm:$0xff]   ;;  %v13413_v9 = vld [vmem:[%s17094_s5 + $0x328] sm:$0xff]  }
 0x546   :  { %11989 = vmatprep.subr.bf16.mxu0 %v13778_v0  ;;  %12469 = vmatprep.subr.bf16.mxu1 %v13778_v0 }
 0x549   :  { %11990 = vmatpush3.bf16.msra.mxu0 %v13363_v61  ;;  %12470 = vmatpush3.bf16.msra.mxu1 %v13364_v23  ;;  %v13414_v61 = vld [vmem:[%s17094_s5 + $0x2e8] sm:$0xff]   ;;  %v13415_v23 = vld [vmem:[%s17094_s5 + $0x330] sm:$0xff]  }
 0x54a   :  { %11991 = vmatprep.subr.bf16.mxu0 %v13778_v0  ;;  %12471 = vmatprep.subr.bf16.mxu1 %v13778_v0 }
 0x54d   :  { %11992 = vmatpush3.bf16.msra.mxu0 %v13365_v31  ;;  %12472 = vmatpush3.bf16.msra.mxu1 %v13366_v53  ;;  %v13416_v31 = vld [vmem:[%s17094_s5 + $0x2f0] sm:$0xff]   ;;  %v13417_v53 = vld [vmem:[%s17094_s5 + $0x338] sm:$0xff]  }
 0x54e   :  { %11993 = vmatprep.subr.bf16.mxu0 %v13778_v0  ;;  %12473 = vmatprep.subr.bf16.mxu1 %v13778_v0 }
 0x551   :  { %11994 = vmatpush3.bf16.msra.mxu0 %v13367_v21  ;;  %12474 = vmatpush3.bf16.msra.mxu1 %v13368_v7  ;;  %v13418_v21 = vld [vmem:[%s17094_s5 + $0x2f8] sm:$0xff]   ;;  %v13419_v7 = vld [vmem:[%s17094_s5 + $0x340] sm:$0xff]  }
 0x552   :  { %11995 = vmatprep.subr.bf16.mxu0 %v13778_v0  ;;  %12475 = vmatprep.subr.bf16.mxu1 %v13778_v0 }
 0x555   :  { %11996 = vmatpush3.bf16.msra.mxu0 %v13369_v51  ;;  %12476 = vmatpush3.bf16.msra.mxu1 %v13370_v6  ;;  %v13420_v51 = vld [vmem:[%s17094_s5 + $0x300] sm:$0xff]   ;;  %v4628_v6 = vrot.slane %v15937_v10, 1 }
 0x556   :  { %12001 = vmatprep.subr.bf16.mxu0 %v13778_v0  ;;  %12481 = vmatprep.subr.bf16.mxu1 %v13778_v0 }
 0x558   :  { %11998 = vmatmul.mubr.bf16.vlgmr.msra.gmra.mrb[100].mxu0 %v4302_v35  ;;  %12478 = vmatmul.mubr.bf16.vlgmr.msra.gmra.mrb[212].mxu1 %v6894_v44  ;;  %v13422_v35 = vld [vmem:[%s17094_s5 + $0x308] sm:$0xff]   ;;  %v13423_v44 = vld [vmem:[%s17094_s5 + $0x350] sm:$0xff]  }
 0x559   :  { %12002 = vmatpush3.bf16.msra.mxu0 %v13371_v58  ;;  %12482 = vmatpush3.bf16.msra.mxu1 %v13372_v41  ;;  %v7215_v58 = vshrl.u32 %v16010_v56, 16  ;;  %v13421_v41 = vld [vmem:[%s17094_s5 + $0x348] sm:$0xff]  }
 0x55a   :  { %12003 = vmatprep.subr.bf16.mxu0 %v13778_v0  ;;  %12483 = vmatprep.subr.bf16.mxu1 %v13778_v0 }
 0x55b   :  { %12017 = vmatprep.mubr.msk.bf16.mxu0 %vm13779_vm3, %v13778_v0  ;;  %12497 = vmatprep.mubr.msk.bf16.mxu1 %vm13779_vm3, %v13778_v0  ;;  %v7431_v16 = vrot.slane %v7215_v58, 1 }
 0x55d   :  { %12004 = vmatpush3.bf16.msra.mxu0 %v13373_v29  ;;  %12484 = vmatpush3.bf16.msra.mxu1 %v13374_v55  ;;  %v13424_v29 = vld [vmem:[%s17094_s5 + $0x310] sm:$0xff]   ;;  %v13425_v55 = vld [vmem:[%s17094_s5 + $0x358] sm:$0xff]  }
 0x55e   :  { %12005 = vmatprep.subr.bf16.mxu0 %v13778_v0  ;;  %12485 = vmatprep.subr.bf16.mxu1 %v13778_v0 }
 0x561   :  { %12006 = vmatpush3.bf16.msra.mxu0 %v13375_v47  ;;  %12486 = vmatpush3.bf16.msra.mxu1 %v13376_v28  ;;  %v13426_v47 = vld [vmem:[%s17094_s5 + $0x318] sm:$0xff]   ;;  %v13427_v28 = vld [vmem:[%s17094_s5 + $0x360] sm:$0xff]  }
 0x562   :  { %12007 = vmatprep.subr.bf16.mxu0 %v13778_v0  ;;  %12487 = vmatprep.subr.bf16.mxu1 %v13778_v0 }
 0x565   :  { %12008 = vmatpush3.bf16.msra.mxu0 %v13377_v3  ;;  %12488 = vmatpush3.bf16.msra.mxu1 %v13378_v13  ;;  %v13428_v3 = vld [vmem:[%s17094_s5 + $0x320] sm:$0xff]   ;;  %v13429_v13 = vld [vmem:[%s17094_s5 + $0x368] sm:$0xff]  }
 0x566   :  { %12009 = vmatprep.subr.bf16.mxu0 %v13778_v0  ;;  %12489 = vmatprep.subr.bf16.mxu1 %v13778_v0 }
 0x569   :  { %12010 = vmatpush3.bf16.msra.mxu0 %v13379_v34  ;;  %12490 = vmatpush3.bf16.msra.mxu1 %v13380_v15  ;;  %v13430_v34 = vld [vmem:[%s17094_s5 + $0x328] sm:$0xff]   ;;  %v13431_v15 = vld [vmem:[%s17094_s5 + $0x370] sm:$0xff]  }
 0x56a   :  { %12011 = vmatprep.subr.bf16.mxu0 %v13778_v0  ;;  %12491 = vmatprep.subr.bf16.mxu1 %v13778_v0 }
 0x56d   :  { %12012 = vmatpush3.bf16.msra.mxu0 %v13381_v60  ;;  %12492 = vmatpush3.bf16.msra.mxu1 %v13382_v38  ;;  %v13432_v60 = vld [vmem:[%s17094_s5 + $0x330] sm:$0xff]   ;;  %v13433_v38 = vld [vmem:[%s17094_s5 + $0x378] sm:$0xff]  }
 0x56e   :  { %12013 = vmatprep.subr.bf16.mxu0 %v13778_v0  ;;  %12493 = vmatprep.subr.bf16.mxu1 %v13778_v0 }
 0x571   :  { %12014 = vmatpush3.bf16.msra.mxu0 %v13383_v42  ;;  %12494 = vmatpush3.bf16.msra.mxu1 %v13384_v59  ;;  %v13434_v42 = vld [vmem:[%s17094_s5 + $0x338] sm:$0xff]   ;;  %v13435_v59 = vld [vmem:[%s17094_s5 + $0x380] sm:$0xff]  }
 0x572   :  { %12015 = vmatprep.subr.bf16.mxu0 %v13778_v0  ;;  %12495 = vmatprep.subr.bf16.mxu1 %v13778_v0 }
 0x575   :  { %12016 = vmatpush3.bf16.msra.mxu0 %v13385_v14  ;;  %12496 = vmatpush3.bf16.msra.mxu1 %v13386_v4  ;;  %v13436_v14 = vld [vmem:[%s17094_s5 + $0x340] sm:$0xff]   ;;  %v4736_v4 = vrot.slane %v4518_v27, 1 }
 0x576   :  { %12021 = vmatprep.subr.bf16.mxu0 %v13778_v0  ;;  %12501 = vmatprep.subr.bf16.mxu1 %v13778_v0 }
 0x578   :  { %12018 = vmatmul.mubr.bf16.vlgmr.msra.gmra.mrb[100].mxu0 %v15937_v10  ;;  %12498 = vmatmul.mubr.bf16.vlgmr.msra.gmra.mrb[212].mxu1 %v7001_v24  ;;  %v13439_v24 = vld [vmem:[%s17094_s5 + $0x390] sm:$0xff]  }
 0x579   :  { %12022 = vmatpush3.bf16.msra.mxu0 %v13387_v36  ;;  %12502 = vmatpush3.bf16.msra.mxu1 %v13388_v57  ;;  %v13437_v36 = vld [vmem:[%s17094_s5 + $0x388] sm:$0xff]  }
 0x57a   :  { %12023 = vmatprep.subr.bf16.mxu0 %v13778_v0  ;;  %12503 = vmatprep.subr.bf16.mxu1 %v13778_v0  ;;  %v13438_v57 = vld [vmem:[%s17094_s5 + $0x348] sm:$0xff]  }
 0x57b   :  { %12037 = vmatprep.mubr.msk.bf16.mxu0 %vm13779_vm3, %v13778_v0  ;;  %12517 = vmatprep.mubr.msk.bf16.mxu1 %vm13779_vm3, %v13778_v0 }
 0x57d   :  { %12024 = vmatpush3.bf16.msra.mxu0 %v13389_v48  ;;  %12504 = vmatpush3.bf16.msra.mxu1 %v13390_v54  ;;  %v13440_v48 = vld [vmem:[%s17094_s5 + $0x350] sm:$0xff]   ;;  %v13441_v54 = vld [vmem:[%s17094_s5 + $0x398] sm:$0xff]  }
 0x57e   :  { %12025 = vmatprep.subr.bf16.mxu0 %v13778_v0  ;;  %12505 = vmatprep.subr.bf16.mxu1 %v13778_v0 }
 0x581   :  { %12026 = vmatpush3.bf16.msra.mxu0 %v13391_v12  ;;  %12506 = vmatpush3.bf16.msra.mxu1 %v13392_v32  ;;  %v13442_v12 = vld [vmem:[%s17094_s5 + $0x358] sm:$0xff]   ;;  %v13443_v32 = vld [vmem:[%s17094_s5 + $0x3a0] sm:$0xff]  }
 0x582   :  { %12027 = vmatprep.subr.bf16.mxu0 %v13778_v0  ;;  %12507 = vmatprep.subr.bf16.mxu1 %v13778_v0 }
 0x585   :  { %12028 = vmatpush3.bf16.msra.mxu0 %v13393_v20  ;;  %12508 = vmatpush3.bf16.msra.mxu1 %v13394_v62  ;;  %v13444_v20 = vld [vmem:[%s17094_s5 + $0x360] sm:$0xff]   ;;  %v13445_v62 = vld [vmem:[%s17094_s5 + $0x3a8] sm:$0xff]  }
 0x586   :  { %12029 = vmatprep.subr.bf16.mxu0 %v13778_v0  ;;  %12509 = vmatprep.subr.bf16.mxu1 %v13778_v0 }
 0x589   :  { %12030 = vmatpush3.bf16.msra.mxu0 %v13395_v49  ;;  %12510 = vmatpush3.bf16.msra.mxu1 %v13396_v30  ;;  %v13446_v49 = vld [vmem:[%s17094_s5 + $0x368] sm:$0xff]   ;;  %v13447_v30 = vld [vmem:[%s17094_s5 + $0x3b0] sm:$0xff]  }
 0x58a   :  { %12031 = vmatprep.subr.bf16.mxu0 %v13778_v0  ;;  %12511 = vmatprep.subr.bf16.mxu1 %v13778_v0 }
 0x58d   :  { %12032 = vmatpush3.bf16.msra.mxu0 %v13397_v46  ;;  %12512 = vmatpush3.bf16.msra.mxu1 %v13398_v22  ;;  %v13448_v46 = vld [vmem:[%s17094_s5 + $0x370] sm:$0xff]   ;;  %v13449_v22 = vld [vmem:[%s17094_s5 + $0x3b8] sm:$0xff]  }
 0x58e   :  { %12033 = vmatprep.subr.bf16.mxu0 %v13778_v0  ;;  %12513 = vmatprep.subr.bf16.mxu1 %v13778_v0 }
 0x591   :  { %12034 = vmatpush3.bf16.msra.mxu0 %v13399_v26  ;;  %12514 = vmatpush3.bf16.msra.mxu1 %v13400_v5  ;;  %v13450_v26 = vld [vmem:[%s17094_s5 + $0x378] sm:$0xff]   ;;  %v13451_v5 = vld [vmem:[%s17094_s5 + $0x3c0] sm:$0xff]  }
 0x592   :  { %12035 = vmatprep.subr.bf16.mxu0 %v13778_v0  ;;  %12515 = vmatprep.subr.bf16.mxu1 %v13778_v0 }
 0x595   :  { %12036 = vmatpush3.bf16.msra.mxu0 %v13401_v63  ;;  %12516 = vmatpush3.bf16.msra.mxu1 %v13402_v18  ;;  %v13452_v63 = vld [vmem:[%s17094_s5 + $0x380] sm:$0xff]   ;;  %v4844_v18 = vrot.slane %v15937_v10, 2  ;;  %v13455_v10 = vld [vmem:[%s17094_s5 + $0x3d0] sm:$0xff]  }
 0x596   :  { %12041 = vmatprep.subr.bf16.mxu0 %v13778_v0  ;;  %12521 = vmatprep.subr.bf16.mxu1 %v13778_v0 }
 0x598   :  { %12038 = vmatmul.mubr.bf16.vlgmr.msra.gmra.mrb[100].mxu0 %v4518_v27  ;;  %12518 = vmatmul.mubr.bf16.vlgmr.msra.gmra.mrb[212].mxu1 %v16010_v56  ;;  %v13456_v27 = vld [vmem:[%s17094_s5 + $0x390] sm:$0xff]  }
 0x599   :  { %12042 = vmatpush3.bf16.msra.mxu0 %v13403_v2  ;;  %12522 = vmatpush3.bf16.msra.mxu1 %v13404_v52  ;;  %v13453_v2 = vld [vmem:[%s17094_s5 + $0x3c8] sm:$0xff]  }
 0x59a   :  { %12043 = vmatprep.subr.bf16.mxu0 %v13778_v0  ;;  %12523 = vmatprep.subr.bf16.mxu1 %v13778_v0  ;;  %v13454_v52 = vld [vmem:[%s17094_s5 + $0x388] sm:$0xff]  }
 0x59b   :  { %12057 = vmatprep.mubr.msk.bf16.mxu0 %vm13779_vm3, %v13778_v0  ;;  %12537 = vmatprep.mubr.msk.bf16.mxu1 %vm13779_vm3, %v13778_v0 }
 0x59d   :  { %12044 = vmatpush3.bf16.msra.mxu0 %v13405_v8  ;;  %12524 = vmatpush3.bf16.msra.mxu1 %v13406_v43  ;;  %v13457_v8 = vld [vmem:[%s17094_s5 + $0x3d8] sm:$0xff]  }
 0x59e   :  { %12045 = vmatprep.subr.bf16.mxu0 %v13778_v0  ;;  %12525 = vmatprep.subr.bf16.mxu1 %v13778_v0  ;;  %v13458_v43 = vld [vmem:[%s17094_s5 + $0x398] sm:$0xff]  }
 0x5a1   :  { %12046 = vmatpush3.bf16.msra.mxu0 %v13407_v11  ;;  %12526 = vmatpush3.bf16.msra.mxu1 %v13408_v45  ;;  %v13459_v11 = vld [vmem:[%s17094_s5 + $0x3e0] sm:$0xff]  }
 0x5a2   :  { %12047 = vmatprep.subr.bf16.mxu0 %v13778_v0  ;;  %12527 = vmatprep.subr.bf16.mxu1 %v13778_v0  ;;  %v13460_v45 = vld [vmem:[%s17094_s5 + $0x3a0] sm:$0xff]  }
 0x5a5   :  { %12048 = vmatpush3.bf16.msra.mxu0 %v13409_v37  ;;  %12528 = vmatpush3.bf16.msra.mxu1 %v13410_v25  ;;  %v13461_v37 = vld [vmem:[%s17094_s5 + $0x3e8] sm:$0xff]  }
 0x5a6   :  { %12049 = vmatprep.subr.bf16.mxu0 %v13778_v0  ;;  %12529 = vmatprep.subr.bf16.mxu1 %v13778_v0  ;;  %v13462_v25 = vld [vmem:[%s17094_s5 + $0x3a8] sm:$0xff]  }
 0x5a9   :  { %12050 = vmatpush3.bf16.msra.mxu0 %v13411_v39  ;;  %12530 = vmatpush3.bf16.msra.mxu1 %v13412_v17  ;;  %v13463_v39 = vld [vmem:[%s17094_s5 + $0x3f0] sm:$0xff]  }
 0x5aa   :  { %12051 = vmatprep.subr.bf16.mxu0 %v13778_v0  ;;  %12531 = vmatprep.subr.bf16.mxu1 %v13778_v0  ;;  %v13464_v17 = vld [vmem:[%s17094_s5 + $0x3b0] sm:$0xff]  }
 0x5ad   :  { %12052 = vmatpush3.bf16.msra.mxu0 %v13413_v9  ;;  %12532 = vmatpush3.bf16.msra.mxu1 %v13414_v61  ;;  %v13465_v9 = vld [vmem:[%s17094_s5 + $0x3f8] sm:$0xff]  }
 0x5ae   :  { %12053 = vmatprep.subr.bf16.mxu0 %v13778_v0  ;;  %12533 = vmatprep.subr.bf16.mxu1 %v13778_v0  ;;  %v13466_v61 = vld [vmem:[%s17094_s5 + $0x3b8] sm:$0xff]  }
 0x5b1   :  { %12054 = vmatpush3.bf16.msra.mxu0 %v13415_v23  ;;  %12534 = vmatpush3.bf16.msra.mxu1 %v13416_v31  ;;  %v3305_v23 = vmax.f32 %v15235_v33, 0.0  ;;  %v13467_v31 = vld [vmem:[%s17094_s5 + $0x400] sm:$0xff]   ;;  %v7538_v33 = vrot.slane %v16010_v56, 2  ;;  %v13471_v56 = vld [vmem:[%s17094_s5 + $0x410] sm:$0xff]  }
 0x5b2   :  { %12055 = vmatprep.subr.bf16.mxu0 %v13778_v0  ;;  %12535 = vmatprep.subr.bf16.mxu1 %v13778_v0 }
 0x5b5   :  { %12056 = vmatpush3.bf16.msra.mxu0 %v13417_v53  ;;  %12536 = vmatpush3.bf16.msra.mxu1 %v13418_v21  ;;  %v13468_v53 = vld [vmem:[%s17094_s5 + $0x3c0] sm:$0xff]   ;;  %v16299_v21 = vpack.c.bf16 %v3305_v23, %v3305_v23  ;;  %v13518_v23 = vld [vmem:[%s17094_s5 + $0x488] sm:$0xff]  }
 0x5b6   :  { %12061 = vmatprep.subr.bf16.mxu0 %v13778_v0  ;;  %12541 = vmatprep.subr.bf16.mxu1 %v13778_v0 }
 0x5b8   :  { %12058 = vmatmul.mubr.bf16.vlgmr.msra.gmra.mrb[100].mxu0 %v4628_v6  ;;  %12538 = vmatmul.mubr.bf16.vlgmr.msra.gmra.mrb[212].mxu1 %v7215_v58  ;;  %v13472_v6 = vld [vmem:[%s17094_s5 + $0x3d0] sm:$0xff]   ;;  %v13473_v58 = vld [vmem:[%s17094_s5 + $0x418] sm:$0xff]  }
 0x5b9   :  { %12062 = vmatpush3.bf16.msra.mxu0 %v13419_v7  ;;  %12542 = vmatpush3.bf16.msra.mxu1 %v13420_v51  ;;  %v13469_v7 = vld [vmem:[%s17094_s5 + $0x408] sm:$0xff]  }
 0x5ba   :  { %12063 = vmatprep.subr.bf16.mxu0 %v13778_v0  ;;  %12543 = vmatprep.subr.bf16.mxu1 %v13778_v0  ;;  %v13470_v51 = vld [vmem:[%s17094_s5 + $0x3c8] sm:$0xff]  }
 0x5bb   :  { %12077 = vmatprep.mubr.msk.bf16.mxu0 %vm13779_vm3, %v13778_v0  ;;  %12557 = vmatprep.mubr.msk.bf16.mxu1 %vm13779_vm3, %v13778_v0 }
 0x5bd   :  { %12064 = vmatpush3.bf16.msra.mxu0 %v13421_v41  ;;  %12544 = vmatpush3.bf16.msra.mxu1 %v13422_v35  ;;  %v13474_v41 = vld [vmem:[%s17094_s5 + $0x3d8] sm:$0xff]   ;;  %v13475_v35 = vld [vmem:[%s17094_s5 + $0x420] sm:$0xff]  }
 0x5be   :  { %12065 = vmatprep.subr.bf16.mxu0 %v13778_v0  ;;  %12545 = vmatprep.subr.bf16.mxu1 %v13778_v0 }
 0x5c1   :  { %12066 = vmatpush3.bf16.msra.mxu0 %v13423_v44  ;;  %12546 = vmatpush3.bf16.msra.mxu1 %v13424_v29  ;;  %v13476_v44 = vld [vmem:[%s17094_s5 + $0x3e0] sm:$0xff]   ;;  %v13477_v29 = vld [vmem:[%s17094_s5 + $0x428] sm:$0xff]  }
 0x5c2   :  { %12067 = vmatprep.subr.bf16.mxu0 %v13778_v0  ;;  %12547 = vmatprep.subr.bf16.mxu1 %v13778_v0 }
 0x5c5   :  { %12068 = vmatpush3.bf16.msra.mxu0 %v13425_v55  ;;  %12548 = vmatpush3.bf16.msra.mxu1 %v13426_v47  ;;  %v13478_v55 = vld [vmem:[%s17094_s5 + $0x3e8] sm:$0xff]   ;;  %v13479_v47 = vld [vmem:[%s17094_s5 + $0x430] sm:$0xff]  }
 0x5c6   :  { %12069 = vmatprep.subr.bf16.mxu0 %v13778_v0  ;;  %12549 = vmatprep.subr.bf16.mxu1 %v13778_v0 }
 0x5c9   :  { %12070 = vmatpush3.bf16.msra.mxu0 %v13427_v28  ;;  %12550 = vmatpush3.bf16.msra.mxu1 %v13428_v3  ;;  %v13480_v28 = vld [vmem:[%s17094_s5 + $0x3f0] sm:$0xff]   ;;  %v13481_v3 = vld [vmem:[%s17094_s5 + $0x438] sm:$0xff]  }
 0x5ca   :  { %12071 = vmatprep.subr.bf16.mxu0 %v13778_v0  ;;  %12551 = vmatprep.subr.bf16.mxu1 %v13778_v0 }
 0x5cd   :  { %12072 = vmatpush3.bf16.msra.mxu0 %v13429_v13  ;;  %12552 = vmatpush3.bf16.msra.mxu1 %v13430_v34  ;;  %v13482_v13 = vld [vmem:[%s17094_s5 + $0x3f8] sm:$0xff]   ;;  %v3310_v34 = vmax.f32 %v15296_v50, 0.0  ;;  %v13485_v50 = vld [vmem:[%s17094_s5 + $0x448] sm:$0xff]  }
 0x5ce   :  { %12073 = vmatprep.subr.bf16.mxu0 %v13778_v0  ;;  %12553 = vmatprep.subr.bf16.mxu1 %v13778_v0 }
 0x5d1   :  { %12074 = vmatpush3.bf16.msra.mxu0 %v13431_v15  ;;  %12554 = vmatpush3.bf16.msra.mxu1 %v13432_v60  ;;  %v13483_v15 = vld [vmem:[%s17094_s5 + $0x440] sm:$0xff]  }
 0x5d2   :  { %12075 = vmatprep.subr.bf16.mxu0 %v13778_v0  ;;  %12555 = vmatprep.subr.bf16.mxu1 %v13778_v0  ;;  %v13484_v60 = vld [vmem:[%s17094_s5 + $0x400] sm:$0xff]  }
 0x5d5   :  { %12076 = vmatpush3.bf16.msra.mxu0 %v13433_v38  ;;  %12556 = vmatpush3.bf16.msra.mxu1 %v13434_v42  ;;  %v16372_v38 = vpack.c.bf16 %v3310_v34, %v3310_v34  ;;  %v5060_v42 = vshrl.u32 %v16299_v21, 16  ;;  %v13534_v34 = vld [vmem:[%s17094_s5 + $0x4c8] sm:$0xff]  }
 0x5d6   :  { %12081 = vmatprep.subr.bf16.mxu0 %v13778_v0  ;;  %12561 = vmatprep.subr.bf16.mxu1 %v13778_v0 }
 0x5d8   :  { %12078 = vmatmul.mubr.bf16.vlgmr.msra.gmra.mrb[100].mxu0 %v4736_v4  ;;  %12558 = vmatmul.mubr.bf16.vlgmr.msra.gmra.mrb[212].mxu1 %v7324_v19  ;;  %v13488_v4 = vld [vmem:[%s17094_s5 + $0x410] sm:$0xff]   ;;  %v13489_v19 = vld [vmem:[%s17094_s5 + $0x458] sm:$0xff]  }
 0x5d9   :  { %12082 = vmatpush3.bf16.msra.mxu0 %v13435_v59  ;;  %12562 = vmatpush3.bf16.msra.mxu1 %v13436_v14  ;;  %v13486_v59 = vld [vmem:[%s17094_s5 + $0x408] sm:$0xff]   ;;  %v13487_v14 = vld [vmem:[%s17094_s5 + $0x450] sm:$0xff]  }
 0x5da   :  { %12083 = vmatprep.subr.bf16.mxu0 %v13778_v0  ;;  %12563 = vmatprep.subr.bf16.mxu1 %v13778_v0 }
 0x5db   :  { %12097 = vmatprep.mubr.msk.bf16.mxu0 %vm13779_vm3, %v13778_v0  ;;  %12577 = vmatprep.mubr.msk.bf16.mxu1 %vm13779_vm3, %v13778_v0 }
 0x5dd   :  { %12084 = vmatpush3.bf16.msra.mxu0 %v13437_v36  ;;  %12564 = vmatpush3.bf16.msra.mxu1 %v13438_v57  ;;  %v13490_v36 = vld [vmem:[%s17094_s5 + $0x418] sm:$0xff]   ;;  %v13491_v57 = vld [vmem:[%s17094_s5 + $0x460] sm:$0xff]  }
 0x5de   :  { %12085 = vmatprep.subr.bf16.mxu0 %v13778_v0  ;;  %12565 = vmatprep.subr.bf16.mxu1 %v13778_v0 }
 0x5e1   :  { %12086 = vmatpush3.bf16.msra.mxu0 %v13439_v24  ;;  %12566 = vmatpush3.bf16.msra.mxu1 %v13440_v48  ;;  %v13492_v24 = vld [vmem:[%s17094_s5 + $0x420] sm:$0xff]   ;;  %v13493_v48 = vld [vmem:[%s17094_s5 + $0x468] sm:$0xff]  }
 0x5e2   :  { %12087 = vmatprep.subr.bf16.mxu0 %v13778_v0  ;;  %12567 = vmatprep.subr.bf16.mxu1 %v13778_v0 }
 0x5e5   :  { %12088 = vmatpush3.bf16.msra.mxu0 %v13441_v54  ;;  %12568 = vmatpush3.bf16.msra.mxu1 %v13442_v12  ;;  %v13494_v54 = vld [vmem:[%s17094_s5 + $0x428] sm:$0xff]   ;;  %v13495_v12 = vld [vmem:[%s17094_s5 + $0x470] sm:$0xff]  }
 0x5e6   :  { %12089 = vmatprep.subr.bf16.mxu0 %v13778_v0  ;;  %12569 = vmatprep.subr.bf16.mxu1 %v13778_v0 }
 0x5e9   :  { %12090 = vmatpush3.bf16.msra.mxu0 %v13443_v32  ;;  %12570 = vmatpush3.bf16.msra.mxu1 %v13444_v20  ;;  %v13496_v32 = vld [vmem:[%s17094_s5 + $0x430] sm:$0xff]   ;;  %v13497_v20 = vld [vmem:[%s17094_s5 + $0x478] sm:$0xff]  }
 0x5ea   :  { %12091 = vmatprep.subr.bf16.mxu0 %v13778_v0  ;;  %12571 = vmatprep.subr.bf16.mxu1 %v13778_v0 }
 0x5ed   :  { %12092 = vmatpush3.bf16.msra.mxu0 %v13445_v62  ;;  %12572 = vmatpush3.bf16.msra.mxu1 %v13446_v49  ;;  %v13498_v62 = vld [vmem:[%s17094_s5 + $0x438] sm:$0xff]   ;;  %v13499_v49 = vld [vmem:[%s17094_s5 + $0x480] sm:$0xff]  }
 0x5ee   :  { %12093 = vmatprep.subr.bf16.mxu0 %v13778_v0  ;;  %12573 = vmatprep.subr.bf16.mxu1 %v13778_v0 }
 0x5f1   :  { %12094 = vmatpush3.bf16.msra.mxu0 %v13447_v30  ;;  %12574 = vmatpush3.bf16.msra.mxu1 %v13448_v46  ;;  %v13500_v30 = vld [vmem:[%s17094_s5 + $0x440] sm:$0xff]   ;;  %v5170_v46 = vrot.slane %v16299_v21, 1 }
 0x5f2   :  { %12095 = vmatprep.subr.bf16.mxu0 %v13778_v0  ;;  %12575 = vmatprep.subr.bf16.mxu1 %v13778_v0 }
 0x5f5   :  { %12096 = vmatpush3.bf16.msra.mxu0 %v13449_v22  ;;  %12576 = vmatpush3.bf16.msra.mxu1 %v13450_v26  ;;  %v7752_v22 = vshrl.u32 %v16372_v38, 16  ;;  %v13501_v26 = vld [vmem:[%s17094_s5 + $0x488] sm:$0xff]  }
 0x5f6   :  { %12101 = vmatprep.subr.bf16.mxu0 %v13778_v0  ;;  %12581 = vmatprep.subr.bf16.mxu1 %v13778_v0 }
 0x5f8   :  { %12098 = vmatmul.mubr.bf16.vlgmr.msra.gmra.mrb[100].mxu0 %v4844_v18  ;;  %12578 = vmatmul.mubr.bf16.vlgmr.msra.gmra.mrb[212].mxu1 %v7431_v16  ;;  %v13504_v18 = vld [vmem:[%s17094_s5 + $0x450] sm:$0xff]   ;;  %v13505_v16 = vld [vmem:[%s17094_s5 + $0x498] sm:$0xff]  }
 0x5f9   :  { %12102 = vmatpush3.bf16.msra.mxu0 %v13451_v5  ;;  %12582 = vmatpush3.bf16.msra.mxu1 %v13452_v63  ;;  %v13502_v5 = vld [vmem:[%s17094_s5 + $0x448] sm:$0xff]   ;;  %v13503_v63 = vld [vmem:[%s17094_s5 + $0x490] sm:$0xff]  }
 0x5fa   :  { %12103 = vmatprep.subr.bf16.mxu0 %v13778_v0  ;;  %12583 = vmatprep.subr.bf16.mxu1 %v13778_v0 }
 0x5fb   :  { %12117 = vmatprep.mubr.msk.bf16.mxu0 %vm13779_vm3, %v13778_v0  ;;  %12597 = vmatprep.mubr.msk.bf16.mxu1 %vm13779_vm3, %v13778_v0 }
 0x5fd   :  { %12104 = vmatpush3.bf16.msra.mxu0 %v13453_v2  ;;  %12584 = vmatpush3.bf16.msra.mxu1 %v13454_v52  ;;  %v13506_v2 = vld [vmem:[%s17094_s5 + $0x458] sm:$0xff]   ;;  %v13507_v52 = vld [vmem:[%s17094_s5 + $0x4a0] sm:$0xff]  }
 0x5fe   :  { %12105 = vmatprep.subr.bf16.mxu0 %v13778_v0  ;;  %12585 = vmatprep.subr.bf16.mxu1 %v13778_v0 }
 0x601   :  { %12106 = vmatpush3.bf16.msra.mxu0 %v13455_v10  ;;  %12586 = vmatpush3.bf16.msra.mxu1 %v13456_v27  ;;  %v13508_v10 = vld [vmem:[%s17094_s5 + $0x460] sm:$0xff]   ;;  %v13509_v27 = vld [vmem:[%s17094_s5 + $0x4a8] sm:$0xff]  }
 0x602   :  { %12107 = vmatprep.subr.bf16.mxu0 %v13778_v0  ;;  %12587 = vmatprep.subr.bf16.mxu1 %v13778_v0 }
 0x605   :  { %12108 = vmatpush3.bf16.msra.mxu0 %v13457_v8  ;;  %12588 = vmatpush3.bf16.msra.mxu1 %v13458_v43  ;;  %v13510_v8 = vld [vmem:[%s17094_s5 + $0x468] sm:$0xff]   ;;  %v13511_v43 = vld [vmem:[%s17094_s5 + $0x4b0] sm:$0xff]  }
 0x606   :  { %12109 = vmatprep.subr.bf16.mxu0 %v13778_v0  ;;  %12589 = vmatprep.subr.bf16.mxu1 %v13778_v0 }
 0x609   :  { %12110 = vmatpush3.bf16.msra.mxu0 %v13459_v11  ;;  %12590 = vmatpush3.bf16.msra.mxu1 %v13460_v45  ;;  %v13512_v11 = vld [vmem:[%s17094_s5 + $0x470] sm:$0xff]   ;;  %v13513_v45 = vld [vmem:[%s17094_s5 + $0x4b8] sm:$0xff]  }
 0x60a   :  { %12111 = vmatprep.subr.bf16.mxu0 %v13778_v0  ;;  %12591 = vmatprep.subr.bf16.mxu1 %v13778_v0 }
 0x60d   :  { %12112 = vmatpush3.bf16.msra.mxu0 %v13461_v37  ;;  %12592 = vmatpush3.bf16.msra.mxu1 %v13462_v25  ;;  %v13514_v37 = vld [vmem:[%s17094_s5 + $0x478] sm:$0xff]   ;;  %v13515_v25 = vld [vmem:[%s17094_s5 + $0x4c0] sm:$0xff]  }
 0x60e   :  { %12113 = vmatprep.subr.bf16.mxu0 %v13778_v0  ;;  %12593 = vmatprep.subr.bf16.mxu1 %v13778_v0 }
 0x611   :  { %12114 = vmatpush3.bf16.msra.mxu0 %v13463_v39  ;;  %12594 = vmatpush3.bf16.msra.mxu1 %v13464_v17  ;;  %v13516_v39 = vld [vmem:[%s17094_s5 + $0x480] sm:$0xff]   ;;  %v5278_v17 = vrot.slane %v5060_v42, 1 }
 0x612   :  { %12115 = vmatprep.subr.bf16.mxu0 %v13778_v0  ;;  %12595 = vmatprep.subr.bf16.mxu1 %v13778_v0 }
 0x615   :  { %12116 = vmatpush3.bf16.msra.mxu0 %v13465_v9  ;;  %12596 = vmatpush3.bf16.msra.mxu1 %v13466_v61  ;;  %v7861_v9 = vrot.slane %v16372_v38, 1  ;;  %v13517_v61 = vld [vmem:[%s17094_s5 + $0x4c8] sm:$0xff]  }
 0x616   :  { %12121 = vmatprep.subr.bf16.mxu0 %v13778_v0  ;;  %12601 = vmatprep.subr.bf16.mxu1 %v13778_v0 }
 0x618   :  { %12118 = vmatmul.mubr.bf16.vlgmr.msra.gmra.mrb[100].mxu0 %v16299_v21  ;;  %12598 = vmatmul.mubr.bf16.vlgmr.msra.gmra.mrb[212].mxu1 %v7538_v33  ;;  %v13521_v33 = vld [vmem:[%s17094_s5 + $0x4d8] sm:$0xff]  }
 0x619   :  { %12122 = vmatpush3.bf16.msra.mxu0 %v13467_v31  ;;  %12602 = vmatpush3.bf16.msra.mxu1 %v13468_v53  ;;  %v13519_v31 = vld [vmem:[%s17094_s5 + $0x4d0] sm:$0xff]  }
 0x61a   :  { %12123 = vmatprep.subr.bf16.mxu0 %v13778_v0  ;;  %12603 = vmatprep.subr.bf16.mxu1 %v13778_v0  ;;  %v13520_v53 = vld [vmem:[%s17094_s5 + $0x490] sm:$0xff]  }
 0x61b   :  { %12137 = vmatprep.mubr.msk.bf16.mxu0 %vm13779_vm3, %v13778_v0  ;;  %12617 = vmatprep.mubr.msk.bf16.mxu1 %vm13779_vm3, %v13778_v0 }
 0x61d   :  { %12124 = vmatpush3.bf16.msra.mxu0 %v13469_v7  ;;  %12604 = vmatpush3.bf16.msra.mxu1 %v13470_v51  ;;  %v13522_v7 = vld [vmem:[%s17094_s5 + $0x498] sm:$0xff]   ;;  %v13523_v51 = vld [vmem:[%s17094_s5 + $0x4e0] sm:$0xff]  }
 0x61e   :  { %12125 = vmatprep.subr.bf16.mxu0 %v13778_v0  ;;  %12605 = vmatprep.subr.bf16.mxu1 %v13778_v0 }
 0x621   :  { %12126 = vmatpush3.bf16.msra.mxu0 %v13471_v56  ;;  %12606 = vmatpush3.bf16.msra.mxu1 %v13472_v6  ;;  %v13524_v56 = vld [vmem:[%s17094_s5 + $0x4a0] sm:$0xff]   ;;  %v13525_v6 = vld [vmem:[%s17094_s5 + $0x4e8] sm:$0xff]  }
 0x622   :  { %12127 = vmatprep.subr.bf16.mxu0 %v13778_v0  ;;  %12607 = vmatprep.subr.bf16.mxu1 %v13778_v0 }
 0x625   :  { %12128 = vmatpush3.bf16.msra.mxu0 %v13473_v58  ;;  %12608 = vmatpush3.bf16.msra.mxu1 %v13474_v41  ;;  %v13526_v58 = vld [vmem:[%s17094_s5 + $0x4a8] sm:$0xff]   ;;  %v13527_v41 = vld [vmem:[%s17094_s5 + $0x4f0] sm:$0xff]  }
 0x626   :  { %12129 = vmatprep.subr.bf16.mxu0 %v13778_v0  ;;  %12609 = vmatprep.subr.bf16.mxu1 %v13778_v0 }
 0x629   :  { %12130 = vmatpush3.bf16.msra.mxu0 %v13475_v35  ;;  %12610 = vmatpush3.bf16.msra.mxu1 %v13476_v44  ;;  %v13528_v35 = vld [vmem:[%s17094_s5 + $0x4b0] sm:$0xff]   ;;  %v13529_v44 = vld [vmem:[%s17094_s5 + $0x4f8] sm:$0xff]  }
 0x62a   :  { %12131 = vmatprep.subr.bf16.mxu0 %v13778_v0  ;;  %12611 = vmatprep.subr.bf16.mxu1 %v13778_v0 }
 0x62d   :  { %12132 = vmatpush3.bf16.msra.mxu0 %v13477_v29  ;;  %12612 = vmatpush3.bf16.msra.mxu1 %v13478_v55  ;;  %v13530_v29 = vld [vmem:[%s17094_s5 + $0x4b8] sm:$0xff]   ;;  %v13531_v55 = vld [vmem:[%s17094_s5 + $0x500] sm:$0xff]  }
 0x62e   :  { %12133 = vmatprep.subr.bf16.mxu0 %v13778_v0  ;;  %12613 = vmatprep.subr.bf16.mxu1 %v13778_v0 }
 0x631   :  { %12134 = vmatpush3.bf16.msra.mxu0 %v13479_v47  ;;  %12614 = vmatpush3.bf16.msra.mxu1 %v13480_v28  ;;  %v13532_v47 = vld [vmem:[%s17094_s5 + $0x4c0] sm:$0xff]   ;;  %v5386_v28 = vrot.slane %v16299_v21, 2  ;;  %v13535_v21 = vld [vmem:[%s17094_s5 + $0x510] sm:$0xff]  }
 0x632   :  { %12135 = vmatprep.subr.bf16.mxu0 %v13778_v0  ;;  %12615 = vmatprep.subr.bf16.mxu1 %v13778_v0 }
 0x635   :  { %12136 = vmatpush3.bf16.msra.mxu0 %v13481_v3  ;;  %12616 = vmatpush3.bf16.msra.mxu1 %v13482_v13  ;;  %v7968_v3 = vrot.slane %v7752_v22, 1  ;;  %v13533_v13 = vld [vmem:[%s17094_s5 + $0x508] sm:$0xff]  }
 0x636   :  { %12141 = vmatprep.subr.bf16.mxu0 %v13778_v0  ;;  %12621 = vmatprep.subr.bf16.mxu1 %v13778_v0 }
 0x638   :  { %12138 = vmatmul.mubr.bf16.vlgmr.msra.gmra.mrb[100].mxu0 %v5060_v42  ;;  %12618 = vmatmul.mubr.bf16.vlgmr.msra.gmra.mrb[212].mxu1 %v16372_v38  ;;  %v13538_v42 = vld [vmem:[%s17094_s5 + $0x4d8] sm:$0xff]  }
 0x639   :  { %12142 = vmatpush3.bf16.msra.mxu0 %v13483_v15  ;;  %12622 = vmatpush3.bf16.msra.mxu1 %v13484_v60  ;;  %v13536_v15 = vld [vmem:[%s17094_s5 + $0x4d0] sm:$0xff]   ;;  %v13537_v60 = vld [vmem:[%s17094_s5 + $0x518] sm:$0xff]  }
 0x63a   :  { %12143 = vmatprep.subr.bf16.mxu0 %v13778_v0  ;;  %12623 = vmatprep.subr.bf16.mxu1 %v13778_v0 }
 0x63b   :  { %12157 = vmatprep.mubr.msk.bf16.mxu0 %vm13779_vm3, %v13778_v0  ;;  %12637 = vmatprep.mubr.msk.bf16.mxu1 %vm13779_vm3, %v13778_v0 }
 0x63d   :  { %12144 = vmatpush3.bf16.msra.mxu0 %v13485_v50  ;;  %12624 = vmatpush3.bf16.msra.mxu1 %v13486_v59  ;;  %v13539_v50 = vld [vmem:[%s17094_s5 + $0x520] sm:$0xff]  }
 0x63e   :  { %12145 = vmatprep.subr.bf16.mxu0 %v13778_v0  ;;  %12625 = vmatprep.subr.bf16.mxu1 %v13778_v0  ;;  %v13540_v59 = vld [vmem:[%s17094_s5 + $0x4e0] sm:$0xff]  }
 0x641   :  { %12146 = vmatpush3.bf16.msra.mxu0 %v13487_v14  ;;  %12626 = vmatpush3.bf16.msra.mxu1 %v13488_v4  ;;  %v13541_v14 = vld [vmem:[%s17094_s5 + $0x528] sm:$0xff]  }
 0x642   :  { %12147 = vmatprep.subr.bf16.mxu0 %v13778_v0  ;;  %12627 = vmatprep.subr.bf16.mxu1 %v13778_v0  ;;  %v13542_v4 = vld [vmem:[%s17094_s5 + $0x4e8] sm:$0xff]  }
 0x645   :  { %12148 = vmatpush3.bf16.msra.mxu0 %v13489_v19  ;;  %12628 = vmatpush3.bf16.msra.mxu1 %v13490_v36  ;;  %v13543_v19 = vld [vmem:[%s17094_s5 + $0x530] sm:$0xff]  }
 0x646   :  { %12149 = vmatprep.subr.bf16.mxu0 %v13778_v0  ;;  %12629 = vmatprep.subr.bf16.mxu1 %v13778_v0  ;;  %v13544_v36 = vld [vmem:[%s17094_s5 + $0x4f0] sm:$0xff]  }
 0x649   :  { %12150 = vmatpush3.bf16.msra.mxu0 %v13491_v57  ;;  %12630 = vmatpush3.bf16.msra.mxu1 %v13492_v24  ;;  %v13545_v57 = vld [vmem:[%s17094_s5 + $0x538] sm:$0xff]  }
 0x64a   :  { %12151 = vmatprep.subr.bf16.mxu0 %v13778_v0  ;;  %12631 = vmatprep.subr.bf16.mxu1 %v13778_v0  ;;  %v13546_v24 = vld [vmem:[%s17094_s5 + $0x4f8] sm:$0xff]  }
 0x64d   :  { %12152 = vmatpush3.bf16.msra.mxu0 %v13493_v48  ;;  %12632 = vmatpush3.bf16.msra.mxu1 %v13494_v54  ;;  %v3306_v48 = vmax.f32 %v15243_v40, 0.0  ;;  %v13547_v54 = vld [vmem:[%s17094_s5 + $0x540] sm:$0xff]   ;;  %v8075_v40 = vrot.slane %v16372_v38, 2  ;;  %v13551_v38 = vld [vmem:[%s17094_s5 + $0x550] sm:$0xff]  }
 0x64e   :  { %12153 = vmatprep.subr.bf16.mxu0 %v13778_v0  ;;  %12633 = vmatprep.subr.bf16.mxu1 %v13778_v0 }
 0x651   :  { %12154 = vmatpush3.bf16.msra.mxu0 %v13495_v12  ;;  %12634 = vmatpush3.bf16.msra.mxu1 %v13496_v32  ;;  %v13548_v12 = vld [vmem:[%s17094_s5 + $0x500] sm:$0xff]   ;;  %v16661_v32 = vpack.c.bf16 %v3306_v48, %v3306_v48  ;;  %v13600_v48 = vld [vmem:[%s17094_s5 + $0x5d0] sm:$0xff]  }
 0x652   :  { %12155 = vmatprep.subr.bf16.mxu0 %v13778_v0  ;;  %12635 = vmatprep.subr.bf16.mxu1 %v13778_v0 }
 0x655   :  { %12156 = vmatpush3.bf16.msra.mxu0 %v13497_v20  ;;  %12636 = vmatpush3.bf16.msra.mxu1 %v13498_v62  ;;  %v13549_v20 = vld [vmem:[%s17094_s5 + $0x548] sm:$0xff]  }
 0x656   :  { %12161 = vmatprep.subr.bf16.mxu0 %v13778_v0  ;;  %12641 = vmatprep.subr.bf16.mxu1 %v13778_v0  ;;  %v13550_v62 = vld [vmem:[%s17094_s5 + $0x508] sm:$0xff]  }
 0x658   :  { %12158 = vmatmul.mubr.bf16.vlgmr.msra.gmra.mrb[100].mxu0 %v5170_v46  ;;  %12638 = vmatmul.mubr.bf16.vlgmr.msra.gmra.mrb[212].mxu1 %v7752_v22  ;;  %v13554_v46 = vld [vmem:[%s17094_s5 + $0x518] sm:$0xff]   ;;  %v13555_v22 = vld [vmem:[%s17094_s5 + $0x560] sm:$0xff]  }
 0x659   :  { %12162 = vmatpush3.bf16.msra.mxu0 %v13499_v49  ;;  %12642 = vmatpush3.bf16.msra.mxu1 %v13500_v30  ;;  %v13552_v49 = vld [vmem:[%s17094_s5 + $0x510] sm:$0xff]   ;;  %v13553_v30 = vld [vmem:[%s17094_s5 + $0x558] sm:$0xff]  }
 0x65a   :  { %12163 = vmatprep.subr.bf16.mxu0 %v13778_v0  ;;  %12643 = vmatprep.subr.bf16.mxu1 %v13778_v0 }
 0x65b   :  { %12177 = vmatprep.mubr.msk.bf16.mxu0 %vm13779_vm3, %v13778_v0  ;;  %12657 = vmatprep.mubr.msk.bf16.mxu1 %vm13779_vm3, %v13778_v0 }
 0x65d   :  { %12164 = vmatpush3.bf16.msra.mxu0 %v13501_v26  ;;  %12644 = vmatpush3.bf16.msra.mxu1 %v13502_v5  ;;  %v13556_v26 = vld [vmem:[%s17094_s5 + $0x520] sm:$0xff]   ;;  %v13557_v5 = vld [vmem:[%s17094_s5 + $0x568] sm:$0xff]  }
 0x65e   :  { %12165 = vmatprep.subr.bf16.mxu0 %v13778_v0  ;;  %12645 = vmatprep.subr.bf16.mxu1 %v13778_v0 }
 0x661   :  { %12166 = vmatpush3.bf16.msra.mxu0 %v13503_v63  ;;  %12646 = vmatpush3.bf16.msra.mxu1 %v13504_v18  ;;  %v13558_v63 = vld [vmem:[%s17094_s5 + $0x528] sm:$0xff]   ;;  %v13559_v18 = vld [vmem:[%s17094_s5 + $0x570] sm:$0xff]  }
 0x662   :  { %12167 = vmatprep.subr.bf16.mxu0 %v13778_v0  ;;  %12647 = vmatprep.subr.bf16.mxu1 %v13778_v0 }
 0x665   :  { %12168 = vmatpush3.bf16.msra.mxu0 %v13505_v16  ;;  %12648 = vmatpush3.bf16.msra.mxu1 %v13506_v2  ;;  %v13560_v16 = vld [vmem:[%s17094_s5 + $0x530] sm:$0xff]   ;;  %v13561_v2 = vld [vmem:[%s17094_s5 + $0x578] sm:$0xff]  }
 0x666   :  { %12169 = vmatprep.subr.bf16.mxu0 %v13778_v0  ;;  %12649 = vmatprep.subr.bf16.mxu1 %v13778_v0 }
 0x669   :  { %12170 = vmatpush3.bf16.msra.mxu0 %v13507_v52  ;;  %12650 = vmatpush3.bf16.msra.mxu1 %v13508_v10  ;;  %v13562_v52 = vld [vmem:[%s17094_s5 + $0x538] sm:$0xff]   ;;  %v3311_v10 = vmax.f32 %v15314_v1, 0.0  ;;  %v13565_v1 = vld [vmem:[%s17094_s5 + $0x588] sm:$0xff]  }
 0x66a   :  { %12171 = vmatprep.subr.bf16.mxu0 %v13778_v0  ;;  %12651 = vmatprep.subr.bf16.mxu1 %v13778_v0 }
 0x66d   :  { %12172 = vmatpush3.bf16.msra.mxu0 %v13509_v27  ;;  %12652 = vmatpush3.bf16.msra.mxu1 %v13510_v8  ;;  %v13563_v27 = vld [vmem:[%s17094_s5 + $0x580] sm:$0xff]  }
 0x66e   :  { %12173 = vmatprep.subr.bf16.mxu0 %v13778_v0  ;;  %12653 = vmatprep.subr.bf16.mxu1 %v13778_v0  ;;  %v13564_v8 = vld [vmem:[%s17094_s5 + $0x540] sm:$0xff]  }
 0x671   :  { %12174 = vmatpush3.bf16.msra.mxu0 %v13511_v43  ;;  %12654 = vmatpush3.bf16.msra.mxu1 %v13512_v11  ;;  %v16734_v43 = vpack.c.bf16 %v3311_v10, %v3311_v10  ;;  %v5602_v11 = vshrl.u32 %v16661_v32, 16  ;;  %v13617_v10 = vld [vmem:[%s17094_s5 + $0x630] sm:$0xff]  }
 0x672   :  { %12175 = vmatprep.subr.bf16.mxu0 %v13778_v0  ;;  %12655 = vmatprep.subr.bf16.mxu1 %v13778_v0 }
 0x675   :  { %12176 = vmatpush3.bf16.msra.mxu0 %v13513_v45  ;;  %12656 = vmatpush3.bf16.msra.mxu1 %v13514_v37  ;;  %v13566_v45 = vld [vmem:[%s17094_s5 + $0x548] sm:$0xff]   ;;  %v13567_v37 = vld [vmem:[%s17094_s5 + $0x590] sm:$0xff]  }
 0x676   :  { %12181 = vmatprep.subr.bf16.mxu0 %v13778_v0  ;;  %12661 = vmatprep.subr.bf16.mxu1 %v13778_v0 }
 0x678   :  { %12178 = vmatmul.mubr.bf16.vlgmr.msra.gmra.mrb[100].mxu0 %v5278_v17  ;;  %12658 = vmatmul.mubr.bf16.vlgmr.msra.gmra.mrb[212].mxu1 %v7861_v9  ;;  %v13570_v17 = vld [vmem:[%s17094_s5 + $0x558] sm:$0xff]   ;;  %v13571_v9 = vld [vmem:[%s17094_s5 + $0x5a0] sm:$0xff]  }
 0x679   :  { %12182 = vmatpush3.bf16.msra.mxu0 %v13515_v25  ;;  %12662 = vmatpush3.bf16.msra.mxu1 %v13516_v39  ;;  %v13568_v25 = vld [vmem:[%s17094_s5 + $0x550] sm:$0xff]   ;;  %v13569_v39 = vld [vmem:[%s17094_s5 + $0x598] sm:$0xff]  }
 0x67a   :  { %12183 = vmatprep.subr.bf16.mxu0 %v13778_v0  ;;  %12663 = vmatprep.subr.bf16.mxu1 %v13778_v0 }
 0x67b   :  { %12197 = vmatprep.mubr.msk.bf16.mxu0 %vm13779_vm3, %v13778_v0  ;;  %12677 = vmatprep.mubr.msk.bf16.mxu1 %vm13779_vm3, %v13778_v0 }
 0x67d   :  { %12184 = vmatpush3.bf16.msra.mxu0 %v13517_v61  ;;  %12664 = vmatpush3.bf16.msra.mxu1 %v13518_v23  ;;  %v13572_v61 = vld [vmem:[%s17094_s5 + $0x560] sm:$0xff]   ;;  %v13573_v23 = vld [vmem:[%s17094_s5 + $0x5a8] sm:$0xff]  }
 0x67e   :  { %12185 = vmatprep.subr.bf16.mxu0 %v13778_v0  ;;  %12665 = vmatprep.subr.bf16.mxu1 %v13778_v0 }
 0x681   :  { %12186 = vmatpush3.bf16.msra.mxu0 %v13519_v31  ;;  %12666 = vmatpush3.bf16.msra.mxu1 %v13520_v53  ;;  %v13574_v31 = vld [vmem:[%s17094_s5 + $0x568] sm:$0xff]   ;;  %v13575_v53 = vld [vmem:[%s17094_s5 + $0x5b0] sm:$0xff]  }
 0x682   :  { %12187 = vmatprep.subr.bf16.mxu0 %v13778_v0  ;;  %12667 = vmatprep.subr.bf16.mxu1 %v13778_v0 }
 0x685   :  { %12188 = vmatpush3.bf16.msra.mxu0 %v13521_v33  ;;  %12668 = vmatpush3.bf16.msra.mxu1 %v13522_v7  ;;  %v13576_v33 = vld [vmem:[%s17094_s5 + $0x570] sm:$0xff]   ;;  %v13577_v7 = vld [vmem:[%s17094_s5 + $0x5b8] sm:$0xff]  }
 0x686   :  { %12189 = vmatprep.subr.bf16.mxu0 %v13778_v0  ;;  %12669 = vmatprep.subr.bf16.mxu1 %v13778_v0 }
 0x689   :  { %12190 = vmatpush3.bf16.msra.mxu0 %v13523_v51  ;;  %12670 = vmatpush3.bf16.msra.mxu1 %v13524_v56  ;;  %v13578_v51 = vld [vmem:[%s17094_s5 + $0x578] sm:$0xff]   ;;  %v13579_v56 = vld [vmem:[%s17094_s5 + $0x5c0] sm:$0xff]  }
 0x68a   :  { %12191 = vmatprep.subr.bf16.mxu0 %v13778_v0  ;;  %12671 = vmatprep.subr.bf16.mxu1 %v13778_v0 }
 0x68d   :  { %12192 = vmatpush3.bf16.msra.mxu0 %v13525_v6  ;;  %12672 = vmatpush3.bf16.msra.mxu1 %v13526_v58  ;;  %v13580_v6 = vld [vmem:[%s17094_s5 + $0x580] sm:$0xff]   ;;  %v5712_v58 = vrot.slane %v16661_v32, 1 }
 0x68e   :  { %12193 = vmatprep.subr.bf16.mxu0 %v13778_v0  ;;  %12673 = vmatprep.subr.bf16.mxu1 %v13778_v0 }
 0x691   :  { %12194 = vmatpush3.bf16.msra.mxu0 %v13527_v41  ;;  %12674 = vmatpush3.bf16.msra.mxu1 %v13528_v35  ;;  %v8289_v41 = vshrl.u32 %v16734_v43, 16  ;;  %v13581_v35 = vld [vmem:[%s17094_s5 + $0x5c8] sm:$0xff]  }
 0x692   :  { %12195 = vmatprep.subr.bf16.mxu0 %v13778_v0  ;;  %12675 = vmatprep.subr.bf16.mxu1 %v13778_v0 }
 0x695   :  { %12196 = vmatpush3.bf16.msra.mxu0 %v13529_v44  ;;  %12676 = vmatpush3.bf16.msra.mxu1 %v13530_v29  ;;  %v13582_v44 = vld [vmem:[%s17094_s5 + $0x588] sm:$0xff]   ;;  %v13583_v29 = vld [vmem:[%s17094_s5 + $0x5d0] sm:$0xff]  }
 0x696   :  { %12201 = vmatprep.subr.bf16.mxu0 %v13778_v0  ;;  %12681 = vmatprep.subr.bf16.mxu1 %v13778_v0 }
 0x698   :  { %12198 = vmatmul.mubr.bf16.vlgmr.msra.gmra.mrb[100].mxu0 %v5386_v28  ;;  %12678 = vmatmul.mubr.bf16.vlgmr.msra.gmra.mrb[212].mxu1 %v7968_v3  ;;  %v13586_v28 = vld [vmem:[%s17094_s5 + $0x598] sm:$0xff]   ;;  %v13587_v3 = vld [vmem:[%s17094_s5 + $0x5e0] sm:$0xff]  }
 0x699   :  { %12202 = vmatpush3.bf16.msra.mxu0 %v13531_v55  ;;  %12682 = vmatpush3.bf16.msra.mxu1 %v13532_v47  ;;  %v13584_v55 = vld [vmem:[%s17094_s5 + $0x590] sm:$0xff]   ;;  %v13585_v47 = vld [vmem:[%s17094_s5 + $0x5d8] sm:$0xff]  }
 0x69a   :  { %12203 = vmatprep.subr.bf16.mxu0 %v13778_v0  ;;  %12683 = vmatprep.subr.bf16.mxu1 %v13778_v0 }
 0x69b   :  { %12217 = vmatprep.mubr.msk.bf16.mxu0 %vm13779_vm3, %v13778_v0  ;;  %12697 = vmatprep.mubr.msk.bf16.mxu1 %vm13779_vm3, %v13778_v0 }
 0x69d   :  { %12204 = vmatpush3.bf16.msra.mxu0 %v13533_v13  ;;  %12684 = vmatpush3.bf16.msra.mxu1 %v13534_v34  ;;  %v13588_v13 = vld [vmem:[%s17094_s5 + $0x5a0] sm:$0xff]   ;;  %v13589_v34 = vld [vmem:[%s17094_s5 + $0x5e8] sm:$0xff]  }
 0x69e   :  { %12205 = vmatprep.subr.bf16.mxu0 %v13778_v0  ;;  %12685 = vmatprep.subr.bf16.mxu1 %v13778_v0 }
 0x6a1   :  { %12206 = vmatpush3.bf16.msra.mxu0 %v13535_v21  ;;  %12686 = vmatpush3.bf16.msra.mxu1 %v13536_v15  ;;  %v13590_v21 = vld [vmem:[%s17094_s5 + $0x5a8] sm:$0xff]   ;;  %v13591_v15 = vld [vmem:[%s17094_s5 + $0x5f0] sm:$0xff]  }
 0x6a2   :  { %12207 = vmatprep.subr.bf16.mxu0 %v13778_v0  ;;  %12687 = vmatprep.subr.bf16.mxu1 %v13778_v0 }
 0x6a5   :  { %12208 = vmatpush3.bf16.msra.mxu0 %v13537_v60  ;;  %12688 = vmatpush3.bf16.msra.mxu1 %v13538_v42  ;;  %v13592_v60 = vld [vmem:[%s17094_s5 + $0x5b0] sm:$0xff]   ;;  %v13593_v42 = vld [vmem:[%s17094_s5 + $0x5f8] sm:$0xff]  }
 0x6a6   :  { %12209 = vmatprep.subr.bf16.mxu0 %v13778_v0  ;;  %12689 = vmatprep.subr.bf16.mxu1 %v13778_v0 }
 0x6a9   :  { %12210 = vmatpush3.bf16.msra.mxu0 %v13539_v50  ;;  %12690 = vmatpush3.bf16.msra.mxu1 %v13540_v59  ;;  %v13594_v50 = vld [vmem:[%s17094_s5 + $0x5b8] sm:$0xff]   ;;  %v13595_v59 = vld [vmem:[%s17094_s5 + $0x600] sm:$0xff]  }
 0x6aa   :  { %12211 = vmatprep.subr.bf16.mxu0 %v13778_v0  ;;  %12691 = vmatprep.subr.bf16.mxu1 %v13778_v0 }
 0x6ad   :  { %12212 = vmatpush3.bf16.msra.mxu0 %v13541_v14  ;;  %12692 = vmatpush3.bf16.msra.mxu1 %v13542_v4  ;;  %v13596_v14 = vld [vmem:[%s17094_s5 + $0x5c0] sm:$0xff]   ;;  %v5820_v4 = vrot.slane %v5602_v11, 1 }
 0x6ae   :  { %12213 = vmatprep.subr.bf16.mxu0 %v13778_v0  ;;  %12693 = vmatprep.subr.bf16.mxu1 %v13778_v0 }
 0x6b1   :  { %12214 = vmatpush3.bf16.msra.mxu0 %v13543_v19  ;;  %12694 = vmatpush3.bf16.msra.mxu1 %v13544_v36  ;;  %v8398_v19 = vrot.slane %v16734_v43, 1  ;;  %v13597_v36 = vld [vmem:[%s17094_s5 + $0x608] sm:$0xff]  }
 0x6b2   :  { %12215 = vmatprep.subr.bf16.mxu0 %v13778_v0  ;;  %12695 = vmatprep.subr.bf16.mxu1 %v13778_v0 }
 0x6b5   :  { %12216 = vmatpush3.bf16.msra.mxu0 %v13545_v57  ;;  %12696 = vmatpush3.bf16.msra.mxu1 %v13546_v24  ;;  %v13598_v57 = vld [vmem:[%s17094_s5 + $0x5c8] sm:$0xff]   ;;  %v13599_v24 = vld [vmem:[%s17094_s5 + $0x610] sm:$0xff]  }
 0x6b6   :  { %12221 = vmatprep.subr.bf16.mxu0 %v13778_v0  ;;  %12701 = vmatprep.subr.bf16.mxu1 %v13778_v0 }
 0x6b8   :  { %12218 = vmatmul.mubr.bf16.vlgmr.msra.gmra.mrb[100].mxu0 %v16661_v32  ;;  %12698 = vmatmul.mubr.bf16.vlgmr.msra.gmra.mrb[212].mxu1 %v8075_v40  ;;  %v13603_v40 = vld [vmem:[%s17094_s5 + $0x620] sm:$0xff]  }
 0x6b9   :  { %12222 = vmatpush3.bf16.msra.mxu0 %v13547_v54  ;;  %12702 = vmatpush3.bf16.msra.mxu1 %v13548_v12  ;;  %v13601_v54 = vld [vmem:[%s17094_s5 + $0x618] sm:$0xff]  }
 0x6ba   :  { %12223 = vmatprep.subr.bf16.mxu0 %v13778_v0  ;;  %12703 = vmatprep.subr.bf16.mxu1 %v13778_v0  ;;  %v13602_v12 = vld [vmem:[%s17094_s5 + $0x5d8] sm:$0xff]  }
 0x6bb   :  { %12237 = vmatprep.mubr.msk.bf16.mxu0 %vm13779_vm3, %v13778_v0  ;;  %12717 = vmatprep.mubr.msk.bf16.mxu1 %vm13779_vm3, %v13778_v0 }
 0x6bd   :  { %12224 = vmatpush3.bf16.msra.mxu0 %v13549_v20  ;;  %12704 = vmatpush3.bf16.msra.mxu1 %v13550_v62  ;;  %v13604_v20 = vld [vmem:[%s17094_s5 + $0x5e0] sm:$0xff]   ;;  %v13605_v62 = vld [vmem:[%s17094_s5 + $0x628] sm:$0xff]  }
 0x6be   :  { %12225 = vmatprep.subr.bf16.mxu0 %v13778_v0  ;;  %12705 = vmatprep.subr.bf16.mxu1 %v13778_v0 }
 0x6c1   :  { %12226 = vmatpush3.bf16.msra.mxu0 %v13551_v38  ;;  %12706 = vmatpush3.bf16.msra.mxu1 %v13552_v49  ;;  %v13606_v38 = vld [vmem:[%s17094_s5 + $0x5e8] sm:$0xff]   ;;  %v13607_v49 = vld [vmem:[%s17094_s5 + $0x630] sm:$0xff]  }
 0x6c2   :  { %12227 = vmatprep.subr.bf16.mxu0 %v13778_v0  ;;  %12707 = vmatprep.subr.bf16.mxu1 %v13778_v0 }
 0x6c5   :  { %12228 = vmatpush3.bf16.msra.mxu0 %v13553_v30  ;;  %12708 = vmatpush3.bf16.msra.mxu1 %v13554_v46  ;;  %v13608_v30 = vld [vmem:[%s17094_s5 + $0x5f0] sm:$0xff]   ;;  %v13609_v46 = vld [vmem:[%s17094_s5 + $0x638] sm:$0xff]  }
 0x6c6   :  { %12229 = vmatprep.subr.bf16.mxu0 %v13778_v0  ;;  %12709 = vmatprep.subr.bf16.mxu1 %v13778_v0 }
 0x6c9   :  { %12230 = vmatpush3.bf16.msra.mxu0 %v13555_v22  ;;  %12710 = vmatpush3.bf16.msra.mxu1 %v13556_v26  ;;  %v13610_v22 = vld [vmem:[%s17094_s5 + $0x5f8] sm:$0xff]   ;;  %v13611_v26 = vld [vmem:[%s17094_s5 + $0x600] sm:$0xff]  }
 0x6ca   :  { %12231 = vmatprep.subr.bf16.mxu0 %v13778_v0  ;;  %12711 = vmatprep.subr.bf16.mxu1 %v13778_v0 }
 0x6cd   :  { %12232 = vmatpush3.bf16.msra.mxu0 %v13557_v5  ;;  %12712 = vmatpush3.bf16.msra.mxu1 %v13558_v63  ;;  %v5928_v5 = vrot.slane %v16661_v32, 2  ;;  %v8505_v63 = vrot.slane %v8289_v41, 1  ;;  %v13613_v32 = vld [vmem:[%s17094_s5 + $0x610] sm:$0xff]  }
 0x6ce   :  { %12233 = vmatprep.subr.bf16.mxu0 %v13778_v0  ;;  %12713 = vmatprep.subr.bf16.mxu1 %v13778_v0 }
 0x6d1   :  { %12234 = vmatpush3.bf16.msra.mxu0 %v13559_v18  ;;  %12714 = vmatpush3.bf16.msra.mxu1 %v13560_v16  ;;  %v13612_v18 = vld [vmem:[%s17094_s5 + $0x608] sm:$0xff]   ;;  %v13614_v16 = vld [vmem:[%s17094_s5 + $0x618] sm:$0xff]  }
 0x6d2   :  { %12235 = vmatprep.subr.bf16.mxu0 %v13778_v0  ;;  %12715 = vmatprep.subr.bf16.mxu1 %v13778_v0 }
 0x6d5   :  { %12236 = vmatpush3.bf16.msra.mxu0 %v13561_v2  ;;  %12716 = vmatpush3.bf16.msra.mxu1 %v13562_v52  ;;  %v13615_v2 = vld [vmem:[%s17094_s5 + $0x620] sm:$0xff]   ;;  %v13616_v52 = vld [vmem:[%s17094_s5 + $0x628] sm:$0xff]  }
 0x6d6   :  { %12241 = vmatprep.subr.bf16.mxu0 %v13778_v0  ;;  %12721 = vmatprep.subr.bf16.mxu1 %v13778_v0 }
 0x6d8   :  { %12238 = vmatmul.mubr.bf16.vlgmr.msra.gmra.mrb[100].mxu0 %v5602_v11  ;;  %12718 = vmatmul.mubr.bf16.vlgmr.msra.gmra.mrb[212].mxu1 %v16734_v43 }
 0x6d9   :  { %12242 = vmatpush3.bf16.msra.mxu0 %v13563_v27  ;;  %12722 = vmatpush3.bf16.msra.mxu1 %v13564_v8  ;;  %v13618_v27 = vld [vmem:[%s17094_s5 + $0x638] sm:$0xff]   ;;  %v8612_v8 = vrot.slane %v16734_v43, 2  ;;  %v10521_v43 = vld [vmem:[%s17095_s6] ss:$0 sm:$0xff] }
 0x6da   :  { %12243 = vmatprep.subr.bf16.mxu0 %v13778_v0  ;;  %12723 = vmatprep.subr.bf16.mxu1 %v13778_v0 }
 0x6db   :  { %12257 = vmatprep.mubr.msk.bf16.mxu0 %vm13779_vm3, %v13778_v0  ;;  %12737 = vmatprep.mubr.msk.bf16.mxu1 %vm13779_vm3, %v13778_v0 }
 0x6dd   :  { %12244 = vmatpush3.bf16.msra.mxu0 %v13565_v1  ;;  %12724 = vmatpush3.bf16.msra.mxu1 %v13566_v45 }
 0x6de   :  { %12245 = vmatprep.subr.bf16.mxu0 %v13778_v0  ;;  %12725 = vmatprep.subr.bf16.mxu1 %v13778_v0 }
 0x6e1   :  { %12246 = vmatpush3.bf16.msra.mxu0 %v13567_v37  ;;  %12726 = vmatpush3.bf16.msra.mxu1 %v13568_v25 }
 0x6e2   :  { %12247 = vmatprep.subr.bf16.mxu0 %v13778_v0  ;;  %12727 = vmatprep.subr.bf16.mxu1 %v13778_v0 }
 0x6e5   :  { %12248 = vmatpush3.bf16.msra.mxu0 %v13569_v39  ;;  %12728 = vmatpush3.bf16.msra.mxu1 %v13570_v17 }
 0x6e6   :  { %12249 = vmatprep.subr.bf16.mxu0 %v13778_v0  ;;  %12729 = vmatprep.subr.bf16.mxu1 %v13778_v0 }
 0x6e9   :  { %12250 = vmatpush3.bf16.msra.mxu0 %v13571_v9  ;;  %12730 = vmatpush3.bf16.msra.mxu1 %v13572_v61 }
 0x6ea   :  { %12251 = vmatprep.subr.bf16.mxu0 %v13778_v0  ;;  %12731 = vmatprep.subr.bf16.mxu1 %v13778_v0 }
 0x6ed   :  { %12252 = vmatpush3.bf16.msra.mxu0 %v13573_v23  ;;  %12732 = vmatpush3.bf16.msra.mxu1 %v13574_v31 }
 0x6ee   :  { %12253 = vmatprep.subr.bf16.mxu0 %v13778_v0  ;;  %12733 = vmatprep.subr.bf16.mxu1 %v13778_v0 }
 0x6f1   :  { %12254 = vmatpush3.bf16.msra.mxu0 %v13575_v53  ;;  %12734 = vmatpush3.bf16.msra.mxu1 %v13576_v33  ;;  %v8717_v53 = vlaneseq }
 0x6f2   :  { %12255 = vmatprep.subr.bf16.mxu0 %v13778_v0  ;;  %12735 = vmatprep.subr.bf16.mxu1 %v13778_v0 }
 0x6f3   :  { %v8718_v33 = vand.u32 127, %v8717_v53 }
 0x6f5   :  { %12256 = vmatpush3.bf16.msra.mxu0 %v13577_v7  ;;  %12736 = vmatpush3.bf16.msra.mxu1 %v13578_v51  ;;  %vm8719_vm5 = vcmp.lt.s32.totalorder %v8718_v33, 32 }
 0x6f6   :  { %12261 = vmatprep.subr.bf16.mxu0 %v13778_v0  ;;  %12741 = vmatprep.subr.bf16.mxu1 %v13778_v0 }
 0x6f8   :  { %12258 = vmatmul.mubr.bf16.vlgmr.msra.gmra.mrb[100].mxu0 %v5712_v58  ;;  %12738 = vmatmul.mubr.bf16.vlgmr.msra.gmra.mrb[212].mxu1 %v8289_v41 }
 0x6f9   :  { %12262 = vmatpush3.bf16.msra.mxu0 %v13579_v56  ;;  %12742 = vmatpush3.bf16.msra.mxu1 %v13580_v6  ;;  %v10522_v56 = vsel %vm8719_vm5, 1.0, %v13778_v0 }
 0x6fa   :  { %12263 = vmatprep.subr.bf16.mxu0 %v13778_v0  ;;  %12743 = vmatprep.subr.bf16.mxu1 %v13778_v0 }
 0x6fb   :  { %12277 = vmatprep.mubr.msk.bf16.mxu0 %vm13779_vm3, %v13778_v0  ;;  %12757 = vmatprep.mubr.msk.bf16.mxu1 %vm13779_vm3, %v13778_v0 }
 0x6fd   :  { %12264 = vmatpush3.bf16.msra.mxu0 %v13581_v35  ;;  %12744 = vmatpush3.bf16.msra.mxu1 %v13582_v44  ;;  %v13619_v44 = vld [vmem:[#allocation6] sm:$0xff]  }
 0x6fe   :  { %12265 = vmatprep.subr.bf16.mxu0 %v13778_v0  ;;  %12745 = vmatprep.subr.bf16.mxu1 %v13778_v0 }
 0x701   :  { %12266 = vmatpush3.bf16.msra.mxu0 %v13583_v29  ;;  %12746 = vmatpush3.bf16.msra.mxu1 %v13584_v55  ;;  %v13620_v29 = vld [vmem:[#allocation6 + $0x8] sm:$0xff]   ;;  %v13621_v55 = vld [vmem:[#allocation6 + $0x10] sm:$0xff]  }
 0x702   :  { %12267 = vmatprep.subr.bf16.mxu0 %v13778_v0  ;;  %12747 = vmatprep.subr.bf16.mxu1 %v13778_v0 }
 0x705   :  { %12268 = vmatpush3.bf16.msra.mxu0 %v13585_v47  ;;  %12748 = vmatpush3.bf16.msra.mxu1 %v13586_v28  ;;  %v13622_v47 = vld [vmem:[#allocation6 + $0x18] sm:$0xff]   ;;  %v13623_v28 = vld [vmem:[#allocation6 + $0x20] sm:$0xff]  }
 0x706   :  { %12269 = vmatprep.subr.bf16.mxu0 %v13778_v0  ;;  %12749 = vmatprep.subr.bf16.mxu1 %v13778_v0 }
 0x709   :  { %12270 = vmatpush3.bf16.msra.mxu0 %v13587_v3  ;;  %12750 = vmatpush3.bf16.msra.mxu1 %v13588_v13  ;;  %v13624_v3 = vld [vmem:[#allocation6 + $0x28] sm:$0xff]   ;;  %v13627_v13 = vld [vmem:[#allocation8] sm:$0xff]  }
 0x70a   :  { %12271 = vmatprep.subr.bf16.mxu0 %v13778_v0  ;;  %12751 = vmatprep.subr.bf16.mxu1 %v13778_v0 }
 0x70d   :  { %12272 = vmatpush3.bf16.msra.mxu0 %v13589_v34  ;;  %12752 = vmatpush3.bf16.msra.mxu1 %v13590_v21  ;;  %v13628_v34 = vld [vmem:[#allocation8 + $0x8] sm:$0xff]   ;;  %v13625_v21 = vld [vmem:[#allocation6 + $0x30] sm:$0xff]  }
 0x70e   :  { %12273 = vmatprep.subr.bf16.mxu0 %v13778_v0  ;;  %12753 = vmatprep.subr.bf16.mxu1 %v13778_v0 }
 0x711   :  { %12274 = vmatpush3.bf16.msra.mxu0 %v13591_v15  ;;  %12754 = vmatpush3.bf16.msra.mxu1 %v13592_v60  ;;  %v13629_v15 = vld [vmem:[#allocation8 + $0x10] sm:$0xff]   ;;  %v13626_v60 = vld [vmem:[#allocation6 + $0x38] sm:$0xff]  }
 0x712   :  { %12275 = vmatprep.subr.bf16.mxu0 %v13778_v0  ;;  %12755 = vmatprep.subr.bf16.mxu1 %v13778_v0 }
 0x715   :  { %12276 = vmatpush3.bf16.msra.mxu0 %v13593_v42  ;;  %12756 = vmatpush3.bf16.msra.mxu1 %v13594_v50  ;;  %v13630_v42 = vld [vmem:[#allocation8 + $0x18] sm:$0xff]   ;;  %v13631_v50 = vld [vmem:[#allocation8 + $0x20] sm:$0xff]  }
 0x716   :  { %12281 = vmatprep.subr.bf16.mxu0 %v13778_v0  ;;  %12761 = vmatprep.subr.bf16.mxu1 %v13778_v0 }
 0x718   :  { %12278 = vmatmul.mubr.bf16.vlgmr.msra.gmra.mrb[100].mxu0 %v5820_v4  ;;  %12758 = vmatmul.mubr.bf16.vlgmr.msra.gmra.mrb[212].mxu1 %v8398_v19 }
 0x719   :  { %12282 = vmatpush3.bf16.msra.mxu0 %v13595_v59  ;;  %12762 = vmatpush3.bf16.msra.mxu1 %v13596_v14  ;;  %v13632_v59 = vld [vmem:[#allocation8 + $0x28] sm:$0xff]  }
 0x71a   :  { %12283 = vmatprep.subr.bf16.mxu0 %v13778_v0  ;;  %12763 = vmatprep.subr.bf16.mxu1 %v13778_v0 }
 0x71b   :  { %12297 = vmatprep.mubr.msk.bf16.mxu0 %vm13779_vm3, %v13778_v0  ;;  %12777 = vmatprep.mubr.msk.bf16.mxu1 %vm13779_vm3, %v13778_v0 }
 0x71d   :  { %12284 = vmatpush3.bf16.msra.mxu0 %v13597_v36  ;;  %12764 = vmatpush3.bf16.msra.mxu1 %v13598_v57  ;;  %v10523_v57 = vld [vmem:[%s17096_s7] ss:$0 sm:$0xff] }
 0x71e   :  { %12285 = vmatprep.subr.bf16.mxu0 %v13778_v0  ;;  %12765 = vmatprep.subr.bf16.mxu1 %v13778_v0 }
 0x721   :  { %12286 = vmatpush3.bf16.msra.mxu0 %v13599_v24  ;;  %12766 = vmatpush3.bf16.msra.mxu1 %v13600_v48  ;;  %v10524_v48 = vld [vmem:[%s17097_s8] ss:$0 sm:$0xff] }
 0x722   :  { %12287 = vmatprep.subr.bf16.mxu0 %v13778_v0  ;;  %12767 = vmatprep.subr.bf16.mxu1 %v13778_v0 }
 0x725   :  { %12288 = vmatpush3.bf16.msra.mxu0 %v13601_v54  ;;  %12768 = vmatpush3.bf16.msra.mxu1 %v13602_v12 }
 0x726   :  { %12289 = vmatprep.subr.bf16.mxu0 %v13778_v0  ;;  %12769 = vmatprep.subr.bf16.mxu1 %v13778_v0 }
 0x729   :  { %12290 = vmatpush3.bf16.msra.mxu0 %v13603_v40  ;;  %12770 = vmatpush3.bf16.msra.mxu1 %v13604_v20 }
 0x72a   :  { %12291 = vmatprep.subr.bf16.mxu0 %v13778_v0  ;;  %12771 = vmatprep.subr.bf16.mxu1 %v13778_v0 }
 0x72d   :  { %12292 = vmatpush3.bf16.msra.mxu0 %v13605_v62  ;;  %12772 = vmatpush3.bf16.msra.mxu1 %v13606_v38  ;;  %v13633_v62 = vld [vmem:[#allocation8 + $0x30] sm:$0xff]   ;;  %v13634_v38 = vld [vmem:[#allocation8 + $0x38] sm:$0xff]  }
 0x72e   :  { %12293 = vmatprep.subr.bf16.mxu0 %v13778_v0  ;;  %12773 = vmatprep.subr.bf16.mxu1 %v13778_v0 }
 0x731   :  { %12294 = vmatpush3.bf16.msra.mxu0 %v13607_v49  ;;  %12774 = vmatpush3.bf16.msra.mxu1 %v13608_v30  ;;  %v13635_v49 = vld [vmem:[%s17102_s13] ss:$8 sps:$4 sm:$0xff]   ;;  %v13637_v30 = vld [vmem:[%s17102_s13 + $0x4] ss:$8 sps:$4 sm:$0xff]  }
 0x732   :  { %12295 = vmatprep.subr.bf16.mxu0 %v13778_v0  ;;  %12775 = vmatprep.subr.bf16.mxu1 %v13778_v0 }
 0x735   :  { %12296 = vmatpush3.bf16.msra.mxu0 %v13609_v46  ;;  %12776 = vmatpush3.bf16.msra.mxu1 %v13610_v22  ;;  %v13640_v46 = vld [vmem:[%s17102_s13 + $0x14] ss:$8 sps:$4 sm:$0xff]   ;;  %v13638_v22 = vld [vmem:[%s17102_s13 + $0x10] ss:$8 sps:$4 sm:$0xff]  }
 0x736   :  { %12781 = vmatprep.subr.bf16.mxu1 %v13778_v0  ;;  %12801 = vmatprep.subr.bf16.mxu0 %v13778_v0 }
 0x738   :  { %12298 = vmatmul.mubr.bf16.vlgmr.msra.gmra.mrb[100].mxu0 %v5928_v5  ;;  %12778 = vmatmul.mubr.bf16.vlgmr.msra.gmra.mrb[212].mxu1 %v8505_v63  ;;  %v13646_v5 = vld [vmem:[%s17102_s13 + $0x34] ss:$8 sps:$4 sm:$0xff]   ;;  %v13644_v63 = vld [vmem:[%s17102_s13 + $0x30] ss:$8 sps:$4 sm:$0xff]  }
 0x739   :  { %12782 = vmatpush3.bf16.msra.mxu1 %v13611_v26  ;;  %12797 = vmatprep.mubr.msk.bf16.mxu1 %vm13779_vm3, %v13778_v0  ;;  %v13643_v26 = vld [vmem:[%s17102_s13 + $0x24] ss:$8 sps:$4 sm:$0xff]  }
 0x73a   :  { %12783 = vmatprep.subr.bf16.mxu1 %v13778_v0  ;;  %12817 = vmatprep.mubr.msk.bf16.mxu0 %vm13779_vm3, %v13778_v0 }
 0x73b   :  { %12802 = vmatpush3.bf16.msra.mxu0 %v13619_v44 }
 0x73c   :  { %12803 = vmatprep.subr.bf16.mxu0 %v13778_v0 }
 0x73d   :  { %12784 = vmatpush3.bf16.msra.mxu1 %v13612_v18  ;;  %v13649_v18 = vld [vmem:[%s17102_s13 + $0x44] ss:$8 sps:$4 sm:$0xff]  }
 0x73e   :  { %12785 = vmatprep.subr.bf16.mxu1 %v13778_v0 }
 0x73f   :  { %12804 = vmatpush3.bf16.msra.mxu0 %v13620_v29 }
 0x740   :  { %12805 = vmatprep.subr.bf16.mxu0 %v13778_v0 }
 0x741   :  { %12786 = vmatpush3.bf16.msra.mxu1 %v13613_v32  ;;  %v13647_v32 = vld [vmem:[%s17102_s13 + $0x40] ss:$8 sps:$4 sm:$0xff]  }
 0x742   :  { %12787 = vmatprep.subr.bf16.mxu1 %v13778_v0 }
 0x743   :  { %12806 = vmatpush3.bf16.msra.mxu0 %v13621_v55 }
 0x744   :  { %12807 = vmatprep.subr.bf16.mxu0 %v13778_v0 }
 0x745   :  { %12788 = vmatpush3.bf16.msra.mxu1 %v13614_v16  ;;  %v13652_v16 = vld [vmem:[%s17102_s13 + $0x54] ss:$8 sps:$4 sm:$0xff]  }
 0x746   :  { %12789 = vmatprep.subr.bf16.mxu1 %v13778_v0 }
 0x747   :  { %12808 = vmatpush3.bf16.msra.mxu0 %v13622_v47 }
 0x748   :  { %12809 = vmatprep.subr.bf16.mxu0 %v13778_v0 }
 0x749   :  { %12790 = vmatpush3.bf16.msra.mxu1 %v13615_v2  ;;  %v13650_v2 = vld [vmem:[%s17102_s13 + $0x50] ss:$8 sps:$4 sm:$0xff]  }
 0x74a   :  { %12791 = vmatprep.subr.bf16.mxu1 %v13778_v0 }
 0x74b   :  { %12810 = vmatpush3.bf16.msra.mxu0 %v13623_v28 }
 0x74c   :  { %12811 = vmatprep.subr.bf16.mxu0 %v13778_v0 }
 0x74d   :  { %12792 = vmatpush3.bf16.msra.mxu1 %v13616_v52  ;;  %v13655_v52 = vld [vmem:[%s17102_s13 + $0x64] ss:$8 sps:$4 sm:$0xff]  }
 0x74e   :  { %12793 = vmatprep.subr.bf16.mxu1 %v13778_v0 }
 0x74f   :  { %12812 = vmatpush3.bf16.msra.mxu0 %v13624_v3 }
 0x750   :  { %12813 = vmatprep.subr.bf16.mxu0 %v13778_v0 }
 0x751   :  { %12794 = vmatpush3.bf16.msra.mxu1 %v13617_v10  ;;  %v13653_v10 = vld [vmem:[%s17102_s13 + $0x60] ss:$8 sps:$4 sm:$0xff]  }
 0x752   :  { %12795 = vmatprep.subr.bf16.mxu1 %v13778_v0 }
 0x753   :  { %12814 = vmatpush3.bf16.msra.mxu0 %v13625_v21 }
 0x754   :  { %12815 = vmatprep.subr.bf16.mxu0 %v13778_v0 }
 0x755   :  { %12796 = vmatpush3.bf16.msra.mxu1 %v13618_v27  ;;  %v10525_v27 = vld [vmem:[%s17099_s10] ss:$0 sm:$0xff] }
 0x756   :  { %12821 = vmatprep.subr.bf16.mxu1 %v13778_v0 }
 0x757   :  { %12816 = vmatpush3.bf16.msra.mxu0 %v13626_v60 }
 0x758   :  { %12798 = vmatmul.mubr.bf16.vlgmr.msra.gmra.mrb[212].mxu1 %v8612_v8  ;;  %9084 = vmatprep.subr.bf16.mxu0 %v13637_v30 }
 0x759   :  { %12837 = vmatprep.mubr.msk.bf16.mxu1 %vm13779_vm3, %v13778_v0  ;;  %12822 = vmatpush3.bf16.msra.mxu1 %v13627_v13 }
 0x75a   :  { %12823 = vmatprep.subr.bf16.mxu1 %v13778_v0 }
 0x75d   :  { %12824 = vmatpush3.bf16.msra.mxu1 %v13628_v34 }
 0x75e   :  { %12825 = vmatprep.subr.bf16.mxu1 %v13778_v0 }
 0x761   :  { %12826 = vmatpush3.bf16.msra.mxu1 %v13629_v15 }
 0x762   :  { %12827 = vmatprep.subr.bf16.mxu1 %v13778_v0 }
 0x765   :  { %12828 = vmatpush3.bf16.msra.mxu1 %v13630_v42 }
 0x766   :  { %12829 = vmatprep.subr.bf16.mxu1 %v13778_v0 }
 0x769   :  { %12830 = vmatpush3.bf16.msra.mxu1 %v13631_v50  ;;  %v9131_v50 = vld [vmem:[%s17104_s15] sm:$0x3] }
 0x76a   :  { %12831 = vmatprep.subr.bf16.mxu1 %v13778_v0 }
 0x76d   :  { %12832 = vmatpush3.bf16.msra.mxu1 %v13632_v59 }
 0x76e   :  { %12833 = vmatprep.subr.bf16.mxu1 %v13778_v0 }
 0x771   :  { %12834 = vmatpush3.bf16.msra.mxu1 %v13633_v62 }
 0x772   :  { %12835 = vmatprep.subr.bf16.mxu1 %v13778_v0  ;;  %v13641_v0 = vld [vmem:[%s17102_s13 + $0x20] ss:$8 sps:$4 sm:$0xff]  }
 0x775   :  { %12836 = vmatpush3.bf16.msra.mxu1 %v13634_v38 }
 0x80b   :  { %v6012_v11 = vpop.f32.mrb[100].mxu0 }
 0x80c   :  { %6019 = vst [vmem:[#allocation2] sm:$0x1] %v6012_v11  ;;  %v12299_v1 = vpop.f32.mrb[101].mxu0 }
 0x80d   :  { %v6015_v45 = vpop.f32.mrb[102].mxu0 }
 0x80e   :  { %v12300_v37 = vpop.f32.mrb[103].mxu0 }
 0x82b   :  { %v8696_v25 = vpop.f32.mrb[212].mxu1 }
 0x82c   :  { %8703 = vst [vmem:[#allocation2 + $0x1] sm:$0x1] %v8696_v25  ;;  %v12799_v39 = vpop.f32.mrb[213].mxu1 }
 0x82d   :  { %v8699_v17 = vpop.f32.mrb[214].mxu1 }
 0x82e   :  { %v12800_v9 = vpop.f32.mrb[215].mxu1  ;;  %v13656_v17 = vld [vmem:[%s17102_s13 + $0x70] ss:$8 sps:$4 sm:$0xff]  }
 0x82f   :  { %v13658_v9 = vld [vmem:[%s17102_s13 + $0x74] ss:$8 sps:$4 sm:$0xff]  }
 0x833   :  { %v8704_v61 = vld [vmem:[#allocation2] sm:$0x3] }
 0x834   :  { %v8712_v23 = vadd.f32 %v10521_v43, %v8704_v61  ;;  %v13780_v43 = vmov 0   ;;  %v10534_v61 = vld [vmem:[%s17101_s12] ss:$0 sm:$0xff] }
 0x836   :  { %v8713_v31 = vsel %vm205_vm0, %v8712_v23, 0.0 }
 0x837   :  { %8714 = vadd.xlane.f32.xlu0 %v8713_v31 }
 0x8c4   :  { %v8715_v7 = vpop.xlane.xlu0 %8714 }
 0x8c5   :  { %v8716_v51 = vmul.f32 0.03125, %v8715_v7 }
 0x8c7   :  { %v8722_v6 = vsub.f32 %v8712_v23, %v8716_v51 }
 0x8c9   :  { %v8723_v58 = vmul.f32 %v10522_v56, %v8722_v6 }
 0x8cb   :  { %v8724_v41 = vmul.f32 %v8723_v58, %v8723_v58 }
 0x8cd   :  { %v8725_v35 = vsel %vm205_vm0, %v8724_v41, 0.0 }
 0x8ce   :  { %8726 = vadd.xlane.f32.xlu0 %v8725_v35  ;;  %v8992_v35 = vld [vmem:[%s17103_s14] sm:$0x3]  ;;  %s13781_s14 = smov [#allocation9]  }
 0x8cf   :  { %s9143_s25 = sshll.u32 %s13781_s14, 4  ;;  %s9144_s25 = int_to_ptr.vmem [resolvable:$true] %s9143_s25 }
 0x8d0   :  { %s13745_s18 = scalar_lea.vmem %s9144_s25, 32  ;;  %p13750_p11 = scmp.lt.s32.totalorder %s9144_s25, %s9144_s25 }
 0x8d1   :  { %p13746_p10 = scmp.ne.s32.totalorder %s9144_s25, %s13745_s18  ;;  %p13751_p12 = scmp.lt.s32.totalorder %s13745_s18, %s13745_s18 }
 0x8d3   :  { %p13752_p13 = por %p13751_p12, %p13750_p11 }
 0x8d5   :  { %p13753_p0 = pnand %p13752_p13, %p13746_p10 }
 0x95b   :  { %v8727_v14 = vpop.xlane.xlu0 %8726 }
 0x95c   :  { %v8728_v4 = vmul.f32 0.03125, %v8727_v14 }
 0x95e   :  { %v8729_v19 = vadd.f32 1e-05, %v8728_v4 }
 0x960   :  { %13659 = vrsqrt.f32 %v8729_v19 }
 0x96a   :  { %v13660_v36 = vpop.eup %13659 }
 0x96b   :  { %v8731_v24 = vmul.f32 %v13660_v36, %v8723_v58  ;;  %v8995_v58 = vshrl.u32 %v8717_v53, 7 }
 0x96d   :  { %v8739_v54 = vmul.f32 %v10523_v57, %v8731_v24  ;;  %v9000_v41 = vsub.s32 1, %v8995_v58  ;;  %v8996_v42 = vsub.s32 0, %v8995_v58 }
 0x96f   :  { %v8747_v12 = vadd.f32 %v10524_v48, %v8739_v54  ;;  %v9001_v44 = vrot.slane %v8992_v35, %v9000_v41  ;;  %v8997_v53 = vrot.slane %v8992_v35, %v8996_v42 }
 0x971   :  { %13661 = vtanh.f32 %v8747_v12 }
 0x97b   :  { %v13662_v40 = vpop.eup %13661 }
 0x97c   :  { %v8749_v20 = vpack.c.bf16 %v13662_v40, %v13662_v40 }
 0x97e   :  { %12818 = vmatmul.mubr.bf16.vlgmr.msra.gmra.mrb[104].mxu0 %v8749_v20 }
 0x97f   :  { %9085 = vmatpush1.bf16.msra.mxu0 %v13635_v49  ;;  %9116 = vmatprep.mubr.bf16.mxu0 %v13780_v43 }
 0x980   :  { %9086 = vmatprep.subr.bf16.mxu0 %v13640_v46 }
 0x983   :  { %9087 = vmatpush1.bf16.msra.mxu0 %v13638_v22 }
 0x984   :  { %9088 = vmatprep.subr.bf16.mxu0 %v13643_v26 }
 0x987   :  { %9089 = vmatpush1.bf16.msra.mxu0 %v13641_v0 }
 0x988   :  { %9090 = vmatprep.subr.bf16.mxu0 %v13646_v5 }
 0x98b   :  { %9091 = vmatpush1.bf16.msra.mxu0 %v13644_v63 }
 0x98c   :  { %9092 = vmatprep.subr.bf16.mxu0 %v13649_v18 }
 0x98f   :  { %9093 = vmatpush1.bf16.msra.mxu0 %v13647_v32 }
 0x990   :  { %9094 = vmatprep.subr.bf16.mxu0 %v13652_v16 }
 0x993   :  { %9095 = vmatpush1.bf16.msra.mxu0 %v13650_v2 }
 0x994   :  { %9096 = vmatprep.subr.bf16.mxu0 %v13655_v52 }
 0x997   :  { %9097 = vmatpush1.bf16.msra.mxu0 %v13653_v10 }
 0x998   :  { %9098 = vmatprep.subr.bf16.mxu0 %v13658_v9 }
 0x99b   :  { %9099 = vmatpush1.bf16.msra.mxu0 %v13656_v17 }
 0xa51   :  { %v8855_v8 = vpop.f32.mrb[104].mxu0 }
 0xa52   :  { %v8856_v11 = vadd.f32 %v10525_v27, %v8855_v8  ;;  %v12819_v1 = vpop.f32.mrb[105].mxu0 }
 0xa53   :  { %v8858_v45 = vpop.f32.mrb[106].mxu0 }
 0xa54   :  { %v8861_v37 = vmax.f32 %v8856_v11, 0.0  ;;  %v12820_v25 = vpop.f32.mrb[107].mxu0 }
 0xa56   :  { %v8862_v39 = vpack.c.bf16 %v8861_v37, %v8861_v37 }
 0xa58   :  { %12838 = vmatmul.mubr.bf16.vlgmr.msra.gmra.mrb[216].mxu1 %v8862_v39 }
 0xb2b   :  { %v8968_v23 = vpop.f32.mrb[216].mxu1 }
 0xb2c   :  { %v8969_v31 = vadd.f32 %v10534_v61, %v8968_v23  ;;  %v12839_v33 = vpop.f32.mrb[217].mxu1 }
 0xb2d   :  { %v8971_v7 = vpop.f32.mrb[218].mxu1 }
 0xb2e   :  { %v8974_v51 = vmax.f32 %v8969_v31, 0.0  ;;  %v12840_v56 = vpop.f32.mrb[219].mxu1 }
 0xb30   :  { %v8975_v6 = vpack.c.bf16 %v8974_v51, %v8974_v51 }
 0xb32   :  { %9117 = vmatmul.mubr.bf16.vlgmr.msra.gmra.mrb[108].mxu0 %v8975_v6 }
 0xc05   :  { %v9118_v29 = vpop.f32.mrb[108].mxu0 }
 0xc06   :  { %v9120_v55 = vpop.f32.mrb[109].mxu0  ;;  %v9119_v14 = vadd.f32 %v9118_v29, %v8997_v53 }
 0xc07   :  { %v9121_v47 = vadd.f32 %v9120_v55, %v9001_v44  ;;  %v9122_v28 = vpop.f32.mrb[110].mxu0 }
 0xc08   :  { %v9123_v3 = vpop.f32.mrb[111].mxu0 }
 0xc09   :  { %13663 = vtanh.f32 %v9121_v47 }
 0xc13   :  { %v13664_v13 = vpop.eup %13663 }
 0xc14   :  { %v9126_v34 = vadd.f32 1.0, %v13664_v13 }
 0xc16   :  { %v9127_v21 = vmul.f32 6.0, %v9126_v34 }
 0xc18   :  { %v9128_v15 = vadd.f32 -10.0, %v9127_v21 }
 0xc1a   :  { %v9129_v60 = vmul.f32 1.442695, %v9128_v15 }
 0xc1c   :  { %13665 = vpow2.f32 %v9129_v60 }
 0xc26   :  { %v13666_v59 = vpop.eup %13665 }
 0xc27   :  { %v9132_v4 = vmul.f32 %v13666_v59, %v9131_v50 }
 0xc29   :  { %v9133_v19 = vadd.f32 %v9132_v4, %v9119_v14 }
 0xc2b   :  { %13667 = vtanh.f32 %v9133_v19 }
 0xc35   :  { %v13668_v36 = vpop.eup %13667 }
 0xc36   :  { %9136 = vst [vmem:[#allocation9] sm:$0x3] %v13668_v36 }
 0xc37   :  { %13756 = shalt.err (!%p13753_p0)
}
 0xc38   :  { %s13757_s15 = scalar_lea.hbm %s17105_s16, 32 }
 0xc39   :  { %p13758_p1 = scmp.ne.s32.totalorder %s17105_s16, %s13757_s15  ;;  %p13761_p2 = scmp.lt.u32.totalorder %s13757_s15, %s17105_s16 }
 0xc3b   :  { %p13763_p3 = pnand %p13761_p2, %p13758_p1 }
 0xc3d   :  { %13766 = shalt.err (!%p13763_p3)
}
 0xc3e   :  { %9146 = dma.vmem_to_hbm [thread:$0]  %s9144_s25, 32, %s17105_s16, [#allocation5]  }
 0xc3f   :  { %13771 = dma.done.wait [#allocation5], 32  }
 0xc40   :  { %13772 = vsyncadd [#allocation5], 4294967264 }
 0xc41   :  { %9150 = vsyncpa [#allocation4], 1 }
 0xc42   :  { %9151 = vsyncpa [#allocation7], 1 }
 0xc43   :  { %9152 = vsyncpa [#allocation5], 1 }

</bundles_post_ra>
